<compile_context>
chip_gen: v7x
topology: tpu7x:2x2x1
jax: 0.10.0
libtpu: 0.0.40
codegen_flags: <defaults>
</compile_context>

<pallas_src>
import functools

import jax
import jax.numpy as jnp
from jax import lax
from jax.experimental import pallas as pl
from jax.experimental.pallas import tpu as pltpu


def _round_up(x, m):
    return (x + m - 1) // m * m


def _row_split(h, target=32):
    """Split H into >=2 row tiles when possible (megacore / VMEM bounding)."""
    best = (1, h)
    for th in range(min(target, h), 0, -1):
        if h % th == 0:
            nt = h // th
            if nt >= 2:
                return nt, th
            best = (nt, th)
    return best


def _cp(*sem):
    return pltpu.CompilerParams(dimension_semantics=sem,
                                vmem_limit_bytes=48 * 1024 * 1024)


# --------------------------------------------------------------------------
# Pallas kernels
# --------------------------------------------------------------------------

def _stem_kernel(x_ref, w_ref, s_ref, b_ref, o_ref):
    """Fused conv_00|conv_11: block-diag 1x1 conv + folded BN + ReLU."""
    acc = jnp.dot(x_ref[...].astype(jnp.bfloat16), w_ref[...],
                  preferred_element_type=jnp.float32)
    acc = acc * s_ref[...] + b_ref[...]
    o_ref[...] = jnp.maximum(acc, 0.0).astype(o_ref.dtype)


def _dwsep_kernel(x_ref, dw_ref, pw_ref, s_ref, b_ref, o_ref, *, ho, wo):
    """Depthwise 3x3 (valid) + pointwise 1x1 + per-branch BN + ReLU, fused.
    The two parallel branches are packed along channels (shared weights)."""
    xt = x_ref[0].astype(jnp.float32)                       # (Ho+2, Wo+2, C)
    c = xt.shape[-1]
    acc = jnp.zeros((ho, wo, c), jnp.float32)
    k = 0
    for di in range(3):
        for dj in range(3):
            acc = acc + xt[di:di + ho, dj:dj + wo, :] * dw_ref[k:k + 1, :]
            k += 1
    d2 = acc.reshape(ho * wo, c).astype(jnp.bfloat16)
    out = jnp.dot(d2, pw_ref[...], preferred_element_type=jnp.float32)
    out = out * s_ref[...] + b_ref[...]
    o_ref[0] = jnp.maximum(out, 0.0).astype(o_ref.dtype)


def _conv3x3_kernel(x_ref, w_ref, s_ref, b_ref, *rest, gate, th, wp, cin):
    """Dense 3x3 conv (padding=1) + BN as 3 accumulating K=3*Cin MXU dots
    (one W-shift per dj; H shifts are free leading-dim slices).  Row-tiled:
    this step produces rows [r*th, (r+1)*th) of the image.  Optional fused
    SCConv gate: out = conv_bn * sigmoid(gate)."""
    if gate:
        g_ref, o_ref = rest
    else:
        (o_ref,) = rest
    r0 = pl.program_id(1) * th
    xt = x_ref[0, pl.ds(r0, th + 2), :, :]                  # (th+2, wp+2, cin)
    acc = None
    for dj in range(3):
        sl = xt[:, dj:dj + wp, :]                           # (th+2, wp, cin)
        p = jnp.concatenate([sl[di:di + th] for di in range(3)], axis=-1)
        pb = p.reshape(th * wp, 3 * cin).astype(jnp.bfloat16)
        d = jnp.dot(pb, w_ref[dj], preferred_element_type=jnp.float32)
        acc = d if acc is None else acc + d
    acc = acc * s_ref[...] + b_ref[...]
    if gate:
        acc = acc * jax.nn.sigmoid(g_ref[0].astype(jnp.float32))
    o_ref[0] = acc.astype(o_ref.dtype)


def _scproj_kernel(x_ref, w_ref, s_ref, b_ref, id_ref, ab_ref, *, h):
    """SCConv conv1_a|conv1_b fused: one matmul, outputs pre-BN identity
    (conv1_a) and relu(BN(a))|relu(BN(b))."""
    acc = jnp.dot(x_ref[...], w_ref[...], preferred_element_type=jnp.float32)
    id_ref[...] = acc[:, :h].astype(id_ref.dtype)
    ab_ref[...] = jnp.maximum(acc * s_ref[...] + b_ref[...], 0.0
                              ).astype(ab_ref.dtype)


def _pam_proj_kernel(x_ref, w_ref, b_ref, q_ref, k_ref, v_ref, *, c8):
    """Fused PAM q|k|v projections (one matmul), bf16 outputs."""
    acc = jnp.dot(x_ref[...], w_ref[...], preferred_element_type=jnp.float32)
    acc = acc + b_ref[...]
    q_ref[...] = acc[:, :c8].astype(q_ref.dtype)
    k_ref[...] = acc[:, c8:2 * c8].astype(k_ref.dtype)
    v_ref[...] = acc[:, 2 * c8:].astype(v_ref.dtype)


def _pam_attn_kernel(q_ref, k_ref, v_ref, x_ref, gamma_ref, o_ref,
                     m_sc, l_sc, acc_sc, *, n_real, tk):
    """Flash-tiled PAM attention (online softmax over key tiles) with the
    gamma-residual fused into the finalize step."""
    ki = pl.program_id(2)

    @pl.when(ki == 0)
    def _():
        m_sc[...] = jnp.full_like(m_sc, -jnp.inf)
        l_sc[...] = jnp.zeros_like(l_sc)
        acc_sc[...] = jnp.zeros_like(acc_sc)

    s = lax.dot_general(q_ref[0], k_ref[0], (((1,), (1,)), ((), ())),
                        preferred_element_type=jnp.float32)     # (tq, tk)
    col = ki * tk + lax.broadcasted_iota(jnp.int32, s.shape, 1)
    s = jnp.where(col < n_real, s, -jnp.inf)
    m_prev = m_sc[0]
    m_new = jnp.maximum(m_prev, jnp.max(s, axis=-1, keepdims=True))
    a = jnp.exp(m_prev - m_new)
    p = jnp.exp(s - m_new)
    l_sc[0] = a * l_sc[0] + jnp.sum(p, axis=-1, keepdims=True)
    acc_sc[0] = a * acc_sc[0] + jnp.dot(p.astype(jnp.bfloat16), v_ref[0],
                                        preferred_element_type=jnp.float32)
    m_sc[0] = m_new

    @pl.when(ki == pl.num_programs(2) - 1)
    def _():
        attn = acc_sc[0] * pl.reciprocal(l_sc[0], approx=True)
        o_ref[0] = (gamma_ref[...] * attn + x_ref[0].astype(jnp.float32)
                    ).astype(o_ref.dtype)


def _classifier_kernel(a_ref, b_ref, w1_ref, b1_ref, w2_ref, b2_ref, o_ref):
    """Global average pool of the two SCConv branches + in-kernel concat +
    fc1 -> relu -> fc2 (dropout is eval)."""
    pa = jnp.mean(a_ref[...].astype(jnp.float32), axis=1)       # (B, h)
    pb = jnp.mean(b_ref[...].astype(jnp.float32), axis=1)       # (B, h)
    pooled = jnp.concatenate([pa, pb], axis=-1).astype(jnp.bfloat16)
    hid = jnp.dot(pooled, w1_ref[...],
                  preferred_element_type=jnp.float32) + b1_ref[...]
    hid = jnp.maximum(hid, 0.0)
    out = jnp.dot(hid.astype(jnp.bfloat16), w2_ref[...],
                  preferred_element_type=jnp.float32) + b2_ref[...]
    o_ref[...] = out


# --------------------------------------------------------------------------
# Wrappers (pallas_call with BlockSpecs / grids)
# --------------------------------------------------------------------------

def fused_stem(x2d, w, scale, bias, tm=1024):
    M, K = x2d.shape
    N = w.shape[1]
    tm = min(tm, _round_up(M, 8))
    Mp = _round_up(M, tm)
    if Mp != M:
        x2d = jnp.pad(x2d, ((0, Mp - M), (0, 0)))
    out = pl.pallas_call(
        _stem_kernel,
        out_shape=jax.ShapeDtypeStruct((Mp, N), jnp.bfloat16),
        grid=(Mp // tm,),
        in_specs=[pl.BlockSpec((tm, K), lambda i: (i, 0)),
                  pl.BlockSpec((K, N), lambda i: (0, 0)),
                  pl.BlockSpec((1, N), lambda i: (0, 0)),
                  pl.BlockSpec((1, N), lambda i: (0, 0))],
        out_specs=pl.BlockSpec((tm, N), lambda i: (i, 0)),
        compiler_params=_cp("parallel"),
    )(x2d, w.astype(jnp.bfloat16), scale.reshape(1, N), bias.reshape(1, N))
    return out[:M]


def dwsep_block(x_nhwc, dw_w2, pw_w2, scale, bias):
    """x_nhwc: (B, H, W, 2h) with both parallel branches packed on channels."""
    B, H, W, C = x_nhwc.shape
    Ho, Wo = H - 2, W - 2
    Wop = _round_up(Wo, 8)
    if Wop + 2 != W:
        x_nhwc = jnp.pad(x_nhwc, ((0, 0), (0, 0), (0, Wop + 2 - W), (0, 0)))
    Np = Ho * Wop
    out = pl.pallas_call(
        functools.partial(_dwsep_kernel, ho=Ho, wo=Wop),
        out_shape=jax.ShapeDtypeStruct((B, Np, C), jnp.bfloat16),
        grid=(B,),
        in_specs=[pl.BlockSpec((1, H, Wop + 2, C), lambda b: (b, 0, 0, 0)),
                  pl.BlockSpec((9, C), lambda b: (0, 0)),
                  pl.BlockSpec((C, C), lambda b: (0, 0)),
                  pl.BlockSpec((1, C), lambda b: (0, 0)),
                  pl.BlockSpec((1, C), lambda b: (0, 0))],
        out_specs=pl.BlockSpec((1, Np, C), lambda b: (b, 0, 0)),
        compiler_params=_cp("parallel"),
    )(x_nhwc, dw_w2, pw_w2.astype(jnp.bfloat16),
      scale.reshape(1, C), bias.reshape(1, C))
    if Wop != Wo:
        out = out.reshape(B, Ho, Wop, C)[:, :, :Wo, :].reshape(B, Ho * Wo, C)
    return out                                              # (B, Ho*Wo, C)


def conv3x3_bn(x_nhwc, w_hwio, scale, bias, gate=None):
    """3x3 conv (padding=1) + folded BN; optional fused SCConv gate.
    Grid (B, row_tiles); returns (B, H*W, Cout) bf16."""
    B, H, W, Cin = x_nhwc.shape
    Cout = w_hwio.shape[-1]
    Wp = _round_up(W, 8)
    xp = jnp.pad(x_nhwc, ((0, 0), (1, 1), (1, 1 + Wp - W), (0, 0)))
    wk = jnp.transpose(w_hwio, (1, 0, 2, 3)).reshape(3, 3 * Cin, Cout)
    wk = wk.astype(jnp.bfloat16)
    nt, th = _row_split(H)
    Np = H * Wp
    has_gate = gate is not None

    in_specs = [pl.BlockSpec((1, H + 2, Wp + 2, Cin), lambda b, r: (b, 0, 0, 0)),
                pl.BlockSpec((3, 3 * Cin, Cout), lambda b, r: (0, 0, 0)),
                pl.BlockSpec((1, Cout), lambda b, r: (0, 0)),
                pl.BlockSpec((1, Cout), lambda b, r: (0, 0))]
    args = [xp, wk, scale.reshape(1, Cout), bias.reshape(1, Cout)]
    if has_gate:
        if Wp != W:
            gate = gate.reshape(B, H, W, Cout)
            gate = jnp.pad(gate, ((0, 0), (0, 0), (0, Wp - W), (0, 0)))
            gate = gate.reshape(B, Np, Cout)
        in_specs.append(pl.BlockSpec((1, th * Wp, Cout), lambda b, r: (b, r, 0)))
        args.append(gate.astype(jnp.bfloat16))

    out = pl.pallas_call(
        functools.partial(_conv3x3_kernel, gate=has_gate, th=th, wp=Wp, cin=Cin),
        out_shape=jax.ShapeDtypeStruct((B, Np, Cout), jnp.bfloat16),
        grid=(B, nt),
        in_specs=in_specs,
        out_specs=pl.BlockSpec((1, th * Wp, Cout), lambda b, r: (b, r, 0)),
        compiler_params=_cp("parallel", "parallel"),
    )(*args)
    if Wp != W:
        out = out.reshape(B, H, Wp, Cout)[:, :, :W, :].reshape(B, H * W, Cout)
    return out


def sc_projection(x2d, w_ab, scale_ab, bias_ab, h, tm=1024):
    M, K = x2d.shape
    N2 = w_ab.shape[1]
    tm = min(tm, _round_up(M, 8))
    Mp = _round_up(M, tm)
    if Mp != M:
        x2d = jnp.pad(x2d, ((0, Mp - M), (0, 0)))
    identity, ab = pl.pallas_call(
        functools.partial(_scproj_kernel, h=h),
        out_shape=(jax.ShapeDtypeStruct((Mp, h), jnp.bfloat16),
                   jax.ShapeDtypeStruct((Mp, N2), jnp.bfloat16)),
        grid=(Mp // tm,),
        in_specs=[pl.BlockSpec((tm, K), lambda i: (i, 0)),
                  pl.BlockSpec((K, N2), lambda i: (0, 0)),
                  pl.BlockSpec((1, N2), lambda i: (0, 0)),
                  pl.BlockSpec((1, N2), lambda i: (0, 0))],
        out_specs=(pl.BlockSpec((tm, h), lambda i: (i, 0)),
                   pl.BlockSpec((tm, N2), lambda i: (i, 0))),
        compiler_params=_cp("parallel"),
    )(x2d, w_ab.astype(jnp.bfloat16),
      scale_ab.reshape(1, N2), bias_ab.reshape(1, N2))
    return identity[:M], ab[:M]


def pam_module(x_bnc, wq, bq, wk, bk, wv, bv, gamma, t=256, tm=1024):
    B, N, C2 = x_bnc.shape
    C8 = wq.shape[1]
    t = min(t, _round_up(N, 8))
    Npad = _round_up(N, t)
    xpad = x_bnc if Npad == N else jnp.pad(x_bnc, ((0, 0), (0, Npad - N), (0, 0)))

    # ---- fused q|k|v projection (single matmul) ----
    wqkv = jnp.concatenate([wq, wk, wv], axis=1).astype(jnp.bfloat16)
    bqkv = jnp.concatenate([bq, bk, bv]).reshape(1, -1)
    Nq = 2 * C8 + C2
    M = B * Npad
    x2d = xpad.reshape(M, C2)
    tmm = min(tm, _round_up(M, 8))
    Mp = _round_up(M, tmm)
    if Mp != M:
        x2d = jnp.pad(x2d, ((0, Mp - M), (0, 0)))
    q, k, v = pl.pallas_call(
        functools.partial(_pam_proj_kernel, c8=C8),
        out_shape=(jax.ShapeDtypeStruct((Mp, C8), jnp.bfloat16),
                   jax.ShapeDtypeStruct((Mp, C8), jnp.bfloat16),
                   jax.ShapeDtypeStruct((Mp, C2), jnp.bfloat16)),
        grid=(Mp // tmm,),
        in_specs=[pl.BlockSpec((tmm, C2), lambda i: (i, 0)),
                  pl.BlockSpec((C2, Nq), lambda i: (0, 0)),
                  pl.BlockSpec((1, Nq), lambda i: (0, 0))],
        out_specs=(pl.BlockSpec((tmm, C8), lambda i: (i, 0)),
                   pl.BlockSpec((tmm, C8), lambda i: (i, 0)),
                   pl.BlockSpec((tmm, C2), lambda i: (i, 0))),
        compiler_params=_cp("parallel"),
    )(x2d, wqkv, bqkv)
    q = q[:M].reshape(B, Npad, C8)
    k = k[:M].reshape(B, Npad, C8)
    v = v[:M].reshape(B, Npad, C2)

    # ---- flash-tiled attention + gamma residual ----
    nt = Npad // t
    out = pl.pallas_call(
        functools.partial(_pam_attn_kernel, n_real=N, tk=t),
        out_shape=jax.ShapeDtypeStruct((B, Npad, C2), jnp.bfloat16),
        grid=(B, nt, nt),
        in_specs=[pl.BlockSpec((1, t, C8), lambda b, qi, ki: (b, qi, 0)),
                  pl.BlockSpec((1, t, C8), lambda b, qi, ki: (b, ki, 0)),
                  pl.BlockSpec((1, t, C2), lambda b, qi, ki: (b, ki, 0)),
                  pl.BlockSpec((1, t, C2), lambda b, qi, ki: (b, qi, 0)),
                  pl.BlockSpec((1, 1), lambda b, qi, ki: (0, 0))],
        out_specs=pl.BlockSpec((1, t, C2), lambda b, qi, ki: (b, qi, 0)),
        scratch_shapes=[pltpu.VMEM((1, t, 1), jnp.float32),
                        pltpu.VMEM((1, t, 1), jnp.float32),
                        pltpu.VMEM((1, t, C2), jnp.float32)],
        compiler_params=_cp("parallel", "parallel", "arbitrary"),
    )(q, k, v, xpad, gamma.reshape(1, 1))
    return out[:, :N, :]


def classifier(out1, out2, w1, b1, w2, b2):
    B, N, Cp = out1.shape
    Hd = w1.shape[1]
    ncls = w2.shape[1]
    return pl.pallas_call(
        _classifier_kernel,
        out_shape=jax.ShapeDtypeStruct((B, ncls), jnp.float32),
        grid=(1,),
        in_specs=[pl.BlockSpec((B, N, Cp), lambda i: (0, 0, 0)),
                  pl.BlockSpec((B, N, Cp), lambda i: (0, 0, 0)),
                  pl.BlockSpec((2 * Cp, Hd), lambda i: (0, 0)),
                  pl.BlockSpec((1, Hd), lambda i: (0, 0)),
                  pl.BlockSpec((Hd, ncls), lambda i: (0, 0)),
                  pl.BlockSpec((1, ncls), lambda i: (0, 0))],
        out_specs=pl.BlockSpec((B, ncls), lambda i: (0, 0)),
        compiler_params=_cp("arbitrary"),
    )(out1, out2, w1.astype(jnp.bfloat16), b1.reshape(1, Hd),
      w2.astype(jnp.bfloat16), b2.reshape(1, ncls))


# --------------------------------------------------------------------------
# Parameters (deterministic, matching the module __init__ shapes)
# --------------------------------------------------------------------------

def init_params(key, hsi_ch, msi_ch, hidden, num_classes, num_parallel=2):
    C2 = hidden * 2
    ks = jax.random.split(key, 20)

    def w(k, shape, scale=0.1):
        return scale * jax.random.normal(k, shape, jnp.float32)

    # eval-mode BatchNorm with default init -> scale = 1/sqrt(1+eps), shift = 0
    bn_s = lambda c: jnp.full((c,), 1.0 / jnp.sqrt(1.0 + 1e-5), jnp.float32)
    bn_b = lambda c: jnp.zeros((c,), jnp.float32)

    return dict(
        # conv_00 / conv_11 (1x1, no bias) + BN
        w00=w(ks[0], (hsi_ch, hidden)), bn00_s=bn_s(hidden), bn00_b=bn_b(hidden),
        w11=w(ks[1], (msi_ch, hidden)), bn11_s=bn_s(hidden), bn11_b=bn_b(hidden),
        # shared DepthwiseSeparableConv; dw_w rows ordered k = di*3 + dj
        # TODO(synk): real PyTorch checkpoints need the (C,1,3,3)->(9,C) taps
        # and (Cout,Cin,kH,kW)->(kH,kW,Cin,Cout) conv weights permuted to match.
        dw_w=w(ks[2], (9, hidden)),
        pw_w=w(ks[3], (hidden, hidden)),
        # per-branch BatchNorm2dParallel
        bn1_0_s=bn_s(hidden), bn1_0_b=bn_b(hidden),
        bn1_1_s=bn_s(hidden), bn1_1_b=bn_b(hidden),
        alpha=jnp.ones((num_parallel,), jnp.float32),
        # PAM module (1x1 convs have bias; gamma initialized to 0 as in reference)
        pam_q_w=w(ks[4], (C2, C2 // 8)), pam_q_b=w(ks[5], (C2 // 8,), 0.01),
        pam_k_w=w(ks[6], (C2, C2 // 8)), pam_k_b=w(ks[7], (C2 // 8,), 0.01),
        pam_v_w=w(ks[8], (C2, C2)),      pam_v_b=w(ks[9], (C2,), 0.01),
        pam_gamma=jnp.zeros((1,), jnp.float32),
        # SCConv
        w1a=w(ks[10], (C2, hidden)), bn1a_s=bn_s(hidden), bn1a_b=bn_b(hidden),
        w1b=w(ks[11], (C2, hidden)), bn1b_s=bn_s(hidden), bn1b_b=bn_b(hidden),
        k1_w=w(ks[12], (3, 3, hidden, hidden)), k1_s=bn_s(hidden), k1_b=bn_b(hidden),
        k2_w=w(ks[13], (3, 3, hidden, hidden)), k2_s=bn_s(hidden), k2_b=bn_b(hidden),
        k3_w=w(ks[14], (3, 3, hidden, hidden)), k3_s=bn_s(hidden), k3_b=bn_b(hidden),
        k4_w=w(ks[15], (3, 3, hidden, hidden)), k4_s=bn_s(hidden), k4_b=bn_b(hidden),
        # HSIMSIClassifier
        fc1_w=w(ks[16], (C2, hidden)), fc1_b=jnp.zeros((hidden,), jnp.float32),
        fc2_w=w(ks[17], (hidden, num_classes)),
        fc2_b=jnp.zeros((num_classes,), jnp.float32),
    )


# --------------------------------------------------------------------------
# Forward pass (mirrors HSIMSINet.forward)
# --------------------------------------------------------------------------

def hsimsi_forward(p, x_hsi_nchw, y_msi_nchw):
    # NCHW (PyTorch) -> NHWC (kernel layout)
    x = jnp.transpose(x_hsi_nchw, (0, 2, 3, 1)).astype(jnp.float32)
    y = jnp.transpose(y_msi_nchw, (0, 2, 3, 1)).astype(jnp.float32)
    B, H, W, Cx = x.shape
    Cy = y.shape[-1]
    hdn = p['w00'].shape[1]
    C2 = 2 * hdn

    # conv_00 | conv_11 fused: one block-diagonal 1x1 conv + BN + ReLU,
    # both branches packed along channels [HSI | MSI].
    xy = jnp.concatenate([x, y], axis=-1)
    w_stem = jnp.zeros((Cx + Cy, C2), jnp.float32)
    w_stem = w_stem.at[:Cx, :hdn].set(p['w00']).at[Cx:, hdn:].set(p['w11'])
    s_stem = jnp.concatenate([p['bn00_s'], p['bn11_s']])
    b_stem = jnp.concatenate([p['bn00_b'], p['bn11_b']])
    stem = fused_stem(xy.reshape(B * H * W, Cx + Cy), w_stem, s_stem, b_stem)
    stem = stem.reshape(B, H, W, C2)                              # bf16

    # ModuleParallel(DepthwiseSeparableConv, shared weights) + per-branch BN
    # + ReLU, branches kept channel-packed -> xcat for free.
    dw2 = jnp.concatenate([p['dw_w'], p['dw_w']], axis=1)         # (9, 2h)
    pw2 = jnp.zeros((C2, C2), jnp.float32)
    pw2 = pw2.at[:hdn, :hdn].set(p['pw_w']).at[hdn:, hdn:].set(p['pw_w'])
    s1 = jnp.concatenate([p['bn1_0_s'], p['bn1_1_s']])
    b1 = jnp.concatenate([p['bn1_0_b'], p['bn1_1_b']])
    xcat = dwsep_block(stem, dw2, pw2, s1, b1)                    # (B, N, 2h)
    Ho, Wo = H - 2, W - 2
    N = Ho * Wo

    # TODO(synk): `block` residual layers (self.layer) and External_attention —
    # classes not provided with the module source; treated as identity.
    alpha_soft = jax.nn.softmax(p['alpha'])

    # PAM (reference hard-codes in_dim=256, only consistent for hidden=128; we
    # use in_dim = 2*hidden).  Flash-tiled attention, gamma-residual fused.
    xatt = pam_module(xcat, p['pam_q_w'], p['pam_q_b'],
                      p['pam_k_w'], p['pam_k_b'],
                      p['pam_v_w'], p['pam_v_b'], p['pam_gamma'])  # (B,N,C2)

    # ---- SCConv ----
    wab = jnp.concatenate([p['w1a'], p['w1b']], axis=1)
    sab = jnp.concatenate([p['bn1a_s'], p['bn1b_s']])
    bab = jnp.concatenate([p['bn1a_b'], p['bn1b_b']])
    identity, ab = sc_projection(xatt.reshape(B * N, C2), wab, sab, bab, hdn)
    out_a = ab[:, :hdn].reshape(B, Ho, Wo, hdn)
    out_b = ab[:, hdn:].reshape(B, Ho, Wo, hdn)
    identity = identity.reshape(B, N, hdn)

    # k2: AvgPool(2,2) -> conv3x3(pad=1)+BN -> nearest 2x upsample; pre-added
    # to identity so the k3 gate is a single bf16 stream.
    pooled = out_a.astype(jnp.float32).reshape(
        B, Ho // 2, 2, Wo // 2, 2, hdn).mean(axis=(2, 4)).astype(jnp.bfloat16)
    k2 = conv3x3_bn(pooled, p['k2_w'], p['k2_s'], p['k2_b'])
    k2 = k2.reshape(B, Ho // 2, Wo // 2, hdn)
    k2_up = jnp.repeat(jnp.repeat(k2, 2, axis=1), 2, axis=2).reshape(B, N, hdn)
    gate_pre = (identity.astype(jnp.float32) + k2_up.astype(jnp.float32)
                ).astype(jnp.bfloat16)
    # TODO(synk): the nearest 2x upsample + add could additionally be folded
    # into the gated k3 kernel via in-kernel index math.

    # k3 conv + SCConv gate fused: k3(out_a) * sigmoid(identity + up(k2))
    gated = conv3x3_bn(out_a, p['k3_w'], p['k3_s'], p['k3_b'], gate=gate_pre)
    out1 = conv3x3_bn(gated.reshape(B, Ho, Wo, hdn),
                      p['k4_w'], p['k4_s'], p['k4_b'])
    out2 = conv3x3_bn(out_b, p['k1_w'], p['k1_s'], p['k1_b'])

    # adaptive avg pool (1x1) + HSIMSIClassifier (fc1 -> relu -> fc2) fused;
    # the channel concat of the two SCConv branches happens in-kernel.
    logits = classifier(out1, out2, p['fc1_w'], p['fc1_b'],
                        p['fc2_w'], p['fc2_b'])
    return logits, alpha_soft


# --------------------------------------------------------------------------

if __name__ == "__main__":
    key = jax.random.PRNGKey(0)
    B, HSI_C, MSI_C, HIDDEN, NCLS = 2, 8, 4, 32, 16
    H = W = 10   # -> 8x8 after the valid 3x3 depthwise conv (even, for AvgPool2d(2))

    kp, kx, ky = jax.random.split(key, 3)
    params = init_params(kp, HSI_C, MSI_C, HIDDEN, NCLS)
    x = jax.random.normal(kx, (B, HSI_C, H, W), jnp.float32)   # HSI, NCHW
    y = jax.random.normal(ky, (B, MSI_C, H, W), jnp.float32)   # MSI, NCHW

    logits, alpha_soft = jax.jit(hsimsi_forward)(params, x, y)
    jax.block_until_ready(logits)
    jax.block_until_ready(alpha_soft)

    assert logits.shape == (B, NCLS)
    assert alpha_soft.shape == (2,)
    print("KERNEL_OK")
</pallas_src>

<mosaic_0001>
module attributes {stable_mosaic.version = 11 : i64} {
  func.func @_stem_kernel(%arg0: i32, %arg1: memref<200x12xf32, #tpu.memory_space<vmem>>, %arg2: memref<12x64xbf16, #tpu.memory_space<vmem>>, %arg3: memref<1x64xf32, #tpu.memory_space<vmem>>, %arg4: memref<1x64xf32, #tpu.memory_space<vmem>>, %arg5: memref<200x64xbf16, #tpu.memory_space<vmem>>) attributes {dimension_semantics = [#tpu.dimension_semantics<parallel>], iteration_bounds = array<i64: 1>, scalar_prefetch = 0 : i64, scratch_operands = 0 : i64, tpu.core_type = #tpu.core_type<tc>, window_params = [{transform_indices = @transform_0, window_bounds = array<i64: 200, 12>}, {pipeline_mode = #tpu.pipeline_mode<synchronous>, transform_indices = @transform_1, window_bounds = array<i64: 12, 64>}, {pipeline_mode = #tpu.pipeline_mode<synchronous>, transform_indices = @transform_2, window_bounds = array<i64: 1, 64>}, {pipeline_mode = #tpu.pipeline_mode<synchronous>, transform_indices = @transform_3, window_bounds = array<i64: 1, 64>}, {transform_indices = @transform_4, window_bounds = array<i64: 200, 64>}]} {
    %c0 = arith.constant 0 : index
    %c0_0 = arith.constant 0 : index
    %0 = vector.load %arg1[%c0, %c0_0] : memref<200x12xf32, #tpu.memory_space<vmem>>, vector<200x12xf32>
    %1 = arith.truncf %0 : vector<200x12xf32> to vector<200x12xbf16>
    %c0_1 = arith.constant 0 : index
    %c0_2 = arith.constant 0 : index
    %2 = vector.load %arg2[%c0_1, %c0_2] : memref<12x64xbf16, #tpu.memory_space<vmem>>, vector<12x64xbf16>
    %cst = arith.constant dense<0.000000e+00> : vector<200x64xf32>
    %3 = tpu.matmul %1, %2, %cst {dimension_numbers = #tpu.dot_dimension_numbers<[1], [0], [0], [1], [0, 0, 1, 1], [], []>} : vector<200x12xbf16>, vector<12x64xbf16>, vector<200x64xf32> -> vector<200x64xf32>
    %c0_3 = arith.constant 0 : index
    %c0_4 = arith.constant 0 : index
    %4 = vector.load %arg3[%c0_3, %c0_4] : memref<1x64xf32, #tpu.memory_space<vmem>>, vector<1x64xf32>
    %5 = vector.broadcast %4 : vector<1x64xf32> to vector<200x64xf32>
    %6 = arith.mulf %3, %5 : vector<200x64xf32>
    %c0_5 = arith.constant 0 : index
    %c0_6 = arith.constant 0 : index
    %7 = vector.load %arg4[%c0_5, %c0_6] : memref<1x64xf32, #tpu.memory_space<vmem>>, vector<1x64xf32>
    %8 = vector.broadcast %7 : vector<1x64xf32> to vector<200x64xf32>
    %9 = arith.addf %6, %8 : vector<200x64xf32>
    %cst_7 = arith.constant 0.000000e+00 : f32
    %10 = vector.broadcast %cst_7 : f32 to vector<200x64xf32>
    %11 = arith.maximumf %9, %10 : vector<200x64xf32>
    %12 = arith.truncf %11 : vector<200x64xf32> to vector<200x64xbf16>
    %c0_8 = arith.constant 0 : index
    %c0_9 = arith.constant 0 : index
    %13 = vector.load %arg5[%c0_8, %c0_9] : memref<200x64xbf16, #tpu.memory_space<vmem>>, vector<200x64xbf16>
    tpu.vector_store %arg5[%c0_8, %c0_9], %12 {strides = array<i32>} : memref<200x64xbf16, #tpu.memory_space<vmem>>, vector<200x64xbf16>,
    return
  }
  func.func @transform_0(%arg0: i32) -> (i32, i32) {
    %c0_i32 = arith.constant 0 : i32
    %c0_i32_0 = arith.constant 0 : i32
    return %arg0, %c0_i32 : i32, i32
  }
  func.func @transform_1(%arg0: i32) -> (i32, i32) {
    %c0_i32 = arith.constant 0 : i32
    %c0_i32_0 = arith.constant 0 : i32
    %c0_i32_1 = arith.constant 0 : i32
    return %c0_i32, %c0_i32_0 : i32, i32
  }
  func.func @transform_2(%arg0: i32) -> (i32, i32) {
    %c0_i32 = arith.constant 0 : i32
    %c0_i32_0 = arith.constant 0 : i32
    %c0_i32_1 = arith.constant 0 : i32
    return %c0_i32, %c0_i32_0 : i32, i32
  }
  func.func @transform_3(%arg0: i32) -> (i32, i32) {
    %c0_i32 = arith.constant 0 : i32
    %c0_i32_0 = arith.constant 0 : i32
    %c0_i32_1 = arith.constant 0 : i32
    return %c0_i32, %c0_i32_0 : i32, i32
  }
  func.func @transform_4(%arg0: i32) -> (i32, i32) {
    %c0_i32 = arith.constant 0 : i32
    %c0_i32_0 = arith.constant 0 : i32
    return %arg0, %c0_i32 : i32, i32
  }
}

module attributes {stable_mosaic.version = 11 : i64} {
  func.func @_dwsep_kernel(%arg0: i32, %arg1: memref<1x10x10x64xbf16, #tpu.memory_space<vmem>>, %arg2: memref<9x64xf32, #tpu.memory_space<vmem>>, %arg3: memref<64x64xbf16, #tpu.memory_space<vmem>>, %arg4: memref<1x64xf32, #tpu.memory_space<vmem>>, %arg5: memref<1x64xf32, #tpu.memory_space<vmem>>, %arg6: memref<1x64x64xbf16, #tpu.memory_space<vmem>>) attributes {dimension_semantics = [#tpu.dimension_semantics<parallel>], iteration_bounds = array<i64: 2>, scalar_prefetch = 0 : i64, scratch_operands = 0 : i64, tpu.core_type = #tpu.core_type<tc>, window_params = [{transform_indices = @transform_0, window_bounds = array<i64: 1, 10, 10, 64>}, {pipeline_mode = #tpu.pipeline_mode<synchronous>, transform_indices = @transform_1, window_bounds = array<i64: 9, 64>}, {pipeline_mode = #tpu.pipeline_mode<synchronous>, transform_indices = @transform_2, window_bounds = array<i64: 64, 64>}, {pipeline_mode = #tpu.pipeline_mode<synchronous>, transform_indices = @transform_3, window_bounds = array<i64: 1, 64>}, {pipeline_mode = #tpu.pipeline_mode<synchronous>, transform_indices = @transform_4, window_bounds = array<i64: 1, 64>}, {transform_indices = @transform_5, window_bounds = array<i64: 1, 64, 64>}]} {
    %c0 = arith.constant 0 : index
    %c0_0 = arith.constant 0 : index
    %c0_1 = arith.constant 0 : index
    %c0_2 = arith.constant 0 : index
    %0 = vector.load %arg1[%c0, %c0_0, %c0_1, %c0_2] : memref<1x10x10x64xbf16, #tpu.memory_space<vmem>>, vector<1x10x10x64xbf16>
    %1 = vector.shape_cast %0 : vector<1x10x10x64xbf16> to vector<10x10x64xbf16>
    %2 = arith.extf %1 : vector<10x10x64xbf16> to vector<10x10x64xf32>
    %cst = arith.constant 0.000000e+00 : f32
    %3 = vector.broadcast %cst : f32 to vector<8x8x64xf32>
    %4 = vector.extract_strided_slice %2 {offsets = [0, 0, 0], sizes = [8, 8, 64], strides = [1, 1, 1]} : vector<10x10x64xf32> to vector<8x8x64xf32>
    %c0_3 = arith.constant 0 : index
    %c0_4 = arith.constant 0 : index
    %5 = vector.load %arg2[%c0_3, %c0_4] : memref<9x64xf32, #tpu.memory_space<vmem>>, vector<1x64xf32>
    %6 = vector.shape_cast %5 : vector<1x64xf32> to vector<1x1x64xf32>
    %7 = vector.broadcast %6 : vector<1x1x64xf32> to vector<8x8x64xf32>
    %8 = arith.mulf %4, %7 : vector<8x8x64xf32>
    %9 = arith.addf %3, %8 : vector<8x8x64xf32>
    %10 = vector.extract_strided_slice %2 {offsets = [0, 1, 0], sizes = [8, 8, 64], strides = [1, 1, 1]} : vector<10x10x64xf32> to vector<8x8x64xf32>
    %c1 = arith.constant 1 : index
    %c0_5 = arith.constant 0 : index
    %11 = vector.load %arg2[%c1, %c0_5] : memref<9x64xf32, #tpu.memory_space<vmem>>, vector<1x64xf32>
    %12 = vector.shape_cast %11 : vector<1x64xf32> to vector<1x1x64xf32>
    %13 = vector.broadcast %12 : vector<1x1x64xf32> to vector<8x8x64xf32>
    %14 = arith.mulf %10, %13 : vector<8x8x64xf32>
    %15 = arith.addf %9, %14 : vector<8x8x64xf32>
    %16 = vector.extract_strided_slice %2 {offsets = [0, 2, 0], sizes = [8, 8, 64], strides = [1, 1, 1]} : vector<10x10x64xf32> to vector<8x8x64xf32>
    %c2 = arith.constant 2 : index
    %c0_6 = arith.constant 0 : index
    %17 = vector.load %arg2[%c2, %c0_6] : memref<9x64xf32, #tpu.memory_space<vmem>>, vector<1x64xf32>
    %18 = vector.shape_cast %17 : vector<1x64xf32> to vector<1x1x64xf32>
    %19 = vector.broadcast %18 : vector<1x1x64xf32> to vector<8x8x64xf32>
    %20 = arith.mulf %16, %19 : vector<8x8x64xf32>
    %21 = arith.addf %15, %20 : vector<8x8x64xf32>
    %22 = vector.extract_strided_slice %2 {offsets = [1, 0, 0], sizes = [8, 8, 64], strides = [1, 1, 1]} : vector<10x10x64xf32> to vector<8x8x64xf32>
    %c3 = arith.constant 3 : index
    %c0_7 = arith.constant 0 : index
    %23 = vector.load %arg2[%c3, %c0_7] : memref<9x64xf32, #tpu.memory_space<vmem>>, vector<1x64xf32>
    %24 = vector.shape_cast %23 : vector<1x64xf32> to vector<1x1x64xf32>
    %25 = vector.broadcast %24 : vector<1x1x64xf32> to vector<8x8x64xf32>
    %26 = arith.mulf %22, %25 : vector<8x8x64xf32>
    %27 = arith.addf %21, %26 : vector<8x8x64xf32>
    %28 = vector.extract_strided_slice %2 {offsets = [1, 1, 0], sizes = [8, 8, 64], strides = [1, 1, 1]} : vector<10x10x64xf32> to vector<8x8x64xf32>
    %c4 = arith.constant 4 : index
    %c0_8 = arith.constant 0 : index
    %29 = vector.load %arg2[%c4, %c0_8] : memref<9x64xf32, #tpu.memory_space<vmem>>, vector<1x64xf32>
    %30 = vector.shape_cast %29 : vector<1x64xf32> to vector<1x1x64xf32>
    %31 = vector.broadcast %30 : vector<1x1x64xf32> to vector<8x8x64xf32>
    %32 = arith.mulf %28, %31 : vector<8x8x64xf32>
    %33 = arith.addf %27, %32 : vector<8x8x64xf32>
    %34 = vector.extract_strided_slice %2 {offsets = [1, 2, 0], sizes = [8, 8, 64], strides = [1, 1, 1]} : vector<10x10x64xf32> to vector<8x8x64xf32>
    %c5 = arith.constant 5 : index
    %c0_9 = arith.constant 0 : index
    %35 = vector.load %arg2[%c5, %c0_9] : memref<9x64xf32, #tpu.memory_space<vmem>>, vector<1x64xf32>
    %36 = vector.shape_cast %35 : vector<1x64xf32> to vector<1x1x64xf32>
    %37 = vector.broadcast %36 : vector<1x1x64xf32> to vector<8x8x64xf32>
    %38 = arith.mulf %34, %37 : vector<8x8x64xf32>
    %39 = arith.addf %33, %38 : vector<8x8x64xf32>
    %40 = vector.extract_strided_slice %2 {offsets = [2, 0, 0], sizes = [8, 8, 64], strides = [1, 1, 1]} : vector<10x10x64xf32> to vector<8x8x64xf32>
    %c6 = arith.constant 6 : index
    %c0_10 = arith.constant 0 : index
    %41 = vector.load %arg2[%c6, %c0_10] : memref<9x64xf32, #tpu.memory_space<vmem>>, vector<1x64xf32>
    %42 = vector.shape_cast %41 : vector<1x64xf32> to vector<1x1x64xf32>
    %43 = vector.broadcast %42 : vector<1x1x64xf32> to vector<8x8x64xf32>
    %44 = arith.mulf %40, %43 : vector<8x8x64xf32>
    %45 = arith.addf %39, %44 : vector<8x8x64xf32>
    %46 = vector.extract_strided_slice %2 {offsets = [2, 1, 0], sizes = [8, 8, 64], strides = [1, 1, 1]} : vector<10x10x64xf32> to vector<8x8x64xf32>
    %c7 = arith.constant 7 : index
    %c0_11 = arith.constant 0 : index
    %47 = vector.load %arg2[%c7, %c0_11] : memref<9x64xf32, #tpu.memory_space<vmem>>, vector<1x64xf32>
    %48 = vector.shape_cast %47 : vector<1x64xf32> to vector<1x1x64xf32>
    %49 = vector.broadcast %48 : vector<1x1x64xf32> to vector<8x8x64xf32>
    %50 = arith.mulf %46, %49 : vector<8x8x64xf32>
    %51 = arith.addf %45, %50 : vector<8x8x64xf32>
    %52 = vector.extract_strided_slice %2 {offsets = [2, 2, 0], sizes = [8, 8, 64], strides = [1, 1, 1]} : vector<10x10x64xf32> to vector<8x8x64xf32>
    %c8 = arith.constant 8 : index
    %c0_12 = arith.constant 0 : index
    %53 = vector.load %arg2[%c8, %c0_12] : memref<9x64xf32, #tpu.memory_space<vmem>>, vector<1x64xf32>
    %54 = vector.shape_cast %53 : vector<1x64xf32> to vector<1x1x64xf32>
    %55 = vector.broadcast %54 : vector<1x1x64xf32> to vector<8x8x64xf32>
    %56 = arith.mulf %52, %55 : vector<8x8x64xf32>
    %57 = arith.addf %51, %56 : vector<8x8x64xf32>
    %58 = vector.shape_cast %57 : vector<8x8x64xf32> to vector<64x64xf32>
    %59 = arith.truncf %58 : vector<64x64xf32> to vector<64x64xbf16>
    %c0_13 = arith.constant 0 : index
    %c0_14 = arith.constant 0 : index
    %60 = vector.load %arg3[%c0_13, %c0_14] : memref<64x64xbf16, #tpu.memory_space<vmem>>, vector<64x64xbf16>
    %cst_15 = arith.constant dense<0.000000e+00> : vector<64x64xf32>
    %61 = tpu.matmul %59, %60, %cst_15 {dimension_numbers = #tpu.dot_dimension_numbers<[1], [0], [0], [1], [0, 0, 1, 1], [], []>} : vector<64x64xbf16>, vector<64x64xbf16>, vector<64x64xf32> -> vector<64x64xf32>
    %c0_16 = arith.constant 0 : index
    %c0_17 = arith.constant 0 : index
    %62 = vector.load %arg4[%c0_16, %c0_17] : memref<1x64xf32, #tpu.memory_space<vmem>>, vector<1x64xf32>
    %63 = vector.broadcast %62 : vector<1x64xf32> to vector<64x64xf32>
    %64 = arith.mulf %61, %63 : vector<64x64xf32>
    %c0_18 = arith.constant 0 : index
    %c0_19 = arith.constant 0 : index
    %65 = vector.load %arg5[%c0_18, %c0_19] : memref<1x64xf32, #tpu.memory_space<vmem>>, vector<1x64xf32>
    %66 = vector.broadcast %65 : vector<1x64xf32> to vector<64x64xf32>
    %67 = arith.addf %64, %66 : vector<64x64xf32>
    %cst_20 = arith.constant 0.000000e+00 : f32
    %68 = vector.broadcast %cst_20 : f32 to vector<64x64xf32>
    %69 = arith.maximumf %67, %68 : vector<64x64xf32>
    %70 = arith.truncf %69 : vector<64x64xf32> to vector<64x64xbf16>
    %c0_21 = arith.constant 0 : index
    %c0_22 = arith.constant 0 : index
    %c0_23 = arith.constant 0 : index
    %71 = vector.load %arg6[%c0_21, %c0_22, %c0_23] : memref<1x64x64xbf16, #tpu.memory_space<vmem>>, vector<1x64x64xbf16>
    %72 = vector.shape_cast %71 : vector<1x64x64xbf16> to vector<64x64xbf16>
    %73 = vector.shape_cast %70 : vector<64x64xbf16> to vector<1x64x64xbf16>
    tpu.vector_store %arg6[%c0_21, %c0_22, %c0_23], %73 {strides = array<i32>} : memref<1x64x64xbf16, #tpu.memory_space<vmem>>, vector<1x64x64xbf16>,
    return
  }
  func.func @transform_0(%arg0: i32) -> (i32, i32, i32, i32) {
    %c0_i32 = arith.constant 0 : i32
    %c0_i32_0 = arith.constant 0 : i32
    %c0_i32_1 = arith.constant 0 : i32
    %c0_i32_2 = arith.constant 0 : i32
    return %arg0, %c0_i32, %c0_i32_0, %c0_i32_1 : i32, i32, i32, i32
  }
  func.func @transform_1(%arg0: i32) -> (i32, i32) {
    %c0_i32 = arith.constant 0 : i32
    %c0_i32_0 = arith.constant 0 : i32
    %c0_i32_1 = arith.constant 0 : i32
    return %c0_i32, %c0_i32_0 : i32, i32
  }
  func.func @transform_2(%arg0: i32) -> (i32, i32) {
    %c0_i32 = arith.constant 0 : i32
    %c0_i32_0 = arith.constant 0 : i32
    %c0_i32_1 = arith.constant 0 : i32
    return %c0_i32, %c0_i32_0 : i32, i32
  }
  func.func @transform_3(%arg0: i32) -> (i32, i32) {
    %c0_i32 = arith.constant 0 : i32
    %c0_i32_0 = arith.constant 0 : i32
    %c0_i32_1 = arith.constant 0 : i32
    return %c0_i32, %c0_i32_0 : i32, i32
  }
  func.func @transform_4(%arg0: i32) -> (i32, i32) {
    %c0_i32 = arith.constant 0 : i32
    %c0_i32_0 = arith.constant 0 : i32
    %c0_i32_1 = arith.constant 0 : i32
    return %c0_i32, %c0_i32_0 : i32, i32
  }
  func.func @transform_5(%arg0: i32) -> (i32, i32, i32) {
    %c0_i32 = arith.constant 0 : i32
    %c0_i32_0 = arith.constant 0 : i32
    %c0_i32_1 = arith.constant 0 : i32
    return %arg0, %c0_i32, %c0_i32_0 : i32, i32, i32
  }
}

module attributes {stable_mosaic.version = 11 : i64} {
  func.func @_pam_proj_kernel(%arg0: i32, %arg1: memref<128x64xbf16, #tpu.memory_space<vmem>>, %arg2: memref<64x80xbf16, #tpu.memory_space<vmem>>, %arg3: memref<1x80xf32, #tpu.memory_space<vmem>>, %arg4: memref<128x8xbf16, #tpu.memory_space<vmem>>, %arg5: memref<128x8xbf16, #tpu.memory_space<vmem>>, %arg6: memref<128x64xbf16, #tpu.memory_space<vmem>>) attributes {dimension_semantics = [#tpu.dimension_semantics<parallel>], iteration_bounds = array<i64: 1>, scalar_prefetch = 0 : i64, scratch_operands = 0 : i64, tpu.core_type = #tpu.core_type<tc>, window_params = [{transform_indices = @transform_0, window_bounds = array<i64: 128, 64>}, {pipeline_mode = #tpu.pipeline_mode<synchronous>, transform_indices = @transform_1, window_bounds = array<i64: 64, 80>}, {pipeline_mode = #tpu.pipeline_mode<synchronous>, transform_indices = @transform_2, window_bounds = array<i64: 1, 80>}, {transform_indices = @transform_3, window_bounds = array<i64: 128, 8>}, {transform_indices = @transform_4, window_bounds = array<i64: 128, 8>}, {transform_indices = @transform_5, window_bounds = array<i64: 128, 64>}]} {
    %c0 = arith.constant 0 : index
    %c0_0 = arith.constant 0 : index
    %0 = vector.load %arg1[%c0, %c0_0] : memref<128x64xbf16, #tpu.memory_space<vmem>>, vector<128x64xbf16>
    %c0_1 = arith.constant 0 : index
    %c0_2 = arith.constant 0 : index
    %1 = vector.load %arg2[%c0_1, %c0_2] : memref<64x80xbf16, #tpu.memory_space<vmem>>, vector<64x80xbf16>
    %cst = arith.constant dense<0.000000e+00> : vector<128x80xf32>
    %2 = tpu.matmul %0, %1, %cst {dimension_numbers = #tpu.dot_dimension_numbers<[1], [0], [0], [1], [0, 0, 1, 1], [], []>} : vector<128x64xbf16>, vector<64x80xbf16>, vector<128x80xf32> -> vector<128x80xf32>
    %c0_3 = arith.constant 0 : index
    %c0_4 = arith.constant 0 : index
    %3 = vector.load %arg3[%c0_3, %c0_4] : memref<1x80xf32, #tpu.memory_space<vmem>>, vector<1x80xf32>
    %4 = vector.broadcast %3 : vector<1x80xf32> to vector<128x80xf32>
    %5 = arith.addf %2, %4 : vector<128x80xf32>
    %6 = vector.extract_strided_slice %5 {offsets = [0, 0], sizes = [128, 8], strides = [1, 1]} : vector<128x80xf32> to vector<128x8xf32>
    %7 = arith.truncf %6 : vector<128x8xf32> to vector<128x8xbf16>
    %c0_5 = arith.constant 0 : index
    %c0_6 = arith.constant 0 : index
    %8 = vector.load %arg4[%c0_5, %c0_6] : memref<128x8xbf16, #tpu.memory_space<vmem>>, vector<128x8xbf16>
    tpu.vector_store %arg4[%c0_5, %c0_6], %7 {strides = array<i32>} : memref<128x8xbf16, #tpu.memory_space<vmem>>, vector<128x8xbf16>,
    %9 = vector.extract_strided_slice %5 {offsets = [0, 8], sizes = [128, 8], strides = [1, 1]} : vector<128x80xf32> to vector<128x8xf32>
    %10 = arith.truncf %9 : vector<128x8xf32> to vector<128x8xbf16>
    %c0_7 = arith.constant 0 : index
    %c0_8 = arith.constant 0 : index
    %11 = vector.load %arg5[%c0_7, %c0_8] : memref<128x8xbf16, #tpu.memory_space<vmem>>, vector<128x8xbf16>
    tpu.vector_store %arg5[%c0_7, %c0_8], %10 {strides = array<i32>} : memref<128x8xbf16, #tpu.memory_space<vmem>>, vector<128x8xbf16>,
    %12 = vector.extract_strided_slice %5 {offsets = [0, 16], sizes = [128, 64], strides = [1, 1]} : vector<128x80xf32> to vector<128x64xf32>
    %13 = arith.truncf %12 : vector<128x64xf32> to vector<128x64xbf16>
    %c0_9 = arith.constant 0 : index
    %c0_10 = arith.constant 0 : index
    %14 = vector.load %arg6[%c0_9, %c0_10] : memref<128x64xbf16, #tpu.memory_space<vmem>>, vector<128x64xbf16>
    tpu.vector_store %arg6[%c0_9, %c0_10], %13 {strides = array<i32>} : memref<128x64xbf16, #tpu.memory_space<vmem>>, vector<128x64xbf16>,
    return
  }
  func.func @transform_0(%arg0: i32) -> (i32, i32) {
    %c0_i32 = arith.constant 0 : i32
    %c0_i32_0 = arith.constant 0 : i32
    return %arg0, %c0_i32 : i32, i32
  }
  func.func @transform_1(%arg0: i32) -> (i32, i32) {
    %c0_i32 = arith.constant 0 : i32
    %c0_i32_0 = arith.constant 0 : i32
    %c0_i32_1 = arith.constant 0 : i32
    return %c0_i32, %c0_i32_0 : i32, i32
  }
  func.func @transform_2(%arg0: i32) -> (i32, i32) {
    %c0_i32 = arith.constant 0 : i32
    %c0_i32_0 = arith.constant 0 : i32
    %c0_i32_1 = arith.constant 0 : i32
    return %c0_i32, %c0_i32_0 : i32, i32
  }
  func.func @transform_3(%arg0: i32) -> (i32, i32) {
    %c0_i32 = arith.constant 0 : i32
    %c0_i32_0 = arith.constant 0 : i32
    return %arg0, %c0_i32 : i32, i32
  }
  func.func @transform_4(%arg0: i32) -> (i32, i32) {
    %c0_i32 = arith.constant 0 : i32
    %c0_i32_0 = arith.constant 0 : i32
    return %arg0, %c0_i32 : i32, i32
  }
  func.func @transform_5(%arg0: i32) -> (i32, i32) {
    %c0_i32 = arith.constant 0 : i32
    %c0_i32_0 = arith.constant 0 : i32
    return %arg0, %c0_i32 : i32, i32
  }
}

module attributes {stable_mosaic.version = 11 : i64} {
  func.func @_pam_attn_kernel(%arg0: i32, %arg1: i32, %arg2: i32, %arg3: memref<1x64x8xbf16, #tpu.memory_space<vmem>>, %arg4: memref<1x64x8xbf16, #tpu.memory_space<vmem>>, %arg5: memref<1x64x64xbf16, #tpu.memory_space<vmem>>, %arg6: memref<1x64x64xbf16, #tpu.memory_space<vmem>>, %arg7: memref<1x1xf32, #tpu.memory_space<vmem>>, %arg8: memref<1x64x64xbf16, #tpu.memory_space<vmem>>, %arg9: memref<1x64x1xf32, #tpu.memory_space<vmem>>, %arg10: memref<1x64x1xf32, #tpu.memory_space<vmem>>, %arg11: memref<1x64x64xf32, #tpu.memory_space<vmem>>) attributes {dimension_semantics = [#tpu.dimension_semantics<parallel>, #tpu.dimension_semantics<parallel>, #tpu.dimension_semantics<arbitrary>], iteration_bounds = array<i64: 2, 1, 1>, scalar_prefetch = 0 : i64, scratch_operands = 3 : i64, tpu.core_type = #tpu.core_type<tc>, window_params = [{transform_indices = @transform_0, window_bounds = array<i64: 1, 64, 8>}, {transform_indices = @transform_1, window_bounds = array<i64: 1, 64, 8>}, {transform_indices = @transform_2, window_bounds = array<i64: 1, 64, 64>}, {transform_indices = @transform_3, window_bounds = array<i64: 1, 64, 64>}, {pipeline_mode = #tpu.pipeline_mode<synchronous>, transform_indices = @transform_4, window_bounds = array<i64: 1, 1>}, {transform_indices = @transform_5, window_bounds = array<i64: 1, 64, 64>}]} {
    %c0_i32 = arith.constant 0 : i32
    %0 = arith.cmpi eq, %arg2, %c0_i32 : i32
    %1 = arith.extui %0 : i1 to i32
    %c0_i32_0 = arith.constant 0 : i32
    %2 = arith.cmpi ne, %1, %c0_i32_0 : i32
    scf.if %2 {
      %cst_34 = arith.constant 0xFF800000 : f32
      %53 = vector.broadcast %cst_34 : f32 to vector<1x64x1xf32>
      %c0_35 = arith.constant 0 : index
      %c0_36 = arith.constant 0 : index
      %c0_37 = arith.constant 0 : index
      %54 = vector.load %arg9[%c0_35, %c0_36, %c0_37] : memref<1x64x1xf32, #tpu.memory_space<vmem>>, vector<1x64x1xf32>
      tpu.vector_store %arg9[%c0_35, %c0_36, %c0_37], %53 {strides = array<i32>} : memref<1x64x1xf32, #tpu.memory_space<vmem>>, vector<1x64x1xf32>,
      %cst_38 = arith.constant 0.000000e+00 : f32
      %55 = vector.broadcast %cst_38 : f32 to vector<1x64x1xf32>
      %c0_39 = arith.constant 0 : index
      %c0_40 = arith.constant 0 : index
      %c0_41 = arith.constant 0 : index
      %56 = vector.load %arg10[%c0_39, %c0_40, %c0_41] : memref<1x64x1xf32, #tpu.memory_space<vmem>>, vector<1x64x1xf32>
      tpu.vector_store %arg10[%c0_39, %c0_40, %c0_41], %55 {strides = array<i32>} : memref<1x64x1xf32, #tpu.memory_space<vmem>>, vector<1x64x1xf32>,
      %cst_42 = arith.constant 0.000000e+00 : f32
      %57 = vector.broadcast %cst_42 : f32 to vector<1x64x64xf32>
      %c0_43 = arith.constant 0 : index
      %c0_44 = arith.constant 0 : index
      %c0_45 = arith.constant 0 : index
      %58 = vector.load %arg11[%c0_43, %c0_44, %c0_45] : memref<1x64x64xf32, #tpu.memory_space<vmem>>, vector<1x64x64xf32>
      tpu.vector_store %arg11[%c0_43, %c0_44, %c0_45], %57 {strides = array<i32>} : memref<1x64x64xf32, #tpu.memory_space<vmem>>, vector<1x64x64xf32>,
    } else {
    }
    %c0 = arith.constant 0 : index
    %c0_1 = arith.constant 0 : index
    %c0_2 = arith.constant 0 : index
    %3 = vector.load %arg3[%c0, %c0_1, %c0_2] : memref<1x64x8xbf16, #tpu.memory_space<vmem>>, vector<1x64x8xbf16>
    %4 = vector.shape_cast %3 : vector<1x64x8xbf16> to vector<64x8xbf16>
    %c0_3 = arith.constant 0 : index
    %c0_4 = arith.constant 0 : index
    %c0_5 = arith.constant 0 : index
    %5 = vector.load %arg4[%c0_3, %c0_4, %c0_5] : memref<1x64x8xbf16, #tpu.memory_space<vmem>>, vector<1x64x8xbf16>
    %6 = vector.shape_cast %5 : vector<1x64x8xbf16> to vector<64x8xbf16>
    %cst = arith.constant dense<0.000000e+00> : vector<64x64xf32>
    %7 = tpu.matmul %4, %6, %cst {dimension_numbers = #tpu.dot_dimension_numbers<[1], [1], [0], [0], [0, 0, 1, 0], [], []>} : vector<64x8xbf16>, vector<64x8xbf16>, vector<64x64xf32> -> vector<64x64xf32>
    %c64_i32 = arith.constant 64 : i32
    %8 = arith.muli %arg2, %c64_i32 : i32
    %9 = tpu.iota {dimensions = array<i32: 1>} : vector<64x64xi32>
    %10 = vector.broadcast %8 : i32 to vector<64x64xi32>
    %11 = arith.addi %10, %9 : vector<64x64xi32>
    %c64_i32_6 = arith.constant 64 : i32
    %12 = vector.broadcast %c64_i32_6 : i32 to vector<64x64xi32>
    %13 = arith.cmpi slt, %11, %12 : vector<64x64xi32>
    %cst_7 = arith.constant 0xFF800000 : f32
    %14 = vector.broadcast %cst_7 : f32 to vector<64x64xf32>
    %15 = arith.select %13, %7, %14 : vector<64x64xi1>, vector<64x64xf32>
    %c0_8 = arith.constant 0 : index
    %c0_9 = arith.constant 0 : index
    %c0_10 = arith.constant 0 : index
    %16 = vector.load %arg9[%c0_8, %c0_9, %c0_10] : memref<1x64x1xf32, #tpu.memory_space<vmem>>, vector<1x64x1xf32>
    %17 = vector.shape_cast %16 : vector<1x64x1xf32> to vector<64x1xf32>
    %cst_11 = arith.constant dense<0xFF800000> : vector<64xf32>
    %18 = vector.multi_reduction <maximumf>, %15, %cst_11 [1] : vector<64x64xf32> to vector<64xf32>
    %19 = vector.shape_cast %18 : vector<64xf32> to vector<64x1xf32>
    %20 = arith.maximumf %17, %19 : vector<64x1xf32>
    %21 = arith.subf %17, %20 : vector<64x1xf32>
    %22 = math.exp %21 : vector<64x1xf32>
    %23 = vector.broadcast %20 : vector<64x1xf32> to vector<64x64xf32>
    %24 = arith.subf %15, %23 : vector<64x64xf32>
    %25 = math.exp %24 : vector<64x64xf32>
    %c0_12 = arith.constant 0 : index
    %c0_13 = arith.constant 0 : index
    %c0_14 = arith.constant 0 : index
    %26 = vector.load %arg10[%c0_12, %c0_13, %c0_14] : memref<1x64x1xf32, #tpu.memory_space<vmem>>, vector<1x64x1xf32>
    %27 = vector.shape_cast %26 : vector<1x64x1xf32> to vector<64x1xf32>
    %28 = arith.mulf %22, %27 : vector<64x1xf32>
    %cst_15 = arith.constant dense<0.000000e+00> : vector<64xf32>
    %29 = vector.multi_reduction <add>, %25, %cst_15 [1] : vector<64x64xf32> to vector<64xf32>
    %30 = vector.shape_cast %29 : vector<64xf32> to vector<64x1xf32>
    %31 = arith.addf %28, %30 : vector<64x1xf32>
    %c0_16 = arith.constant 0 : index
    %c0_17 = arith.constant 0 : index
    %c0_18 = arith.constant 0 : index
    %32 = vector.load %arg10[%c0_16, %c0_17, %c0_18] : memref<1x64x1xf32, #tpu.memory_space<vmem>>, vector<1x64x1xf32>
    %33 = vector.shape_cast %32 : vector<1x64x1xf32> to vector<64x1xf32>
    %34 = vector.shape_cast %31 : vector<64x1xf32> to vector<1x64x1xf32>
    tpu.vector_store %arg10[%c0_16, %c0_17, %c0_18], %34 {strides = array<i32>} : memref<1x64x1xf32, #tpu.memory_space<vmem>>, vector<1x64x1xf32>,
    %c0_19 = arith.constant 0 : index
    %c0_20 = arith.constant 0 : index
    %c0_21 = arith.constant 0 : index
    %35 = vector.load %arg11[%c0_19, %c0_20, %c0_21] : memref<1x64x64xf32, #tpu.memory_space<vmem>>, vector<1x64x64xf32>
    %36 = vector.shape_cast %35 : vector<1x64x64xf32> to vector<64x64xf32>
    %37 = vector.broadcast %22 : vector<64x1xf32> to vector<64x64xf32>
    %38 = arith.mulf %37, %36 : vector<64x64xf32>
    %39 = arith.truncf %25 : vector<64x64xf32> to vector<64x64xbf16>
    %c0_22 = arith.constant 0 : index
    %c0_23 = arith.constant 0 : index
    %c0_24 = arith.constant 0 : index
    %40 = vector.load %arg5[%c0_22, %c0_23, %c0_24] : memref<1x64x64xbf16, #tpu.memory_space<vmem>>, vector<1x64x64xbf16>
    %41 = vector.shape_cast %40 : vector<1x64x64xbf16> to vector<64x64xbf16>
    %cst_25 = arith.constant dense<0.000000e+00> : vector<64x64xf32>
    %42 = tpu.matmul %39, %41, %cst_25 {dimension_numbers = #tpu.dot_dimension_numbers<[1], [0], [0], [1], [0, 0, 1, 1], [], []>} : vector<64x64xbf16>, vector<64x64xbf16>, vector<64x64xf32> -> vector<64x64xf32>
    %43 = arith.addf %38, %42 : vector<64x64xf32>
    %c0_26 = arith.constant 0 : index
    %c0_27 = arith.constant 0 : index
    %c0_28 = arith.constant 0 : index
    %44 = vector.load %arg11[%c0_26, %c0_27, %c0_28] : memref<1x64x64xf32, #tpu.memory_space<vmem>>, vector<1x64x64xf32>
    %45 = vector.shape_cast %44 : vector<1x64x64xf32> to vector<64x64xf32>
    %46 = vector.shape_cast %43 : vector<64x64xf32> to vector<1x64x64xf32>
    tpu.vector_store %arg11[%c0_26, %c0_27, %c0_28], %46 {strides = array<i32>} : memref<1x64x64xf32, #tpu.memory_space<vmem>>, vector<1x64x64xf32>,
    %c0_29 = arith.constant 0 : index
    %c0_30 = arith.constant 0 : index
    %c0_31 = arith.constant 0 : index
    %47 = vector.load %arg9[%c0_29, %c0_30, %c0_31] : memref<1x64x1xf32, #tpu.memory_space<vmem>>, vector<1x64x1xf32>
    %48 = vector.shape_cast %47 : vector<1x64x1xf32> to vector<64x1xf32>
    %49 = vector.shape_cast %20 : vector<64x1xf32> to vector<1x64x1xf32>
    tpu.vector_store %arg9[%c0_29, %c0_30, %c0_31], %49 {strides = array<i32>} : memref<1x64x1xf32, #tpu.memory_space<vmem>>, vector<1x64x1xf32>,
    %c0_i32_32 = arith.constant 0 : i32
    %50 = arith.cmpi eq, %arg2, %c0_i32_32 : i32
    %51 = arith.extui %50 : i1 to i32
    %c0_i32_33 = arith.constant 0 : i32
    %52 = arith.cmpi ne, %51, %c0_i32_33 : i32
    scf.if %52 {
      %c0_34 = arith.constant 0 : index
      %c0_35 = arith.constant 0 : index
      %c0_36 = arith.constant 0 : index
      %53 = vector.load %arg11[%c0_34, %c0_35, %c0_36] : memref<1x64x64xf32, #tpu.memory_space<vmem>>, vector<1x64x64xf32>
      %54 = vector.shape_cast %53 : vector<1x64x64xf32> to vector<64x64xf32>
      %c0_37 = arith.constant 0 : index
      %c0_38 = arith.constant 0 : index
      %c0_39 = arith.constant 0 : index
      %55 = vector.load %arg10[%c0_37, %c0_38, %c0_39] : memref<1x64x1xf32, #tpu.memory_space<vmem>>, vector<1x64x1xf32>
      %56 = vector.shape_cast %55 : vector<1x64x1xf32> to vector<64x1xf32>
      %57 = tpu.reciprocal %56 {approx = true} : vector<64x1xf32> -> vector<64x1xf32>
      %58 = vector.broadcast %57 : vector<64x1xf32> to vector<64x64xf32>
      %59 = arith.mulf %54, %58 : vector<64x64xf32>
      %c0_40 = arith.constant 0 : index
      %c0_41 = arith.constant 0 : index
      %60 = vector.load %arg7[%c0_40, %c0_41] : memref<1x1xf32, #tpu.memory_space<vmem>>, vector<1x1xf32>
      %61 = vector.broadcast %60 : vector<1x1xf32> to vector<64x64xf32>
      %62 = arith.mulf %61, %59 : vector<64x64xf32>
      %c0_42 = arith.constant 0 : index
      %c0_43 = arith.constant 0 : index
      %c0_44 = arith.constant 0 : index
      %63 = vector.load %arg6[%c0_42, %c0_43, %c0_44] : memref<1x64x64xbf16, #tpu.memory_space<vmem>>, vector<1x64x64xbf16>
      %64 = vector.shape_cast %63 : vector<1x64x64xbf16> to vector<64x64xbf16>
      %65 = arith.extf %64 : vector<64x64xbf16> to vector<64x64xf32>
      %66 = arith.addf %62, %65 : vector<64x64xf32>
      %67 = arith.truncf %66 : vector<64x64xf32> to vector<64x64xbf16>
      %c0_45 = arith.constant 0 : index
      %c0_46 = arith.constant 0 : index
      %c0_47 = arith.constant 0 : index
      %68 = vector.load %arg8[%c0_45, %c0_46, %c0_47] : memref<1x64x64xbf16, #tpu.memory_space<vmem>>, vector<1x64x64xbf16>
      %69 = vector.shape_cast %68 : vector<1x64x64xbf16> to vector<64x64xbf16>
      %70 = vector.shape_cast %67 : vector<64x64xbf16> to vector<1x64x64xbf16>
      tpu.vector_store %arg8[%c0_45, %c0_46, %c0_47], %70 {strides = array<i32>} : memref<1x64x64xbf16, #tpu.memory_space<vmem>>, vector<1x64x64xbf16>,
    } else {
    }
    return
  }
  func.func @transform_0(%arg0: i32, %arg1: i32, %arg2: i32) -> (i32, i32, i32) {
    %c0_i32 = arith.constant 0 : i32
    %c0_i32_0 = arith.constant 0 : i32
    return %arg0, %arg1, %c0_i32 : i32, i32, i32
  }
  func.func @transform_1(%arg0: i32, %arg1: i32, %arg2: i32) -> (i32, i32, i32) {
    %c0_i32 = arith.constant 0 : i32
    %c0_i32_0 = arith.constant 0 : i32
    return %arg0, %arg2, %c0_i32 : i32, i32, i32
  }
  func.func @transform_2(%arg0: i32, %arg1: i32, %arg2: i32) -> (i32, i32, i32) {
    %c0_i32 = arith.constant 0 : i32
    %c0_i32_0 = arith.constant 0 : i32
    return %arg0, %arg2, %c0_i32 : i32, i32, i32
  }
  func.func @transform_3(%arg0: i32, %arg1: i32, %arg2: i32) -> (i32, i32, i32) {
    %c0_i32 = arith.constant 0 : i32
    %c0_i32_0 = arith.constant 0 : i32
    return %arg0, %arg1, %c0_i32 : i32, i32, i32
  }
  func.func @transform_4(%arg0: i32, %arg1: i32, %arg2: i32) -> (i32, i32) {
    %c0_i32 = arith.constant 0 : i32
    %c0_i32_0 = arith.constant 0 : i32
    %c0_i32_1 = arith.constant 0 : i32
    return %c0_i32, %c0_i32_0 : i32, i32
  }
  func.func @transform_5(%arg0: i32, %arg1: i32, %arg2: i32) -> (i32, i32, i32) {
    %c0_i32 = arith.constant 0 : i32
    %c0_i32_0 = arith.constant 0 : i32
    return %arg0, %arg1, %c0_i32 : i32, i32, i32
  }
}

module attributes {stable_mosaic.version = 11 : i64} {
  func.func @_scproj_kernel(%arg0: i32, %arg1: memref<128x64xbf16, #tpu.memory_space<vmem>>, %arg2: memref<64x64xbf16, #tpu.memory_space<vmem>>, %arg3: memref<1x64xf32, #tpu.memory_space<vmem>>, %arg4: memref<1x64xf32, #tpu.memory_space<vmem>>, %arg5: memref<128x32xbf16, #tpu.memory_space<vmem>>, %arg6: memref<128x64xbf16, #tpu.memory_space<vmem>>) attributes {dimension_semantics = [#tpu.dimension_semantics<parallel>], iteration_bounds = array<i64: 1>, scalar_prefetch = 0 : i64, scratch_operands = 0 : i64, tpu.core_type = #tpu.core_type<tc>, window_params = [{transform_indices = @transform_0, window_bounds = array<i64: 128, 64>}, {pipeline_mode = #tpu.pipeline_mode<synchronous>, transform_indices = @transform_1, window_bounds = array<i64: 64, 64>}, {pipeline_mode = #tpu.pipeline_mode<synchronous>, transform_indices = @transform_2, window_bounds = array<i64: 1, 64>}, {pipeline_mode = #tpu.pipeline_mode<synchronous>, transform_indices = @transform_3, window_bounds = array<i64: 1, 64>}, {transform_indices = @transform_4, window_bounds = array<i64: 128, 32>}, {transform_indices = @transform_5, window_bounds = array<i64: 128, 64>}]} {
    %c0 = arith.constant 0 : index
    %c0_0 = arith.constant 0 : index
    %0 = vector.load %arg1[%c0, %c0_0] : memref<128x64xbf16, #tpu.memory_space<vmem>>, vector<128x64xbf16>
    %c0_1 = arith.constant 0 : index
    %c0_2 = arith.constant 0 : index
    %1 = vector.load %arg2[%c0_1, %c0_2] : memref<64x64xbf16, #tpu.memory_space<vmem>>, vector<64x64xbf16>
    %cst = arith.constant dense<0.000000e+00> : vector<128x64xf32>
    %2 = tpu.matmul %0, %1, %cst {dimension_numbers = #tpu.dot_dimension_numbers<[1], [0], [0], [1], [0, 0, 1, 1], [], []>} : vector<128x64xbf16>, vector<64x64xbf16>, vector<128x64xf32> -> vector<128x64xf32>
    %3 = vector.extract_strided_slice %2 {offsets = [0, 0], sizes = [128, 32], strides = [1, 1]} : vector<128x64xf32> to vector<128x32xf32>
    %4 = arith.truncf %3 : vector<128x32xf32> to vector<128x32xbf16>
    %c0_3 = arith.constant 0 : index
    %c0_4 = arith.constant 0 : index
    %5 = vector.load %arg5[%c0_3, %c0_4] : memref<128x32xbf16, #tpu.memory_space<vmem>>, vector<128x32xbf16>
    tpu.vector_store %arg5[%c0_3, %c0_4], %4 {strides = array<i32>} : memref<128x32xbf16, #tpu.memory_space<vmem>>, vector<128x32xbf16>,
    %c0_5 = arith.constant 0 : index
    %c0_6 = arith.constant 0 : index
    %6 = vector.load %arg3[%c0_5, %c0_6] : memref<1x64xf32, #tpu.memory_space<vmem>>, vector<1x64xf32>
    %7 = vector.broadcast %6 : vector<1x64xf32> to vector<128x64xf32>
    %8 = arith.mulf %2, %7 : vector<128x64xf32>
    %c0_7 = arith.constant 0 : index
    %c0_8 = arith.constant 0 : index
    %9 = vector.load %arg4[%c0_7, %c0_8] : memref<1x64xf32, #tpu.memory_space<vmem>>, vector<1x64xf32>
    %10 = vector.broadcast %9 : vector<1x64xf32> to vector<128x64xf32>
    %11 = arith.addf %8, %10 : vector<128x64xf32>
    %cst_9 = arith.constant 0.000000e+00 : f32
    %12 = vector.broadcast %cst_9 : f32 to vector<128x64xf32>
    %13 = arith.maximumf %11, %12 : vector<128x64xf32>
    %14 = arith.truncf %13 : vector<128x64xf32> to vector<128x64xbf16>
    %c0_10 = arith.constant 0 : index
    %c0_11 = arith.constant 0 : index
    %15 = vector.load %arg6[%c0_10, %c0_11] : memref<128x64xbf16, #tpu.memory_space<vmem>>, vector<128x64xbf16>
    tpu.vector_store %arg6[%c0_10, %c0_11], %14 {strides = array<i32>} : memref<128x64xbf16, #tpu.memory_space<vmem>>, vector<128x64xbf16>,
    return
  }
  func.func @transform_0(%arg0: i32) -> (i32, i32) {
    %c0_i32 = arith.constant 0 : i32
    %c0_i32_0 = arith.constant 0 : i32
    return %arg0, %c0_i32 : i32, i32
  }
  func.func @transform_1(%arg0: i32) -> (i32, i32) {
    %c0_i32 = arith.constant 0 : i32
    %c0_i32_0 = arith.constant 0 : i32
    %c0_i32_1 = arith.constant 0 : i32
    return %c0_i32, %c0_i32_0 : i32, i32
  }
  func.func @transform_2(%arg0: i32) -> (i32, i32) {
    %c0_i32 = arith.constant 0 : i32
    %c0_i32_0 = arith.constant 0 : i32
    %c0_i32_1 = arith.constant 0 : i32
    return %c0_i32, %c0_i32_0 : i32, i32
  }
  func.func @transform_3(%arg0: i32) -> (i32, i32) {
    %c0_i32 = arith.constant 0 : i32
    %c0_i32_0 = arith.constant 0 : i32
    %c0_i32_1 = arith.constant 0 : i32
    return %c0_i32, %c0_i32_0 : i32, i32
  }
  func.func @transform_4(%arg0: i32) -> (i32, i32) {
    %c0_i32 = arith.constant 0 : i32
    %c0_i32_0 = arith.constant 0 : i32
    return %arg0, %c0_i32 : i32, i32
  }
  func.func @transform_5(%arg0: i32) -> (i32, i32) {
    %c0_i32 = arith.constant 0 : i32
    %c0_i32_0 = arith.constant 0 : i32
    return %arg0, %c0_i32 : i32, i32
  }
}

module attributes {stable_mosaic.version = 11 : i64} {
  func.func @_conv3x3_kernel(%arg0: i32, %arg1: i32, %arg2: memref<1x6x10x32xbf16, #tpu.memory_space<vmem>>, %arg3: memref<3x96x32xbf16, #tpu.memory_space<vmem>>, %arg4: memref<1x32xf32, #tpu.memory_space<vmem>>, %arg5: memref<1x32xf32, #tpu.memory_space<vmem>>, %arg6: memref<1x16x32xbf16, #tpu.memory_space<vmem>>) attributes {dimension_semantics = [#tpu.dimension_semantics<parallel>, #tpu.dimension_semantics<parallel>], iteration_bounds = array<i64: 2, 2>, scalar_prefetch = 0 : i64, scratch_operands = 0 : i64, tpu.core_type = #tpu.core_type<tc>, window_params = [{transform_indices = @transform_0, window_bounds = array<i64: 1, 6, 10, 32>}, {pipeline_mode = #tpu.pipeline_mode<synchronous>, transform_indices = @transform_1, window_bounds = array<i64: 3, 96, 32>}, {pipeline_mode = #tpu.pipeline_mode<synchronous>, transform_indices = @transform_2, window_bounds = array<i64: 1, 32>}, {pipeline_mode = #tpu.pipeline_mode<synchronous>, transform_indices = @transform_3, window_bounds = array<i64: 1, 32>}, {transform_indices = @transform_4, window_bounds = array<i64: 1, 16, 32>}]} {
    %c2_i32 = arith.constant 2 : i32
    %0 = arith.muli %arg1, %c2_i32 : i32
    %c0 = arith.constant 0 : index
    %1 = arith.index_cast %0 : i32 to index
    %c0_0 = arith.constant 0 : index
    %c0_1 = arith.constant 0 : index
    %2 = vector.load %arg2[%c0, %1, %c0_0, %c0_1] : memref<1x6x10x32xbf16, #tpu.memory_space<vmem>>, vector<1x4x10x32xbf16>
    %3 = vector.shape_cast %2 : vector<1x4x10x32xbf16> to vector<4x10x32xbf16>
    %4 = vector.extract_strided_slice %3 {offsets = [0, 0, 0], sizes = [4, 8, 32], strides = [1, 1, 1]} : vector<4x10x32xbf16> to vector<4x8x32xbf16>
    %5 = vector.extract_strided_slice %4 {offsets = [0, 0, 0], sizes = [2, 8, 32], strides = [1, 1, 1]} : vector<4x8x32xbf16> to vector<2x8x32xbf16>
    %6 = vector.extract_strided_slice %4 {offsets = [1, 0, 0], sizes = [2, 8, 32], strides = [1, 1, 1]} : vector<4x8x32xbf16> to vector<2x8x32xbf16>
    %7 = vector.extract_strided_slice %4 {offsets = [2, 0, 0], sizes = [2, 8, 32], strides = [1, 1, 1]} : vector<4x8x32xbf16> to vector<2x8x32xbf16>
    %8 = tpu.concatenate %5, %6, %7 in 2 : vector<2x8x32xbf16>, vector<2x8x32xbf16>, vector<2x8x32xbf16> -> vector<2x8x96xbf16>
    %9 = vector.shape_cast %8 : vector<2x8x96xbf16> to vector<16x96xbf16>
    %c0_2 = arith.constant 0 : index
    %c0_3 = arith.constant 0 : index
    %c0_4 = arith.constant 0 : index
    %10 = vector.load %arg3[%c0_2, %c0_3, %c0_4] : memref<3x96x32xbf16, #tpu.memory_space<vmem>>, vector<1x96x32xbf16>
    %11 = vector.shape_cast %10 : vector<1x96x32xbf16> to vector<96x32xbf16>
    %cst = arith.constant dense<0.000000e+00> : vector<16x32xf32>
    %12 = tpu.matmul %9, %11, %cst {dimension_numbers = #tpu.dot_dimension_numbers<[1], [0], [0], [1], [0, 0, 1, 1], [], []>} : vector<16x96xbf16>, vector<96x32xbf16>, vector<16x32xf32> -> vector<16x32xf32>
    %13 = vector.extract_strided_slice %3 {offsets = [0, 1, 0], sizes = [4, 8, 32], strides = [1, 1, 1]} : vector<4x10x32xbf16> to vector<4x8x32xbf16>
    %14 = vector.extract_strided_slice %13 {offsets = [0, 0, 0], sizes = [2, 8, 32], strides = [1, 1, 1]} : vector<4x8x32xbf16> to vector<2x8x32xbf16>
    %15 = vector.extract_strided_slice %13 {offsets = [1, 0, 0], sizes = [2, 8, 32], strides = [1, 1, 1]} : vector<4x8x32xbf16> to vector<2x8x32xbf16>
    %16 = vector.extract_strided_slice %13 {offsets = [2, 0, 0], sizes = [2, 8, 32], strides = [1, 1, 1]} : vector<4x8x32xbf16> to vector<2x8x32xbf16>
    %17 = tpu.concatenate %14, %15, %16 in 2 : vector<2x8x32xbf16>, vector<2x8x32xbf16>, vector<2x8x32xbf16> -> vector<2x8x96xbf16>
    %18 = vector.shape_cast %17 : vector<2x8x96xbf16> to vector<16x96xbf16>
    %c1 = arith.constant 1 : index
    %c0_5 = arith.constant 0 : index
    %c0_6 = arith.constant 0 : index
    %19 = vector.load %arg3[%c1, %c0_5, %c0_6] : memref<3x96x32xbf16, #tpu.memory_space<vmem>>, vector<1x96x32xbf16>
    %20 = vector.shape_cast %19 : vector<1x96x32xbf16> to vector<96x32xbf16>
    %cst_7 = arith.constant dense<0.000000e+00> : vector<16x32xf32>
    %21 = tpu.matmul %18, %20, %cst_7 {dimension_numbers = #tpu.dot_dimension_numbers<[1], [0], [0], [1], [0, 0, 1, 1], [], []>} : vector<16x96xbf16>, vector<96x32xbf16>, vector<16x32xf32> -> vector<16x32xf32>
    %22 = arith.addf %12, %21 : vector<16x32xf32>
    %23 = vector.extract_strided_slice %3 {offsets = [0, 2, 0], sizes = [4, 8, 32], strides = [1, 1, 1]} : vector<4x10x32xbf16> to vector<4x8x32xbf16>
    %24 = vector.extract_strided_slice %23 {offsets = [0, 0, 0], sizes = [2, 8, 32], strides = [1, 1, 1]} : vector<4x8x32xbf16> to vector<2x8x32xbf16>
    %25 = vector.extract_strided_slice %23 {offsets = [1, 0, 0], sizes = [2, 8, 32], strides = [1, 1, 1]} : vector<4x8x32xbf16> to vector<2x8x32xbf16>
    %26 = vector.extract_strided_slice %23 {offsets = [2, 0, 0], sizes = [2, 8, 32], strides = [1, 1, 1]} : vector<4x8x32xbf16> to vector<2x8x32xbf16>
    %27 = tpu.concatenate %24, %25, %26 in 2 : vector<2x8x32xbf16>, vector<2x8x32xbf16>, vector<2x8x32xbf16> -> vector<2x8x96xbf16>
    %28 = vector.shape_cast %27 : vector<2x8x96xbf16> to vector<16x96xbf16>
    %c2 = arith.constant 2 : index
    %c0_8 = arith.constant 0 : index
    %c0_9 = arith.constant 0 : index
    %29 = vector.load %arg3[%c2, %c0_8, %c0_9] : memref<3x96x32xbf16, #tpu.memory_space<vmem>>, vector<1x96x32xbf16>
    %30 = vector.shape_cast %29 : vector<1x96x32xbf16> to vector<96x32xbf16>
    %cst_10 = arith.constant dense<0.000000e+00> : vector<16x32xf32>
    %31 = tpu.matmul %28, %30, %cst_10 {dimension_numbers = #tpu.dot_dimension_numbers<[1], [0], [0], [1], [0, 0, 1, 1], [], []>} : vector<16x96xbf16>, vector<96x32xbf16>, vector<16x32xf32> -> vector<16x32xf32>
    %32 = arith.addf %22, %31 : vector<16x32xf32>
    %c0_11 = arith.constant 0 : index
    %c0_12 = arith.constant 0 : index
    %33 = vector.load %arg4[%c0_11, %c0_12] : memref<1x32xf32, #tpu.memory_space<vmem>>, vector<1x32xf32>
    %34 = vector.broadcast %33 : vector<1x32xf32> to vector<16x32xf32>
    %35 = arith.mulf %32, %34 : vector<16x32xf32>
    %c0_13 = arith.constant 0 : index
    %c0_14 = arith.constant 0 : index
    %36 = vector.load %arg5[%c0_13, %c0_14] : memref<1x32xf32, #tpu.memory_space<vmem>>, vector<1x32xf32>
    %37 = vector.broadcast %36 : vector<1x32xf32> to vector<16x32xf32>
    %38 = arith.addf %35, %37 : vector<16x32xf32>
    %39 = arith.truncf %38 : vector<16x32xf32> to vector<16x32xbf16>
    %c0_15 = arith.constant 0 : index
    %c0_16 = arith.constant 0 : index
    %c0_17 = arith.constant 0 : index
    %40 = vector.load %arg6[%c0_15, %c0_16, %c0_17] : memref<1x16x32xbf16, #tpu.memory_space<vmem>>, vector<1x16x32xbf16>
    %41 = vector.shape_cast %40 : vector<1x16x32xbf16> to vector<16x32xbf16>
    %42 = vector.shape_cast %39 : vector<16x32xbf16> to vector<1x16x32xbf16>
    tpu.vector_store %arg6[%c0_15, %c0_16, %c0_17], %42 {strides = array<i32>} : memref<1x16x32xbf16, #tpu.memory_space<vmem>>, vector<1x16x32xbf16>,
    return
  }
  func.func @transform_0(%arg0: i32, %arg1: i32) -> (i32, i32, i32, i32) {
    %c0_i32 = arith.constant 0 : i32
    %c0_i32_0 = arith.constant 0 : i32
    %c0_i32_1 = arith.constant 0 : i32
    %c0_i32_2 = arith.constant 0 : i32
    return %arg0, %c0_i32, %c0_i32_0, %c0_i32_1 : i32, i32, i32, i32
  }
  func.func @transform_1(%arg0: i32, %arg1: i32) -> (i32, i32, i32) {
    %c0_i32 = arith.constant 0 : i32
    %c0_i32_0 = arith.constant 0 : i32
    %c0_i32_1 = arith.constant 0 : i32
    %c0_i32_2 = arith.constant 0 : i32
    return %c0_i32, %c0_i32_0, %c0_i32_1 : i32, i32, i32
  }
  func.func @transform_2(%arg0: i32, %arg1: i32) -> (i32, i32) {
    %c0_i32 = arith.constant 0 : i32
    %c0_i32_0 = arith.constant 0 : i32
    %c0_i32_1 = arith.constant 0 : i32
    return %c0_i32, %c0_i32_0 : i32, i32
  }
  func.func @transform_3(%arg0: i32, %arg1: i32) -> (i32, i32) {
    %c0_i32 = arith.constant 0 : i32
    %c0_i32_0 = arith.constant 0 : i32
    %c0_i32_1 = arith.constant 0 : i32
    return %c0_i32, %c0_i32_0 : i32, i32
  }
  func.func @transform_4(%arg0: i32, %arg1: i32) -> (i32, i32, i32) {
    %c0_i32 = arith.constant 0 : i32
    %c0_i32_0 = arith.constant 0 : i32
    return %arg0, %arg1, %c0_i32 : i32, i32, i32
  }
}

module attributes {stable_mosaic.version = 11 : i64} {
  func.func @_conv3x3_kernel(%arg0: i32, %arg1: i32, %arg2: memref<1x10x10x32xbf16, #tpu.memory_space<vmem>>, %arg3: memref<3x96x32xbf16, #tpu.memory_space<vmem>>, %arg4: memref<1x32xf32, #tpu.memory_space<vmem>>, %arg5: memref<1x32xf32, #tpu.memory_space<vmem>>, %arg6: memref<1x32x32xbf16, #tpu.memory_space<vmem>>) attributes {dimension_semantics = [#tpu.dimension_semantics<parallel>, #tpu.dimension_semantics<parallel>], iteration_bounds = array<i64: 2, 2>, scalar_prefetch = 0 : i64, scratch_operands = 0 : i64, tpu.core_type = #tpu.core_type<tc>, window_params = [{transform_indices = @transform_0, window_bounds = array<i64: 1, 10, 10, 32>}, {pipeline_mode = #tpu.pipeline_mode<synchronous>, transform_indices = @transform_1, window_bounds = array<i64: 3, 96, 32>}, {pipeline_mode = #tpu.pipeline_mode<synchronous>, transform_indices = @transform_2, window_bounds = array<i64: 1, 32>}, {pipeline_mode = #tpu.pipeline_mode<synchronous>, transform_indices = @transform_3, window_bounds = array<i64: 1, 32>}, {transform_indices = @transform_4, window_bounds = array<i64: 1, 32, 32>}]} {
    %c4_i32 = arith.constant 4 : i32
    %0 = arith.muli %arg1, %c4_i32 : i32
    %c0 = arith.constant 0 : index
    %1 = arith.index_cast %0 : i32 to index
    %c0_0 = arith.constant 0 : index
    %c0_1 = arith.constant 0 : index
    %2 = vector.load %arg2[%c0, %1, %c0_0, %c0_1] : memref<1x10x10x32xbf16, #tpu.memory_space<vmem>>, vector<1x6x10x32xbf16>
    %3 = vector.shape_cast %2 : vector<1x6x10x32xbf16> to vector<6x10x32xbf16>
    %4 = vector.extract_strided_slice %3 {offsets = [0, 0, 0], sizes = [6, 8, 32], strides = [1, 1, 1]} : vector<6x10x32xbf16> to vector<6x8x32xbf16>
    %5 = vector.extract_strided_slice %4 {offsets = [0, 0, 0], sizes = [4, 8, 32], strides = [1, 1, 1]} : vector<6x8x32xbf16> to vector<4x8x32xbf16>
    %6 = vector.extract_strided_slice %4 {offsets = [1, 0, 0], sizes = [4, 8, 32], strides = [1, 1, 1]} : vector<6x8x32xbf16> to vector<4x8x32xbf16>
    %7 = vector.extract_strided_slice %4 {offsets = [2, 0, 0], sizes = [4, 8, 32], strides = [1, 1, 1]} : vector<6x8x32xbf16> to vector<4x8x32xbf16>
    %8 = tpu.concatenate %5, %6, %7 in 2 : vector<4x8x32xbf16>, vector<4x8x32xbf16>, vector<4x8x32xbf16> -> vector<4x8x96xbf16>
    %9 = vector.shape_cast %8 : vector<4x8x96xbf16> to vector<32x96xbf16>
    %c0_2 = arith.constant 0 : index
    %c0_3 = arith.constant 0 : index
    %c0_4 = arith.constant 0 : index
    %10 = vector.load %arg3[%c0_2, %c0_3, %c0_4] : memref<3x96x32xbf16, #tpu.memory_space<vmem>>, vector<1x96x32xbf16>
    %11 = vector.shape_cast %10 : vector<1x96x32xbf16> to vector<96x32xbf16>
    %cst = arith.constant dense<0.000000e+00> : vector<32x32xf32>
    %12 = tpu.matmul %9, %11, %cst {dimension_numbers = #tpu.dot_dimension_numbers<[1], [0], [0], [1], [0, 0, 1, 1], [], []>} : vector<32x96xbf16>, vector<96x32xbf16>, vector<32x32xf32> -> vector<32x32xf32>
    %13 = vector.extract_strided_slice %3 {offsets = [0, 1, 0], sizes = [6, 8, 32], strides = [1, 1, 1]} : vector<6x10x32xbf16> to vector<6x8x32xbf16>
    %14 = vector.extract_strided_slice %13 {offsets = [0, 0, 0], sizes = [4, 8, 32], strides = [1, 1, 1]} : vector<6x8x32xbf16> to vector<4x8x32xbf16>
    %15 = vector.extract_strided_slice %13 {offsets = [1, 0, 0], sizes = [4, 8, 32], strides = [1, 1, 1]} : vector<6x8x32xbf16> to vector<4x8x32xbf16>
    %16 = vector.extract_strided_slice %13 {offsets = [2, 0, 0], sizes = [4, 8, 32], strides = [1, 1, 1]} : vector<6x8x32xbf16> to vector<4x8x32xbf16>
    %17 = tpu.concatenate %14, %15, %16 in 2 : vector<4x8x32xbf16>, vector<4x8x32xbf16>, vector<4x8x32xbf16> -> vector<4x8x96xbf16>
    %18 = vector.shape_cast %17 : vector<4x8x96xbf16> to vector<32x96xbf16>
    %c1 = arith.constant 1 : index
    %c0_5 = arith.constant 0 : index
    %c0_6 = arith.constant 0 : index
    %19 = vector.load %arg3[%c1, %c0_5, %c0_6] : memref<3x96x32xbf16, #tpu.memory_space<vmem>>, vector<1x96x32xbf16>
    %20 = vector.shape_cast %19 : vector<1x96x32xbf16> to vector<96x32xbf16>
    %cst_7 = arith.constant dense<0.000000e+00> : vector<32x32xf32>
    %21 = tpu.matmul %18, %20, %cst_7 {dimension_numbers = #tpu.dot_dimension_numbers<[1], [0], [0], [1], [0, 0, 1, 1], [], []>} : vector<32x96xbf16>, vector<96x32xbf16>, vector<32x32xf32> -> vector<32x32xf32>
    %22 = arith.addf %12, %21 : vector<32x32xf32>
    %23 = vector.extract_strided_slice %3 {offsets = [0, 2, 0], sizes = [6, 8, 32], strides = [1, 1, 1]} : vector<6x10x32xbf16> to vector<6x8x32xbf16>
    %24 = vector.extract_strided_slice %23 {offsets = [0, 0, 0], sizes = [4, 8, 32], strides = [1, 1, 1]} : vector<6x8x32xbf16> to vector<4x8x32xbf16>
    %25 = vector.extract_strided_slice %23 {offsets = [1, 0, 0], sizes = [4, 8, 32], strides = [1, 1, 1]} : vector<6x8x32xbf16> to vector<4x8x32xbf16>
    %26 = vector.extract_strided_slice %23 {offsets = [2, 0, 0], sizes = [4, 8, 32], strides = [1, 1, 1]} : vector<6x8x32xbf16> to vector<4x8x32xbf16>
    %27 = tpu.concatenate %24, %25, %26 in 2 : vector<4x8x32xbf16>, vector<4x8x32xbf16>, vector<4x8x32xbf16> -> vector<4x8x96xbf16>
    %28 = vector.shape_cast %27 : vector<4x8x96xbf16> to vector<32x96xbf16>
    %c2 = arith.constant 2 : index
    %c0_8 = arith.constant 0 : index
    %c0_9 = arith.constant 0 : index
    %29 = vector.load %arg3[%c2, %c0_8, %c0_9] : memref<3x96x32xbf16, #tpu.memory_space<vmem>>, vector<1x96x32xbf16>
    %30 = vector.shape_cast %29 : vector<1x96x32xbf16> to vector<96x32xbf16>
    %cst_10 = arith.constant dense<0.000000e+00> : vector<32x32xf32>
    %31 = tpu.matmul %28, %30, %cst_10 {dimension_numbers = #tpu.dot_dimension_numbers<[1], [0], [0], [1], [0, 0, 1, 1], [], []>} : vector<32x96xbf16>, vector<96x32xbf16>, vector<32x32xf32> -> vector<32x32xf32>
    %32 = arith.addf %22, %31 : vector<32x32xf32>
    %c0_11 = arith.constant 0 : index
    %c0_12 = arith.constant 0 : index
    %33 = vector.load %arg4[%c0_11, %c0_12] : memref<1x32xf32, #tpu.memory_space<vmem>>, vector<1x32xf32>
    %34 = vector.broadcast %33 : vector<1x32xf32> to vector<32x32xf32>
    %35 = arith.mulf %32, %34 : vector<32x32xf32>
    %c0_13 = arith.constant 0 : index
    %c0_14 = arith.constant 0 : index
    %36 = vector.load %arg5[%c0_13, %c0_14] : memref<1x32xf32, #tpu.memory_space<vmem>>, vector<1x32xf32>
    %37 = vector.broadcast %36 : vector<1x32xf32> to vector<32x32xf32>
    %38 = arith.addf %35, %37 : vector<32x32xf32>
    %39 = arith.truncf %38 : vector<32x32xf32> to vector<32x32xbf16>
    %c0_15 = arith.constant 0 : index
    %c0_16 = arith.constant 0 : index
    %c0_17 = arith.constant 0 : index
    %40 = vector.load %arg6[%c0_15, %c0_16, %c0_17] : memref<1x32x32xbf16, #tpu.memory_space<vmem>>, vector<1x32x32xbf16>
    %41 = vector.shape_cast %40 : vector<1x32x32xbf16> to vector<32x32xbf16>
    %42 = vector.shape_cast %39 : vector<32x32xbf16> to vector<1x32x32xbf16>
    tpu.vector_store %arg6[%c0_15, %c0_16, %c0_17], %42 {strides = array<i32>} : memref<1x32x32xbf16, #tpu.memory_space<vmem>>, vector<1x32x32xbf16>,
    return
  }
  func.func @transform_0(%arg0: i32, %arg1: i32) -> (i32, i32, i32, i32) {
    %c0_i32 = arith.constant 0 : i32
    %c0_i32_0 = arith.constant 0 : i32
    %c0_i32_1 = arith.constant 0 : i32
    %c0_i32_2 = arith.constant 0 : i32
    return %arg0, %c0_i32, %c0_i32_0, %c0_i32_1 : i32, i32, i32, i32
  }
  func.func @transform_1(%arg0: i32, %arg1: i32) -> (i32, i32, i32) {
    %c0_i32 = arith.constant 0 : i32
    %c0_i32_0 = arith.constant 0 : i32
    %c0_i32_1 = arith.constant 0 : i32
    %c0_i32_2 = arith.constant 0 : i32
    return %c0_i32, %c0_i32_0, %c0_i32_1 : i32, i32, i32
  }
  func.func @transform_2(%arg0: i32, %arg1: i32) -> (i32, i32) {
    %c0_i32 = arith.constant 0 : i32
    %c0_i32_0 = arith.constant 0 : i32
    %c0_i32_1 = arith.constant 0 : i32
    return %c0_i32, %c0_i32_0 : i32, i32
  }
  func.func @transform_3(%arg0: i32, %arg1: i32) -> (i32, i32) {
    %c0_i32 = arith.constant 0 : i32
    %c0_i32_0 = arith.constant 0 : i32
    %c0_i32_1 = arith.constant 0 : i32
    return %c0_i32, %c0_i32_0 : i32, i32
  }
  func.func @transform_4(%arg0: i32, %arg1: i32) -> (i32, i32, i32) {
    %c0_i32 = arith.constant 0 : i32
    %c0_i32_0 = arith.constant 0 : i32
    return %arg0, %arg1, %c0_i32 : i32, i32, i32
  }
}

module attributes {stable_mosaic.version = 11 : i64} {
  func.func @_classifier_kernel(%arg0: i32, %arg1: memref<2x64x32xbf16, #tpu.memory_space<vmem>>, %arg2: memref<2x64x32xbf16, #tpu.memory_space<vmem>>, %arg3: memref<64x32xbf16, #tpu.memory_space<vmem>>, %arg4: memref<1x32xf32, #tpu.memory_space<vmem>>, %arg5: memref<32x16xbf16, #tpu.memory_space<vmem>>, %arg6: memref<1x16xf32, #tpu.memory_space<vmem>>, %arg7: memref<2x16xf32, #tpu.memory_space<vmem>>) attributes {dimension_semantics = [#tpu.dimension_semantics<arbitrary>], iteration_bounds = array<i64: 1>, scalar_prefetch = 0 : i64, scratch_operands = 0 : i64, tpu.core_type = #tpu.core_type<tc>, window_params = [{pipeline_mode = #tpu.pipeline_mode<synchronous>, transform_indices = @transform_0, window_bounds = array<i64: 2, 64, 32>}, {pipeline_mode = #tpu.pipeline_mode<synchronous>, transform_indices = @transform_1, window_bounds = array<i64: 2, 64, 32>}, {pipeline_mode = #tpu.pipeline_mode<synchronous>, transform_indices = @transform_2, window_bounds = array<i64: 64, 32>}, {pipeline_mode = #tpu.pipeline_mode<synchronous>, transform_indices = @transform_3, window_bounds = array<i64: 1, 32>}, {pipeline_mode = #tpu.pipeline_mode<synchronous>, transform_indices = @transform_4, window_bounds = array<i64: 32, 16>}, {pipeline_mode = #tpu.pipeline_mode<synchronous>, transform_indices = @transform_5, window_bounds = array<i64: 1, 16>}, {pipeline_mode = #tpu.pipeline_mode<synchronous>, transform_indices = @transform_6, window_bounds = array<i64: 2, 16>}]} {
    %c0 = arith.constant 0 : index
    %c0_0 = arith.constant 0 : index
    %c0_1 = arith.constant 0 : index
    %0 = vector.load %arg1[%c0, %c0_0, %c0_1] : memref<2x64x32xbf16, #tpu.memory_space<vmem>>, vector<2x64x32xbf16>
    %1 = arith.extf %0 : vector<2x64x32xbf16> to vector<2x64x32xf32>
    %cst = arith.constant dense<0.000000e+00> : vector<2x32xf32>
    %2 = vector.multi_reduction <add>, %1, %cst [1] : vector<2x64x32xf32> to vector<2x32xf32>
    %cst_2 = arith.constant 6.400000e+01 : f32
    %3 = vector.broadcast %cst_2 : f32 to vector<2x32xf32>
    %4 = arith.divf %2, %3 : vector<2x32xf32>
    %c0_3 = arith.constant 0 : index
    %c0_4 = arith.constant 0 : index
    %c0_5 = arith.constant 0 : index
    %5 = vector.load %arg2[%c0_3, %c0_4, %c0_5] : memref<2x64x32xbf16, #tpu.memory_space<vmem>>, vector<2x64x32xbf16>
    %6 = arith.extf %5 : vector<2x64x32xbf16> to vector<2x64x32xf32>
    %cst_6 = arith.constant dense<0.000000e+00> : vector<2x32xf32>
    %7 = vector.multi_reduction <add>, %6, %cst_6 [1] : vector<2x64x32xf32> to vector<2x32xf32>
    %cst_7 = arith.constant 6.400000e+01 : f32
    %8 = vector.broadcast %cst_7 : f32 to vector<2x32xf32>
    %9 = arith.divf %7, %8 : vector<2x32xf32>
    %10 = tpu.concatenate %4, %9 in 1 : vector<2x32xf32>, vector<2x32xf32> -> vector<2x64xf32>
    %11 = arith.truncf %10 : vector<2x64xf32> to vector<2x64xbf16>
    %c0_8 = arith.constant 0 : index
    %c0_9 = arith.constant 0 : index
    %12 = vector.load %arg3[%c0_8, %c0_9] : memref<64x32xbf16, #tpu.memory_space<vmem>>, vector<64x32xbf16>
    %cst_10 = arith.constant dense<0.000000e+00> : vector<2x32xf32>
    %13 = tpu.matmul %11, %12, %cst_10 {dimension_numbers = #tpu.dot_dimension_numbers<[1], [0], [0], [1], [0, 0, 1, 1], [], []>} : vector<2x64xbf16>, vector<64x32xbf16>, vector<2x32xf32> -> vector<2x32xf32>
    %c0_11 = arith.constant 0 : index
    %c0_12 = arith.constant 0 : index
    %14 = vector.load %arg4[%c0_11, %c0_12] : memref<1x32xf32, #tpu.memory_space<vmem>>, vector<1x32xf32>
    %15 = vector.broadcast %14 : vector<1x32xf32> to vector<2x32xf32>
    %16 = arith.addf %13, %15 : vector<2x32xf32>
    %cst_13 = arith.constant 0.000000e+00 : f32
    %17 = vector.broadcast %cst_13 : f32 to vector<2x32xf32>
    %18 = arith.maximumf %16, %17 : vector<2x32xf32>
    %19 = arith.truncf %18 : vector<2x32xf32> to vector<2x32xbf16>
    %c0_14 = arith.constant 0 : index
    %c0_15 = arith.constant 0 : index
    %20 = vector.load %arg5[%c0_14, %c0_15] : memref<32x16xbf16, #tpu.memory_space<vmem>>, vector<32x16xbf16>
    %cst_16 = arith.constant dense<0.000000e+00> : vector<2x16xf32>
    %21 = tpu.matmul %19, %20, %cst_16 {dimension_numbers = #tpu.dot_dimension_numbers<[1], [0], [0], [1], [0, 0, 1, 1], [], []>} : vector<2x32xbf16>, vector<32x16xbf16>, vector<2x16xf32> -> vector<2x16xf32>
    %c0_17 = arith.constant 0 : index
    %c0_18 = arith.constant 0 : index
    %22 = vector.load %arg6[%c0_17, %c0_18] : memref<1x16xf32, #tpu.memory_space<vmem>>, vector<1x16xf32>
    %23 = vector.broadcast %22 : vector<1x16xf32> to vector<2x16xf32>
    %24 = arith.addf %21, %23 : vector<2x16xf32>
    %c0_19 = arith.constant 0 : index
    %c0_20 = arith.constant 0 : index
    %25 = vector.load %arg7[%c0_19, %c0_20] : memref<2x16xf32, #tpu.memory_space<vmem>>, vector<2x16xf32>
    tpu.vector_store %arg7[%c0_19, %c0_20], %24 {strides = array<i32>} : memref<2x16xf32, #tpu.memory_space<vmem>>, vector<2x16xf32>,
    return
  }
  func.func @transform_0(%arg0: i32) -> (i32, i32, i32) {
    %c0_i32 = arith.constant 0 : i32
    %c0_i32_0 = arith.constant 0 : i32
    %c0_i32_1 = arith.constant 0 : i32
    %c0_i32_2 = arith.constant 0 : i32
    return %c0_i32, %c0_i32_0, %c0_i32_1 : i32, i32, i32
  }
  func.func @transform_1(%arg0: i32) -> (i32, i32, i32) {
    %c0_i32 = arith.constant 0 : i32
    %c0_i32_0 = arith.constant 0 : i32
    %c0_i32_1 = arith.constant 0 : i32
    %c0_i32_2 = arith.constant 0 : i32
    return %c0_i32, %c0_i32_0, %c0_i32_1 : i32, i32, i32
  }
  func.func @transform_2(%arg0: i32) -> (i32, i32) {
    %c0_i32 = arith.constant 0 : i32
    %c0_i32_0 = arith.constant 0 : i32
    %c0_i32_1 = arith.constant 0 : i32
    return %c0_i32, %c0_i32_0 : i32, i32
  }
  func.func @transform_3(%arg0: i32) -> (i32, i32) {
    %c0_i32 = arith.constant 0 : i32
    %c0_i32_0 = arith.constant 0 : i32
    %c0_i32_1 = arith.constant 0 : i32
    return %c0_i32, %c0_i32_0 : i32, i32
  }
  func.func @transform_4(%arg0: i32) -> (i32, i32) {
    %c0_i32 = arith.constant 0 : i32
    %c0_i32_0 = arith.constant 0 : i32
    %c0_i32_1 = arith.constant 0 : i32
    return %c0_i32, %c0_i32_0 : i32, i32
  }
  func.func @transform_5(%arg0: i32) -> (i32, i32) {
    %c0_i32 = arith.constant 0 : i32
    %c0_i32_0 = arith.constant 0 : i32
    %c0_i32_1 = arith.constant 0 : i32
    return %c0_i32, %c0_i32_0 : i32, i32
  }
  func.func @transform_6(%arg0: i32) -> (i32, i32) {
    %c0_i32 = arith.constant 0 : i32
    %c0_i32_0 = arith.constant 0 : i32
    %c0_i32_1 = arith.constant 0 : i32
    return %c0_i32, %c0_i32_0 : i32, i32
  }
}

module attributes {stable_mosaic.version = 11 : i64} {
  func.func @_conv3x3_kernel(%arg0: i32, %arg1: i32, %arg2: memref<1x10x10x32xbf16, #tpu.memory_space<vmem>>, %arg3: memref<3x96x32xbf16, #tpu.memory_space<vmem>>, %arg4: memref<1x32xf32, #tpu.memory_space<vmem>>, %arg5: memref<1x32xf32, #tpu.memory_space<vmem>>, %arg6: memref<1x32x32xbf16, #tpu.memory_space<vmem>>, %arg7: memref<1x32x32xbf16, #tpu.memory_space<vmem>>) attributes {dimension_semantics = [#tpu.dimension_semantics<parallel>, #tpu.dimension_semantics<parallel>], iteration_bounds = array<i64: 2, 2>, scalar_prefetch = 0 : i64, scratch_operands = 0 : i64, tpu.core_type = #tpu.core_type<tc>, window_params = [{transform_indices = @transform_0, window_bounds = array<i64: 1, 10, 10, 32>}, {pipeline_mode = #tpu.pipeline_mode<synchronous>, transform_indices = @transform_1, window_bounds = array<i64: 3, 96, 32>}, {pipeline_mode = #tpu.pipeline_mode<synchronous>, transform_indices = @transform_2, window_bounds = array<i64: 1, 32>}, {pipeline_mode = #tpu.pipeline_mode<synchronous>, transform_indices = @transform_3, window_bounds = array<i64: 1, 32>}, {transform_indices = @transform_4, window_bounds = array<i64: 1, 32, 32>}, {transform_indices = @transform_5, window_bounds = array<i64: 1, 32, 32>}]} {
    %c4_i32 = arith.constant 4 : i32
    %0 = arith.muli %arg1, %c4_i32 : i32
    %c0 = arith.constant 0 : index
    %1 = arith.index_cast %0 : i32 to index
    %c0_0 = arith.constant 0 : index
    %c0_1 = arith.constant 0 : index
    %2 = vector.load %arg2[%c0, %1, %c0_0, %c0_1] : memref<1x10x10x32xbf16, #tpu.memory_space<vmem>>, vector<1x6x10x32xbf16>
    %3 = vector.shape_cast %2 : vector<1x6x10x32xbf16> to vector<6x10x32xbf16>
    %4 = vector.extract_strided_slice %3 {offsets = [0, 0, 0], sizes = [6, 8, 32], strides = [1, 1, 1]} : vector<6x10x32xbf16> to vector<6x8x32xbf16>
    %5 = vector.extract_strided_slice %4 {offsets = [0, 0, 0], sizes = [4, 8, 32], strides = [1, 1, 1]} : vector<6x8x32xbf16> to vector<4x8x32xbf16>
    %6 = vector.extract_strided_slice %4 {offsets = [1, 0, 0], sizes = [4, 8, 32], strides = [1, 1, 1]} : vector<6x8x32xbf16> to vector<4x8x32xbf16>
    %7 = vector.extract_strided_slice %4 {offsets = [2, 0, 0], sizes = [4, 8, 32], strides = [1, 1, 1]} : vector<6x8x32xbf16> to vector<4x8x32xbf16>
    %8 = tpu.concatenate %5, %6, %7 in 2 : vector<4x8x32xbf16>, vector<4x8x32xbf16>, vector<4x8x32xbf16> -> vector<4x8x96xbf16>
    %9 = vector.shape_cast %8 : vector<4x8x96xbf16> to vector<32x96xbf16>
    %c0_2 = arith.constant 0 : index
    %c0_3 = arith.constant 0 : index
    %c0_4 = arith.constant 0 : index
    %10 = vector.load %arg3[%c0_2, %c0_3, %c0_4] : memref<3x96x32xbf16, #tpu.memory_space<vmem>>, vector<1x96x32xbf16>
    %11 = vector.shape_cast %10 : vector<1x96x32xbf16> to vector<96x32xbf16>
    %cst = arith.constant dense<0.000000e+00> : vector<32x32xf32>
    %12 = tpu.matmul %9, %11, %cst {dimension_numbers = #tpu.dot_dimension_numbers<[1], [0], [0], [1], [0, 0, 1, 1], [], []>} : vector<32x96xbf16>, vector<96x32xbf16>, vector<32x32xf32> -> vector<32x32xf32>
    %13 = vector.extract_strided_slice %3 {offsets = [0, 1, 0], sizes = [6, 8, 32], strides = [1, 1, 1]} : vector<6x10x32xbf16> to vector<6x8x32xbf16>
    %14 = vector.extract_strided_slice %13 {offsets = [0, 0, 0], sizes = [4, 8, 32], strides = [1, 1, 1]} : vector<6x8x32xbf16> to vector<4x8x32xbf16>
    %15 = vector.extract_strided_slice %13 {offsets = [1, 0, 0], sizes = [4, 8, 32], strides = [1, 1, 1]} : vector<6x8x32xbf16> to vector<4x8x32xbf16>
    %16 = vector.extract_strided_slice %13 {offsets = [2, 0, 0], sizes = [4, 8, 32], strides = [1, 1, 1]} : vector<6x8x32xbf16> to vector<4x8x32xbf16>
    %17 = tpu.concatenate %14, %15, %16 in 2 : vector<4x8x32xbf16>, vector<4x8x32xbf16>, vector<4x8x32xbf16> -> vector<4x8x96xbf16>
    %18 = vector.shape_cast %17 : vector<4x8x96xbf16> to vector<32x96xbf16>
    %c1 = arith.constant 1 : index
    %c0_5 = arith.constant 0 : index
    %c0_6 = arith.constant 0 : index
    %19 = vector.load %arg3[%c1, %c0_5, %c0_6] : memref<3x96x32xbf16, #tpu.memory_space<vmem>>, vector<1x96x32xbf16>
    %20 = vector.shape_cast %19 : vector<1x96x32xbf16> to vector<96x32xbf16>
    %cst_7 = arith.constant dense<0.000000e+00> : vector<32x32xf32>
    %21 = tpu.matmul %18, %20, %cst_7 {dimension_numbers = #tpu.dot_dimension_numbers<[1], [0], [0], [1], [0, 0, 1, 1], [], []>} : vector<32x96xbf16>, vector<96x32xbf16>, vector<32x32xf32> -> vector<32x32xf32>
    %22 = arith.addf %12, %21 : vector<32x32xf32>
    %23 = vector.extract_strided_slice %3 {offsets = [0, 2, 0], sizes = [6, 8, 32], strides = [1, 1, 1]} : vector<6x10x32xbf16> to vector<6x8x32xbf16>
    %24 = vector.extract_strided_slice %23 {offsets = [0, 0, 0], sizes = [4, 8, 32], strides = [1, 1, 1]} : vector<6x8x32xbf16> to vector<4x8x32xbf16>
    %25 = vector.extract_strided_slice %23 {offsets = [1, 0, 0], sizes = [4, 8, 32], strides = [1, 1, 1]} : vector<6x8x32xbf16> to vector<4x8x32xbf16>
    %26 = vector.extract_strided_slice %23 {offsets = [2, 0, 0], sizes = [4, 8, 32], strides = [1, 1, 1]} : vector<6x8x32xbf16> to vector<4x8x32xbf16>
    %27 = tpu.concatenate %24, %25, %26 in 2 : vector<4x8x32xbf16>, vector<4x8x32xbf16>, vector<4x8x32xbf16> -> vector<4x8x96xbf16>
    %28 = vector.shape_cast %27 : vector<4x8x96xbf16> to vector<32x96xbf16>
    %c2 = arith.constant 2 : index
    %c0_8 = arith.constant 0 : index
    %c0_9 = arith.constant 0 : index
    %29 = vector.load %arg3[%c2, %c0_8, %c0_9] : memref<3x96x32xbf16, #tpu.memory_space<vmem>>, vector<1x96x32xbf16>
    %30 = vector.shape_cast %29 : vector<1x96x32xbf16> to vector<96x32xbf16>
    %cst_10 = arith.constant dense<0.000000e+00> : vector<32x32xf32>
    %31 = tpu.matmul %28, %30, %cst_10 {dimension_numbers = #tpu.dot_dimension_numbers<[1], [0], [0], [1], [0, 0, 1, 1], [], []>} : vector<32x96xbf16>, vector<96x32xbf16>, vector<32x32xf32> -> vector<32x32xf32>
    %32 = arith.addf %22, %31 : vector<32x32xf32>
    %c0_11 = arith.constant 0 : index
    %c0_12 = arith.constant 0 : index
    %33 = vector.load %arg4[%c0_11, %c0_12] : memref<1x32xf32, #tpu.memory_space<vmem>>, vector<1x32xf32>
    %34 = vector.broadcast %33 : vector<1x32xf32> to vector<32x32xf32>
    %35 = arith.mulf %32, %34 : vector<32x32xf32>
    %c0_13 = arith.constant 0 : index
    %c0_14 = arith.constant 0 : index
    %36 = vector.load %arg5[%c0_13, %c0_14] : memref<1x32xf32, #tpu.memory_space<vmem>>, vector<1x32xf32>
    %37 = vector.broadcast %36 : vector<1x32xf32> to vector<32x32xf32>
    %38 = arith.addf %35, %37 : vector<32x32xf32>
    %c0_15 = arith.constant 0 : index
    %c0_16 = arith.constant 0 : index
    %c0_17 = arith.constant 0 : index
    %39 = vector.load %arg6[%c0_15, %c0_16, %c0_17] : memref<1x32x32xbf16, #tpu.memory_space<vmem>>, vector<1x32x32xbf16>
    %40 = vector.shape_cast %39 : vector<1x32x32xbf16> to vector<32x32xbf16>
    %41 = arith.extf %40 : vector<32x32xbf16> to vector<32x32xf32>
    %42 = arith.negf %41 : vector<32x32xf32>
    %43 = math.exp %42 : vector<32x32xf32>
    %cst_18 = arith.constant 1.000000e+00 : f32
    %44 = vector.broadcast %cst_18 : f32 to vector<32x32xf32>
    %45 = arith.addf %44, %43 : vector<32x32xf32>
    %46 = arith.divf %44, %45 : vector<32x32xf32>
    %47 = arith.mulf %38, %46 : vector<32x32xf32>
    %48 = arith.truncf %47 : vector<32x32xf32> to vector<32x32xbf16>
    %c0_19 = arith.constant 0 : index
    %c0_20 = arith.constant 0 : index
    %c0_21 = arith.constant 0 : index
    %49 = vector.load %arg7[%c0_19, %c0_20, %c0_21] : memref<1x32x32xbf16, #tpu.memory_space<vmem>>, vector<1x32x32xbf16>
    %50 = vector.shape_cast %49 : vector<1x32x32xbf16> to vector<32x32xbf16>
    %51 = vector.shape_cast %48 : vector<32x32xbf16> to vector<1x32x32xbf16>
    tpu.vector_store %arg7[%c0_19, %c0_20, %c0_21], %51 {strides = array<i32>} : memref<1x32x32xbf16, #tpu.memory_space<vmem>>, vector<1x32x32xbf16>,
    return
  }
  func.func @transform_0(%arg0: i32, %arg1: i32) -> (i32, i32, i32, i32) {
    %c0_i32 = arith.constant 0 : i32
    %c0_i32_0 = arith.constant 0 : i32
    %c0_i32_1 = arith.constant 0 : i32
    %c0_i32_2 = arith.constant 0 : i32
    return %arg0, %c0_i32, %c0_i32_0, %c0_i32_1 : i32, i32, i32, i32
  }
  func.func @transform_1(%arg0: i32, %arg1: i32) -> (i32, i32, i32) {
    %c0_i32 = arith.constant 0 : i32
    %c0_i32_0 = arith.constant 0 : i32
    %c0_i32_1 = arith.constant 0 : i32
    %c0_i32_2 = arith.constant 0 : i32
    return %c0_i32, %c0_i32_0, %c0_i32_1 : i32, i32, i32
  }
  func.func @transform_2(%arg0: i32, %arg1: i32) -> (i32, i32) {
    %c0_i32 = arith.constant 0 : i32
    %c0_i32_0 = arith.constant 0 : i32
    %c0_i32_1 = arith.constant 0 : i32
    return %c0_i32, %c0_i32_0 : i32, i32
  }
  func.func @transform_3(%arg0: i32, %arg1: i32) -> (i32, i32) {
    %c0_i32 = arith.constant 0 : i32
    %c0_i32_0 = arith.constant 0 : i32
    %c0_i32_1 = arith.constant 0 : i32
    return %c0_i32, %c0_i32_0 : i32, i32
  }
  func.func @transform_4(%arg0: i32, %arg1: i32) -> (i32, i32, i32) {
    %c0_i32 = arith.constant 0 : i32
    %c0_i32_0 = arith.constant 0 : i32
    return %arg0, %arg1, %c0_i32 : i32, i32, i32
  }
  func.func @transform_5(%arg0: i32, %arg1: i32) -> (i32, i32, i32) {
    %c0_i32 = arith.constant 0 : i32
    %c0_i32_0 = arith.constant 0 : i32
    return %arg0, %arg1, %c0_i32 : i32, i32, i32
  }
}

</mosaic_0001>

<bundles_post_ra>
// kernel: hsimsi_forward.10
= control target key start
LH: loop header
LB: loop body
LE: loop exit
PB: predicated region body
PF: predicated region fallthrough
CT: control target
= control target key end

     0   :  { %vm103_vm0 = vcmask 1045504   ;;  %v602_v0 = vmov 0.0   ;;  %vm603_vm1 = vmmov 0   ;;  %vm63_vm2 = vcmask 97280   ;;  %s908_s1 = inlined_call_operand.vmem [shape: bf16[12,64], index: 1, kind: input, shape index: {}]   ;;  %s909_s0 = inlined_call_operand.vmem [shape: f32[200,12], index: 0, kind: input, shape index: {}]   ;;  %s910_s2 = inlined_call_operand.vmem [shape: f32[1,64], index: 2, kind: input, shape index: {}]   ;;  %s911_s3 = inlined_call_operand.vmem [shape: f32[1,64], index: 3, kind: input, shape index: {}]   ;;  %s912_s4 = inlined_call_operand.vmem [shape: bf16[200,64], index: 4, kind: output, shape index: {}]  }
   0x1   :  { %543 = vmatprep.subr.bf16.mxu0 %v602_v0  ;;  %v601_v1 = vld [vmem:[%s908_s1] sm:$0x3f]   ;;  %545 = vmatprep.mubr.msk.bf16.mxu0 %vm603_vm1, %v602_v0  ;;  %v19_v3 = vld [vmem:[%s909_s0 + $0x8] sm:$0xff]  ;;  %v32_v4 = vld [vmem:[%s909_s0 + $0x70] sm:$0xff]  ;;  %vm433_vm3 = vcmask 519168  }
   0x2   :  { %v18_v2 = vld [vmem:[%s909_s0] sm:$0xff]  ;;  %597 = vmatprep.subr.bf16.mxu1 %v602_v0  ;;  %573 = vmatprep.mubr.msk.bf16.mxu1 %vm603_vm1, %v602_v0  ;;  %v105_v5 = vsel %vm103_vm0, %v601_v1, 0  ;;  %v33_v7 = vld [vmem:[%s909_s0 + $0x78] sm:$0xff]  ;;  %v20_v9 = vld [vmem:[%s909_s0 + $0x10] sm:$0xff] }
   0x3   :  { %v43_v6 = vpack.c.bf16 %v19_v3, %v18_v2  ;;  %544 = vmatpush3.bf16.msra.mxu0 %v105_v5  ;;  %598 = vmatpush3.bf16.msra.mxu1 %v105_v5  ;;  %v50_v8 = vpack.c.bf16 %v33_v7, %v32_v4  ;;  %v21_v10 = vld [vmem:[%s909_s0 + $0x18] sm:$0xff]  ;;  %v34_v11 = vld [vmem:[%s909_s0 + $0x80] sm:$0xff]  ;;  %v35_v12 = vld [vmem:[%s909_s0 + $0x88] sm:$0xff] }
   0x4   :  { %v44_v13 = vpack.c.bf16 %v21_v10, %v20_v9  ;;  %v51_v14 = vpack.c.bf16 %v35_v12, %v34_v11  ;;  %v22_v15 = vld [vmem:[%s909_s0 + $0x20] sm:$0xff]  ;;  %v23_v16 = vld [vmem:[%s909_s0 + $0x28] sm:$0xff]  ;;  %v36_v17 = vld [vmem:[%s909_s0 + $0x90] sm:$0xff] }
   0x5   :  { %v37_v18 = vld [vmem:[%s909_s0 + $0x98] sm:$0xff]  ;;  %v45_v19 = vpack.c.bf16 %v23_v16, %v22_v15  ;;  %v24_v21 = vld [vmem:[%s909_s0 + $0x30] sm:$0xff]  ;;  %v38_v23 = vld [vmem:[%s909_s0 + $0xa0] sm:$0xff] }
   0x6   :  { %546 = vmatmul.mubr.msk.bf16.vlgmr.msra.gmra.mrb[0].mxu0 %vm63_vm2, %v43_v6  ;;  %574 = vmatmul.mubr.msk.bf16.vlgmr.msra.gmra.mrb[0].mxu1 %vm63_vm2, %v50_v8  ;;  %v52_v20 = vpack.c.bf16 %v37_v18, %v36_v17  ;;  %v25_v22 = vld [vmem:[%s909_s0 + $0x38] sm:$0xff]  ;;  %v39_v24 = vld [vmem:[%s909_s0 + $0xa8] sm:$0xff]  ;;  %v26_v27 = vld [vmem:[%s909_s0 + $0x40] sm:$0xff] }
   0x7   :  { %549 = vmatprep.mubr.msk.bf16.mxu0 %vm603_vm1, %v602_v0  ;;  %577 = vmatprep.mubr.msk.bf16.mxu1 %vm603_vm1, %v602_v0  ;;  %v46_v25 = vpack.c.bf16 %v25_v22, %v24_v21  ;;  %v53_v26 = vpack.c.bf16 %v39_v24, %v38_v23  ;;  %v27_v28 = vld [vmem:[%s909_s0 + $0x48] sm:$0xff]  ;;  %v40_v29 = vld [vmem:[%s909_s0 + $0xb0] sm:$0xff]  ;;  %v41_v30 = vld [vmem:[%s909_s0 + $0xb8] sm:$0xff] }
   0x8   :  { %v47_v31 = vpack.c.bf16 %v27_v28, %v26_v27  ;;  %v54_v32 = vpack.c.bf16 %v41_v30, %v40_v29  ;;  %v28_v33 = vld [vmem:[%s909_s0 + $0x50] sm:$0xff]  ;;  %v29_v34 = vld [vmem:[%s909_s0 + $0x58] sm:$0xff]  ;;  %v42_v35 = vld [vmem:[%s909_s0 + $0xc0] sm:$0xff] }
   0x9   :  { %v48_v36 = vpack.c.bf16 %v29_v34, %v28_v33  ;;  %v55_v37 = vpack.c.bf16 %v42_v35, %v42_v35  ;;  %v30_v38 = vld [vmem:[%s909_s0 + $0x60] sm:$0xff]  ;;  %v31_v39 = vld [vmem:[%s909_s0 + $0x68] sm:$0xff] }
   0xa   :  { %v49_v40 = vpack.c.bf16 %v31_v39, %v30_v38  ;;  %v751_v41 = vld [vmem:[%s910_s2] ss:$0 sm:$0xff] }
   0xb   :  { %v756_v43 = vld [vmem:[%s911_s3] ss:$0 sm:$0xff] }
   0xe   :  { %550 = vmatmul.mubr.msk.bf16.gmra.mrb[4].mxu0 %vm63_vm2, %v44_v13  ;;  %578 = vmatmul.mubr.msk.bf16.gmra.mrb[4].mxu1 %vm63_vm2, %v51_v14 }
   0xf   :  { %553 = vmatprep.mubr.msk.bf16.mxu0 %vm603_vm1, %v602_v0  ;;  %581 = vmatprep.mubr.msk.bf16.mxu1 %vm603_vm1, %v602_v0 }
  0x16   :  { %554 = vmatmul.mubr.msk.bf16.gmra.mrb[8].mxu0 %vm63_vm2, %v45_v19  ;;  %582 = vmatmul.mubr.msk.bf16.gmra.mrb[8].mxu1 %vm63_vm2, %v52_v20 }
  0x17   :  { %557 = vmatprep.mubr.msk.bf16.mxu0 %vm603_vm1, %v602_v0  ;;  %585 = vmatprep.mubr.msk.bf16.mxu1 %vm603_vm1, %v602_v0 }
  0x1e   :  { %558 = vmatmul.mubr.msk.bf16.gmra.mrb[12].mxu0 %vm63_vm2, %v46_v25  ;;  %586 = vmatmul.mubr.msk.bf16.gmra.mrb[12].mxu1 %vm63_vm2, %v53_v26 }
  0x1f   :  { %561 = vmatprep.mubr.msk.bf16.mxu0 %vm603_vm1, %v602_v0  ;;  %589 = vmatprep.mubr.msk.bf16.mxu1 %vm603_vm1, %v602_v0 }
  0x26   :  { %562 = vmatmul.mubr.msk.bf16.gmra.mrb[16].mxu0 %vm63_vm2, %v47_v31  ;;  %590 = vmatmul.mubr.msk.bf16.gmra.mrb[16].mxu1 %vm63_vm2, %v54_v32 }
  0x27   :  { %565 = vmatprep.mubr.msk.bf16.mxu0 %vm603_vm1, %v602_v0  ;;  %593 = vmatprep.mubr.msk.bf16.mxu1 %vm603_vm1, %v602_v0 }
  0x2e   :  { %566 = vmatmul.mubr.msk.bf16.gmra.mrb[20].mxu0 %vm63_vm2, %v48_v36  ;;  %594 = vmatmul.mubr.msk.bf16.gmra.mrb[20].mxu1 %vm63_vm2, %v55_v37 }
  0x2f   :  { %569 = vmatprep.mubr.msk.bf16.mxu0 %vm603_vm1, %v602_v0 }
  0x36   :  { %570 = vmatmul.mubr.msk.bf16.gmra.mrb[24].mxu0 %vm63_vm2, %v49_v40 }
  0xd9   :  { %v141_v42 = vpop.f32.mrb[0].mxu0  ;;  %v197_v44 = vpop.f32.mrb[0].mxu1 }
  0xda   :  { %v250_v45 = vmul.f32 %v751_v41, %v141_v42  ;;  %v547_v46 = vpop.f32.mrb[1].mxu0  ;;  %v264_v47 = vmul.f32 %v751_v41, %v197_v44  ;;  %v575_v48 = vpop.f32.mrb[1].mxu1 }
  0xdb   :  { %v144_v49 = vpop.f32.mrb[2].mxu0  ;;  %v200_v50 = vpop.f32.mrb[2].mxu1 }
  0xdc   :  { %v282_v51 = vadd.f32 %v756_v43, %v250_v45  ;;  %v251_v52 = vmul.f32 %v751_v41, %v144_v49  ;;  %v548_v53 = vpop.f32.mrb[3].mxu0  ;;  %v296_v54 = vadd.f32 %v756_v43, %v264_v47  ;;  %v265_v55 = vmul.f32 %v751_v41, %v200_v50  ;;  %v576_v56 = vpop.f32.mrb[3].mxu1 }
  0xde   :  { %v307_v57 = vmax.f32 %v282_v51, 0.0  ;;  %v283_v58 = vadd.f32 %v756_v43, %v251_v52  ;;  %v321_v59 = vmax.f32 %v296_v54, 0.0  ;;  %v297_v60 = vadd.f32 %v756_v43, %v265_v55 }
  0xe0   :  { %v504_v61 = vpack.c.bf16 %v307_v57, %v307_v57  ;;  %v308_v62 = vmax.f32 %v283_v58, 0.0  ;;  %v518_v63 = vpack.c.bf16 %v321_v59, %v321_v59  ;;  %v322_v0 = vmax.f32 %v297_v60, 0.0 }
  0xe1   :  { %v149_v1 = vpop.f32.mrb[4].mxu0  ;;  %v205_v2 = vpop.f32.mrb[4].mxu1 }
  0xe2   :  { %434 = vst.msk [vmem:[%s912_s4] sm:$0xf] %vm433_vm3, %v504_v61  ;;  %v505_v3 = vpack.c.bf16 %v308_v62, %v308_v62  ;;  %448 = vst.msk [vmem:[%s912_s4 + $0x38] sm:$0xf] %vm433_vm3, %v518_v63  ;;  %v252_v4 = vmul.f32 %v751_v41, %v149_v1  ;;  %v551_v5 = vpop.f32.mrb[5].mxu0  ;;  %v519_v6 = vpack.c.bf16 %v322_v0, %v322_v0  ;;  %v579_v8 = vpop.f32.mrb[5].mxu1 }
  0xe3   :  { %v266_v7 = vmul.f32 %v751_v41, %v205_v2  ;;  %v152_v9 = vpop.f32.mrb[6].mxu0  ;;  %v208_v10 = vpop.f32.mrb[6].mxu1 }
  0xe4   :  { %435 = vst.msk [vmem:[%s912_s4 + $0x4] sm:$0xf] %vm433_vm3, %v505_v3  ;;  %v284_v11 = vadd.f32 %v756_v43, %v252_v4  ;;  %449 = vst.msk [vmem:[%s912_s4 + $0x3c] sm:$0xf] %vm433_vm3, %v519_v6  ;;  %v253_v12 = vmul.f32 %v751_v41, %v152_v9  ;;  %v552_v13 = vpop.f32.mrb[7].mxu0  ;;  %v267_v15 = vmul.f32 %v751_v41, %v208_v10  ;;  %v580_v16 = vpop.f32.mrb[7].mxu1 }
  0xe5   :  { %v298_v14 = vadd.f32 %v756_v43, %v266_v7 }
  0xe6   :  { %v309_v17 = vmax.f32 %v284_v11, 0.0  ;;  %v285_v18 = vadd.f32 %v756_v43, %v253_v12  ;;  %v299_v20 = vadd.f32 %v756_v43, %v267_v15 }
  0xe7   :  { %v323_v19 = vmax.f32 %v298_v14, 0.0 }
  0xe8   :  { %v506_v21 = vpack.c.bf16 %v309_v17, %v309_v17  ;;  %v310_v22 = vmax.f32 %v285_v18, 0.0  ;;  %v324_v24 = vmax.f32 %v299_v20, 0.0 }
  0xe9   :  { %v520_v23 = vpack.c.bf16 %v323_v19, %v323_v19  ;;  %v157_v25 = vpop.f32.mrb[8].mxu0  ;;  %v213_v26 = vpop.f32.mrb[8].mxu1 }
  0xea   :  { %436 = vst.msk [vmem:[%s912_s4 + $0x8] sm:$0xf] %vm433_vm3, %v506_v21  ;;  %v507_v27 = vpack.c.bf16 %v310_v22, %v310_v22  ;;  %v254_v28 = vmul.f32 %v751_v41, %v157_v25  ;;  %v555_v29 = vpop.f32.mrb[9].mxu0  ;;  %v521_v30 = vpack.c.bf16 %v324_v24, %v324_v24  ;;  %v268_v31 = vmul.f32 %v751_v41, %v213_v26  ;;  %v583_v32 = vpop.f32.mrb[9].mxu1 }
  0xeb   :  { %450 = vst.msk [vmem:[%s912_s4 + $0x40] sm:$0xf] %vm433_vm3, %v520_v23  ;;  %v160_v33 = vpop.f32.mrb[10].mxu0  ;;  %v216_v34 = vpop.f32.mrb[10].mxu1 }
  0xec   :  { %437 = vst.msk [vmem:[%s912_s4 + $0xc] sm:$0xf] %vm433_vm3, %v507_v27  ;;  %v286_v35 = vadd.f32 %v756_v43, %v254_v28  ;;  %451 = vst.msk [vmem:[%s912_s4 + $0x44] sm:$0xf] %vm433_vm3, %v521_v30  ;;  %v255_v36 = vmul.f32 %v751_v41, %v160_v33  ;;  %v556_v37 = vpop.f32.mrb[11].mxu0  ;;  %v300_v38 = vadd.f32 %v756_v43, %v268_v31  ;;  %v584_v40 = vpop.f32.mrb[11].mxu1 }
  0xed   :  { %v269_v39 = vmul.f32 %v751_v41, %v216_v34 }
  0xee   :  { %v311_v42 = vmax.f32 %v286_v35, 0.0  ;;  %v287_v44 = vadd.f32 %v756_v43, %v255_v36  ;;  %v325_v45 = vmax.f32 %v300_v38, 0.0 }
  0xef   :  { %v301_v46 = vadd.f32 %v756_v43, %v269_v39 }
  0xf0   :  { %v508_v47 = vpack.c.bf16 %v311_v42, %v311_v42  ;;  %v312_v48 = vmax.f32 %v287_v44, 0.0  ;;  %v522_v49 = vpack.c.bf16 %v325_v45, %v325_v45 }
  0xf1   :  { %v326_v50 = vmax.f32 %v301_v46, 0.0  ;;  %v165_v51 = vpop.f32.mrb[12].mxu0  ;;  %v221_v52 = vpop.f32.mrb[12].mxu1 }
  0xf2   :  { %438 = vst.msk [vmem:[%s912_s4 + $0x10] sm:$0xf] %vm433_vm3, %v508_v47  ;;  %v509_v53 = vpack.c.bf16 %v312_v48, %v312_v48  ;;  %452 = vst.msk [vmem:[%s912_s4 + $0x48] sm:$0xf] %vm433_vm3, %v522_v49  ;;  %v256_v54 = vmul.f32 %v751_v41, %v165_v51  ;;  %v559_v55 = vpop.f32.mrb[13].mxu0  ;;  %v270_v57 = vmul.f32 %v751_v41, %v221_v52  ;;  %v587_v58 = vpop.f32.mrb[13].mxu1 }
  0xf3   :  { %v523_v56 = vpack.c.bf16 %v326_v50, %v326_v50  ;;  %v168_v59 = vpop.f32.mrb[14].mxu0  ;;  %v224_v60 = vpop.f32.mrb[14].mxu1 }
  0xf4   :  { %439 = vst.msk [vmem:[%s912_s4 + $0x14] sm:$0xf] %vm433_vm3, %v509_v53  ;;  %v288_v61 = vadd.f32 %v756_v43, %v256_v54  ;;  %v257_v62 = vmul.f32 %v751_v41, %v168_v59  ;;  %v560_v63 = vpop.f32.mrb[15].mxu0  ;;  %v302_v0 = vadd.f32 %v756_v43, %v270_v57  ;;  %v271_v1 = vmul.f32 %v751_v41, %v224_v60  ;;  %v588_v2 = vpop.f32.mrb[15].mxu1 }
  0xf5   :  { %453 = vst.msk [vmem:[%s912_s4 + $0x4c] sm:$0xf] %vm433_vm3, %v523_v56 }
  0xf6   :  { %v313_v3 = vmax.f32 %v288_v61, 0.0  ;;  %v289_v4 = vadd.f32 %v756_v43, %v257_v62  ;;  %v327_v5 = vmax.f32 %v302_v0, 0.0  ;;  %v303_v6 = vadd.f32 %v756_v43, %v271_v1 }
  0xf8   :  { %v510_v7 = vpack.c.bf16 %v313_v3, %v313_v3  ;;  %v314_v8 = vmax.f32 %v289_v4, 0.0  ;;  %v524_v9 = vpack.c.bf16 %v327_v5, %v327_v5  ;;  %v328_v10 = vmax.f32 %v303_v6, 0.0 }
  0xf9   :  { %v173_v11 = vpop.f32.mrb[16].mxu0  ;;  %v229_v12 = vpop.f32.mrb[16].mxu1 }
  0xfa   :  { %440 = vst.msk [vmem:[%s912_s4 + $0x18] sm:$0xf] %vm433_vm3, %v510_v7  ;;  %v511_v13 = vpack.c.bf16 %v314_v8, %v314_v8  ;;  %454 = vst.msk [vmem:[%s912_s4 + $0x50] sm:$0xf] %vm433_vm3, %v524_v9  ;;  %v258_v14 = vmul.f32 %v751_v41, %v173_v11  ;;  %v563_v15 = vpop.f32.mrb[17].mxu0  ;;  %v525_v16 = vpack.c.bf16 %v328_v10, %v328_v10  ;;  %v591_v18 = vpop.f32.mrb[17].mxu1 }
  0xfb   :  { %v272_v17 = vmul.f32 %v751_v41, %v229_v12  ;;  %v176_v19 = vpop.f32.mrb[18].mxu0  ;;  %v232_v20 = vpop.f32.mrb[18].mxu1 }
  0xfc   :  { %441 = vst.msk [vmem:[%s912_s4 + $0x1c] sm:$0xf] %vm433_vm3, %v511_v13  ;;  %v290_v21 = vadd.f32 %v756_v43, %v258_v14  ;;  %455 = vst.msk [vmem:[%s912_s4 + $0x54] sm:$0xf] %vm433_vm3, %v525_v16  ;;  %v259_v22 = vmul.f32 %v751_v41, %v176_v19  ;;  %v564_v23 = vpop.f32.mrb[19].mxu0  ;;  %v273_v25 = vmul.f32 %v751_v41, %v232_v20  ;;  %v592_v26 = vpop.f32.mrb[19].mxu1 }
  0xfd   :  { %v304_v24 = vadd.f32 %v756_v43, %v272_v17 }
  0xfe   :  { %v315_v27 = vmax.f32 %v290_v21, 0.0  ;;  %v291_v28 = vadd.f32 %v756_v43, %v259_v22  ;;  %v305_v30 = vadd.f32 %v756_v43, %v273_v25 }
  0xff   :  { %v329_v29 = vmax.f32 %v304_v24, 0.0 }
 0x100   :  { %v512_v31 = vpack.c.bf16 %v315_v27, %v315_v27  ;;  %v316_v32 = vmax.f32 %v291_v28, 0.0  ;;  %v330_v34 = vmax.f32 %v305_v30, 0.0 }
 0x101   :  { %v526_v33 = vpack.c.bf16 %v329_v29, %v329_v29  ;;  %v181_v35 = vpop.f32.mrb[20].mxu0  ;;  %v237_v36 = vpop.f32.mrb[20].mxu1 }
 0x102   :  { %442 = vst.msk [vmem:[%s912_s4 + $0x20] sm:$0xf] %vm433_vm3, %v512_v31  ;;  %v513_v37 = vpack.c.bf16 %v316_v32, %v316_v32  ;;  %v260_v38 = vmul.f32 %v751_v41, %v181_v35  ;;  %v567_v39 = vpop.f32.mrb[21].mxu0  ;;  %v527_v40 = vpack.c.bf16 %v330_v34, %v330_v34  ;;  %v274_v42 = vmul.f32 %v751_v41, %v237_v36  ;;  %v595_v44 = vpop.f32.mrb[21].mxu1 }
 0x103   :  { %456 = vst.msk [vmem:[%s912_s4 + $0x58] sm:$0xf] %vm433_vm3, %v526_v33  ;;  %v184_v45 = vpop.f32.mrb[22].mxu0  ;;  %v240_v46 = vpop.f32.mrb[22].mxu1 }
 0x104   :  { %443 = vst.msk [vmem:[%s912_s4 + $0x24] sm:$0xf] %vm433_vm3, %v513_v37  ;;  %v292_v47 = vadd.f32 %v756_v43, %v260_v38  ;;  %457 = vst.msk [vmem:[%s912_s4 + $0x5c] sm:$0xf] %vm433_vm3, %v527_v40  ;;  %v261_v48 = vmul.f32 %v751_v41, %v184_v45  ;;  %v568_v49 = vpop.f32.mrb[23].mxu0  ;;  %v306_v50 = vadd.f32 %v756_v43, %v274_v42  ;;  %v596_v51 = vpop.f32.mrb[23].mxu1 }
 0x106   :  { %v317_v52 = vmax.f32 %v292_v47, 0.0  ;;  %v293_v53 = vadd.f32 %v756_v43, %v261_v48  ;;  %v331_v54 = vmax.f32 %v306_v50, 0.0 }
 0x108   :  { %v514_v55 = vpack.c.bf16 %v317_v52, %v317_v52  ;;  %v318_v56 = vmax.f32 %v293_v53, 0.0  ;;  %v528_v57 = vpack.c.bf16 %v331_v54, %v331_v54 }
 0x109   :  { %v189_v58 = vpop.f32.mrb[24].mxu0 }
 0x10a   :  { %444 = vst.msk [vmem:[%s912_s4 + $0x28] sm:$0xf] %vm433_vm3, %v514_v55  ;;  %v515_v59 = vpack.c.bf16 %v318_v56, %v318_v56  ;;  %458 = vst.msk [vmem:[%s912_s4 + $0x60] sm:$0xf] %vm433_vm3, %v528_v57  ;;  %v262_v60 = vmul.f32 %v751_v41, %v189_v58  ;;  %v571_v61 = vpop.f32.mrb[25].mxu0 }
 0x10b   :  { %v192_v62 = vpop.f32.mrb[26].mxu0 }
 0x10c   :  { %445 = vst.msk [vmem:[%s912_s4 + $0x2c] sm:$0xf] %vm433_vm3, %v515_v59  ;;  %v294_v63 = vadd.f32 %v756_v43, %v262_v60  ;;  %v263_v0 = vmul.f32 %v751_v41, %v192_v62  ;;  %v572_v1 = vpop.f32.mrb[27].mxu0 }
 0x10e   :  { %v319_v2 = vmax.f32 %v294_v63, 0.0  ;;  %v295_v3 = vadd.f32 %v756_v43, %v263_v0 }
 0x110   :  { %v516_v4 = vpack.c.bf16 %v319_v2, %v319_v2  ;;  %v320_v5 = vmax.f32 %v295_v3, 0.0 }
 0x112   :  { %446 = vst.msk [vmem:[%s912_s4 + $0x30] sm:$0xf] %vm433_vm3, %v516_v4  ;;  %v517_v6 = vpack.c.bf16 %v320_v5, %v320_v5 }
 0x114   :  { %447 = vst.msk [vmem:[%s912_s4 + $0x34] sm:$0xf] %vm433_vm3, %v517_v6 }

// kernel: hsimsi_forward.11
= control target key start
LH: loop header
LB: loop body
LE: loop exit
PB: predicated region body
PF: predicated region fallthrough
CT: control target
= control target key end

     0   :  { %s1170_s18 = smov 0   ;;  %s1605_s0 = inlined_call_operand.vmem [shape: bf16[2,10,10,64], index: 0, kind: input, shape index: {}]   ;;  %s1606_s1 = inlined_call_operand.vmem [shape: f32[9,64], index: 1, kind: input, shape index: {}]   ;;  %s1607_s2 = inlined_call_operand.vmem [shape: bf16[64,64], index: 2, kind: input, shape index: {}]   ;;  %s1608_s3 = inlined_call_operand.vmem [shape: f32[1,64], index: 3, kind: input, shape index: {}]   ;;  %s1609_s4 = inlined_call_operand.vmem [shape: f32[1,64], index: 4, kind: input, shape index: {}]   ;;  %s1610_s5 = inlined_call_operand.vmem [shape: bf16[2,64,64], index: 5, kind: output, shape index: {}]  }
   0x1 LB: > { %s1041_s19 = sadd.s32 4294967295, %s1138_s18   ;;  %p1045_p0 = scmp.ge.s32.totalorder %s1138_s18, 1  ;;  %s1138_s18 = sphi %s1170_s18, %s15_s18  }
   0x2   : > { %p187_p1 = scmp.lt.s32.totalorder %s1138_s18, 3 }
   0x4   : > { %p188_p2 = pnand %p1045_p0, %p187_p1 }
   0x5   : > { %v1128_v0 = vld [vmem:[%s1607_s2] sm:$0xff] (!%p188_p2)   ;;  %p215_p3 = scmp.lt.s32.totalorder (!%p188_p2), %s1041_s19, 1  ;;  %v1129_v1 = vld [vmem:[%s1607_s2 + $0x8] sm:$0xff] (!%p188_p2)   ;;  %v1130_v2 = vld [vmem:[%s1607_s2 + $0x10] sm:$0xff] (!%p188_p2)   ;;  %vm324_vm0 = vcmask (!%p188_p2), 1046528   ;;  %vm402_vm1 = vcmask (!%p188_p2), 1045504  }
   0x6   : > { %191 = sbr.rel (%p188_p2) target bundleno = 335 (0x14f), region = 40  ;;  %1095 = vmatprep.subr.bf16.mxu0 (!%p188_p2), %v1128_v0  ;;  %1111 = vmatprep.subr.bf16.mxu1 (!%p188_p2), %v1128_v0  ;;  %v1131_v3 = vld [vmem:[%s1607_s2 + $0x18] sm:$0xff] (!%p188_p2)   ;;  %v1201_v4 = vld [vmem:[%s1606_s1] ss:$0 sm:$0xff] (!%p188_p2)  ;;  %v1206_v5 = vld [vmem:[%s1606_s1 + $0x1] ss:$0 sm:$0xff] (!%p188_p2) }
   0x7   : > { %1096 = vmatpush3.bf16.msra.mxu0 (!%p188_p2), %v1128_v0  ;;  %1115 = vmatpush3.bf16.msra.mxu1 (!%p188_p2), %v1128_v0  ;;  %v1211_v6 = vld [vmem:[%s1606_s1 + $0x2] ss:$0 sm:$0xff] (!%p188_p2)  ;;  %v1240_v29 = vld [vmem:[%s1606_s1 + $0x3] ss:$0 sm:$0xff] (!%p188_p2)  ;;  %v1251_v39 = vld [vmem:[%s1606_s1 + $0x4] ss:$0 sm:$0xff] (!%p188_p2) }
   0x8   : > { %1097 = vmatprep.subr.bf16.mxu0 (!%p188_p2), %v1129_v1  ;;  %1112 = vmatprep.subr.bf16.mxu1 (!%p188_p2), %v1129_v1  ;;  %v1261_v48 = vld [vmem:[%s1606_s1 + $0x5] ss:$0 sm:$0xff] (!%p188_p2)  ;;  %vm829_vm2 = vcmask (!%p188_p2), 523264   ;;  %vm977_vm3 = vcmask (!%p188_p2), 519168  }
   0xb   : > { %1098 = vmatpush3.bf16.msra.mxu0 (!%p188_p2), %v1129_v1  ;;  %1116 = vmatpush3.bf16.msra.mxu1 (!%p188_p2), %v1129_v1  ;;  %v1276_v1 = vld [vmem:[%s1606_s1 + $0x6] ss:$0 sm:$0xff] (!%p188_p2) }
   0xc   : > { %1099 = vmatprep.subr.bf16.mxu0 (!%p188_p2), %v1130_v2  ;;  %1113 = vmatprep.subr.bf16.mxu1 (!%p188_p2), %v1130_v2 }
   0xd   : > { %s1612_s19 = smov (!%p215_p3, %s1041_s19), 1 }
   0xe   : > { %s1119_s26 = smul.u32 80, %s1612_s19 }
   0xf   : > { %1100 = vmatpush3.bf16.msra.mxu0 %v1130_v2  ;;  %1117 = vmatpush3.bf16.msra.mxu1 %v1130_v2 }
  0x10   : > { %s1196_s6 = scalar_lea.vmem %s1605_s0, %s1119_s26  ;;  %1101 = vmatprep.subr.bf16.mxu0 %v1131_v3  ;;  %1114 = vmatprep.subr.bf16.mxu1 %v1131_v3 }
  0x11   : > { %v226_v7 = vld [vmem:[%s1196_s6] ss:$8 sps:$4 sm:$0xff]   ;;  %v227_v8 = vld [vmem:[%s1196_s6 + $0x4] sm:$0x1]  ;;  %v229_v9 = vld [vmem:[%s1196_s6 + $0xc] sm:$0x1] }
  0x12   : > { %v230_v10 = vld [vmem:[%s1196_s6 + $0x10] ss:$8 sps:$4 sm:$0xff]   ;;  %v231_v11 = vld [vmem:[%s1196_s6 + $0x14] sm:$0x1]  ;;  %v233_v12 = vld [vmem:[%s1196_s6 + $0x1c] sm:$0x1]  ;;  %v246_v13 = vunpack.c.l.bf16 %v226_v7  ;;  %v247_v14 = vunpack.c.l.bf16 %v227_v8  ;;  %v248_v15 = vunpack.c.h.bf16 %v226_v7  ;;  %v249_v16 = vunpack.c.l.bf16 %v229_v9 }
  0x13   : > { %v1219_v17 = vunpack.c.l.bf16 %v230_v10  ;;  %v1221_v18 = vunpack.c.l.bf16 %v231_v11  ;;  %v1223_v19 = vunpack.c.h.bf16 %v230_v10  ;;  %v1225_v20 = vunpack.c.l.bf16 %v233_v12  ;;  %v1228_v21 = vld [vmem:[%s1196_s6 + $0x20] ss:$8 sps:$4 sm:$0xff]   ;;  %1102 = vmatpush3.bf16.msra.mxu0 %v1131_v3  ;;  %1118 = vmatpush3.bf16.msra.mxu1 %v1131_v3  ;;  %v1286_v9 = vld [vmem:[%s1606_s1 + $0x7] ss:$0 sm:$0xff] }
  0x14   : > { %v271_v22 = vmul.f32 %v1201_v4, %v246_v13  ;;  %v272_v23 = vmul.f32 %v1201_v4, %v248_v15  ;;  %v292_v24 = vmul.f32 %v1206_v5, %v246_v13  ;;  %v293_v25 = vmul.f32 %v1206_v5, %v247_v14 }
  0x15   : > { %v294_v26 = vmul.f32 %v1206_v5, %v248_v15  ;;  %v295_v27 = vmul.f32 %v1206_v5, %v249_v16  ;;  %v370_v28 = vmul.f32 %v1211_v6, %v246_v13  ;;  %v1243_v30 = vunpack.c.l.bf16 %v1228_v21 }
  0x16   : > { %v325_v31 = vrot.slane %v292_v24, 1  ;;  %v326_v32 = vrot.slane %v293_v25, 1  ;;  %v371_v33 = vmul.f32 %v1211_v6, %v247_v14  ;;  %v372_v34 = vmul.f32 %v1211_v6, %v248_v15 }
  0x17   : > { %v328_v35 = vrot.slane %v294_v26, 1  ;;  %v329_v36 = vrot.slane %v295_v27, 1  ;;  %v373_v37 = vmul.f32 %v1211_v6, %v249_v16  ;;  %v403_v38 = vrot.slane %v370_v28, 2 }
  0x18   : > { %v327_v40 = vsel %vm324_vm0, %v325_v31, %v326_v32  ;;  %v404_v41 = vrot.slane %v371_v33, 2  ;;  %v406_v42 = vrot.slane %v372_v34, 2  ;;  %v448_v43 = vmul.f32 %v1240_v29, %v248_v15 }
  0x19   : > { %v330_v44 = vsel %vm324_vm0, %v328_v35, %v329_v36  ;;  %v357_v45 = vadd.f32 %v327_v40, %v271_v22  ;;  %v407_v46 = vrot.slane %v373_v37, 2  ;;  %v449_v47 = vmul.f32 %v1240_v29, %v1219_v17 }
  0x1a   : > { %v358_v49 = vadd.f32 %v330_v44, %v272_v23  ;;  %v405_v50 = vsel %vm402_vm1, %v403_v38, %v404_v41  ;;  %v469_v51 = vmul.f32 %v1251_v39, %v248_v15  ;;  %v470_v52 = vmul.f32 %v1251_v39, %v249_v16  ;;  %v1294_v23 = vld [vmem:[%s1606_s1 + $0x8] ss:$0 sm:$0xff] }
  0x1b   : > { %v408_v53 = vsel %vm402_vm1, %v406_v42, %v407_v46  ;;  %v435_v54 = vadd.f32 %v405_v50, %v357_v45  ;;  %v471_v55 = vmul.f32 %v1251_v39, %v1219_v17  ;;  %v472_v56 = vmul.f32 %v1251_v39, %v1221_v18  ;;  %v238_v50 = vld [vmem:[%s1196_s6 + $0x30] ss:$8 sps:$4 sm:$0xff]  }
  0x1c   : > { %v436_v57 = vadd.f32 %v408_v53, %v358_v49  ;;  %v501_v58 = vrot.slane %v469_v51, 1  ;;  %v502_v59 = vrot.slane %v470_v52, 1  ;;  %v546_v60 = vmul.f32 %v1261_v48, %v248_v15  ;;  %v237_v49 = vld [vmem:[%s1196_s6 + $0x2c] sm:$0x1] }
  0x1d   : > { %v456_v61 = vadd.f32 %v448_v43, %v435_v54  ;;  %v504_v62 = vrot.slane %v471_v55, 1  ;;  %v505_v63 = vrot.slane %v472_v56, 1  ;;  %v547_v0 = vmul.f32 %v1261_v48, %v249_v16  ;;  %v235_v43 = vld [vmem:[%s1196_s6 + $0x24] sm:$0x1]  ;;  %v239_v55 = vld [vmem:[%s1196_s6 + $0x34] sm:$0x1] }
  0x1e   : > { %v457_v2 = vadd.f32 %v449_v47, %v436_v57  ;;  %v503_v3 = vsel %vm324_vm0, %v501_v58, %v502_v59  ;;  %v548_v7 = vmul.f32 %v1261_v48, %v1219_v17  ;;  %v549_v8 = vmul.f32 %v1261_v48, %v1221_v18  ;;  %v241_v59 = vld [vmem:[%s1196_s6 + $0x3c] sm:$0x1] }
  0x1f   : > { %v506_v10 = vsel %vm324_vm0, %v504_v62, %v505_v63  ;;  %v533_v11 = vadd.f32 %v503_v3, %v456_v61  ;;  %v578_v12 = vrot.slane %v546_v60, 2  ;;  %v579_v13 = vrot.slane %v547_v0, 2 }
  0x20   : > { %v534_v14 = vadd.f32 %v506_v10, %v457_v2  ;;  %v581_v15 = vrot.slane %v548_v7, 2  ;;  %v582_v16 = vrot.slane %v549_v8, 2  ;;  %v623_v22 = vmul.f32 %v1276_v1, %v1219_v17 }
  0x21   : > { %v580_v24 = vsel %vm402_vm1, %v578_v12, %v579_v13  ;;  %v624_v25 = vmul.f32 %v1276_v1, %v1223_v19  ;;  %v644_v26 = vmul.f32 %v1286_v9, %v1219_v17  ;;  %v645_v27 = vmul.f32 %v1286_v9, %v1221_v18 }
  0x22   : > { %v583_v28 = vsel %vm402_vm1, %v581_v15, %v582_v16  ;;  %v610_v31 = vadd.f32 %v580_v24, %v533_v11  ;;  %v646_v32 = vmul.f32 %v1286_v9, %v1223_v19  ;;  %v647_v33 = vmul.f32 %v1286_v9, %v1225_v20 }
  0x23   : > { %v611_v34 = vadd.f32 %v583_v28, %v534_v14  ;;  %v676_v35 = vrot.slane %v644_v26, 1  ;;  %v677_v36 = vrot.slane %v645_v27, 1  ;;  %v721_v37 = vmul.f32 %v1294_v23, %v1219_v17 }
  0x24   : > { %v631_v38 = vadd.f32 %v623_v22, %v610_v31  ;;  %v679_v40 = vrot.slane %v646_v32, 1  ;;  %v680_v41 = vrot.slane %v647_v33, 1  ;;  %v722_v42 = vmul.f32 %v1294_v23, %v1221_v18 }
  0x25   : > { %v632_v44 = vadd.f32 %v624_v25, %v611_v34  ;;  %v678_v45 = vsel %vm324_vm0, %v676_v35, %v677_v36  ;;  %v723_v46 = vmul.f32 %v1294_v23, %v1223_v19  ;;  %v724_v47 = vmul.f32 %v1294_v23, %v1225_v20 }
  0x26   : > { %v681_v51 = vsel %vm324_vm0, %v679_v40, %v680_v41  ;;  %v708_v52 = vadd.f32 %v678_v45, %v631_v38  ;;  %v753_v53 = vrot.slane %v721_v37, 2  ;;  %v754_v54 = vrot.slane %v722_v42, 2 }
  0x27   : > { %v709_v56 = vadd.f32 %v681_v51, %v632_v44  ;;  %v756_v57 = vrot.slane %v723_v46, 2  ;;  %v757_v58 = vrot.slane %v724_v47, 2  ;;  %v1323_v60 = vunpack.c.l.bf16 %v235_v43 }
  0x28   : > { %v755_v61 = vsel %vm402_vm1, %v753_v53, %v754_v54  ;;  %v1327_v62 = vunpack.c.h.bf16 %v1228_v21  ;;  %v1329_v63 = vunpack.c.l.bf16 %v237_v49  ;;  %v1331_v0 = vunpack.c.l.bf16 %v238_v50 }
  0x29   : > { %v758_v2 = vsel %vm402_vm1, %v756_v57, %v757_v58  ;;  %v785_v3 = vadd.f32 %v755_v61, %v708_v52  ;;  %v1334_v7 = vunpack.c.l.bf16 %v239_v55  ;;  %v1336_v8 = vunpack.c.h.bf16 %v238_v50 }
  0x2a   : > { %v786_v10 = vadd.f32 %v758_v2, %v709_v56  ;;  %v1338_v11 = vunpack.c.l.bf16 %v241_v59  ;;  %v275_v12 = vmul.f32 %v1201_v4, %v1243_v30  ;;  %v276_v21 = vmul.f32 %v1201_v4, %v1327_v62 }
  0x2b   : > { %v300_v13 = vmul.f32 %v1206_v5, %v1243_v30  ;;  %v301_v14 = vmul.f32 %v1206_v5, %v1323_v60  ;;  %v302_v15 = vmul.f32 %v1206_v5, %v1327_v62  ;;  %v303_v16 = vmul.f32 %v1206_v5, %v1329_v63 }
  0x2c   : > { %v793_v22 = vpack.c.bf16 %v786_v10, %v785_v3  ;;  %v378_v24 = vmul.f32 %v1211_v6, %v1243_v30  ;;  %v379_v25 = vmul.f32 %v1211_v6, %v1323_v60  ;;  %v380_v26 = vmul.f32 %v1211_v6, %v1327_v62 }
  0x2d   : > { %v337_v27 = vrot.slane %v300_v13, 1  ;;  %v338_v28 = vrot.slane %v301_v14, 1  ;;  %v340_v31 = vrot.slane %v302_v15, 1  ;;  %v341_v32 = vrot.slane %v303_v16, 1 }
  0x2e   : > { %1103 = vmatprep.mubr.msk.bf16.mxu0 %vm829_vm2, %v793_v22  ;;  %v381_v33 = vmul.f32 %v1211_v6, %v1329_v63  ;;  %v415_v34 = vrot.slane %v378_v24, 2  ;;  %v416_v35 = vrot.slane %v379_v25, 2  ;;  %v418_v36 = vrot.slane %v380_v26, 2 }
  0x2f   : > { %v339_v37 = vsel %vm324_vm0, %v337_v27, %v338_v28  ;;  %v342_v38 = vsel %vm324_vm0, %v340_v31, %v341_v32  ;;  %v452_v40 = vmul.f32 %v1240_v29, %v1327_v62  ;;  %v453_v41 = vmul.f32 %v1240_v29, %v1331_v0 }
  0x30   : > { %v361_v42 = vadd.f32 %v339_v37, %v275_v12  ;;  %v362_v43 = vadd.f32 %v342_v38, %v276_v21  ;;  %v417_v44 = vsel %vm402_vm1, %v415_v34, %v416_v35  ;;  %v419_v45 = vrot.slane %v381_v33, 2 }
  0x31   : > { %v477_v46 = vmul.f32 %v1251_v39, %v1327_v62  ;;  %v478_v47 = vmul.f32 %v1251_v39, %v1329_v63  ;;  %v479_v49 = vmul.f32 %v1251_v39, %v1331_v0  ;;  %v480_v50 = vmul.f32 %v1251_v39, %v1334_v7 }
  0x32   : > { %v420_v51 = vsel %vm402_vm1, %v418_v36, %v419_v45  ;;  %v439_v52 = vadd.f32 %v417_v44, %v361_v42  ;;  %v554_v53 = vmul.f32 %v1261_v48, %v1327_v62  ;;  %v555_v54 = vmul.f32 %v1261_v48, %v1329_v63 }
  0x33   : > { %v440_v55 = vadd.f32 %v420_v51, %v362_v43  ;;  %v513_v56 = vrot.slane %v477_v46, 1  ;;  %v514_v57 = vrot.slane %v478_v47, 1  ;;  %v516_v58 = vrot.slane %v479_v49, 1 }
  0x34   : > { %v460_v59 = vadd.f32 %v452_v40, %v439_v52  ;;  %v517_v61 = vrot.slane %v480_v50, 1  ;;  %v556_v2 = vmul.f32 %v1261_v48, %v1331_v0  ;;  %v557_v3 = vmul.f32 %v1261_v48, %v1334_v7 }
  0x35   : > { %v461_v10 = vadd.f32 %v453_v41, %v440_v55  ;;  %v515_v12 = vsel %vm324_vm0, %v513_v56, %v514_v57  ;;  %v590_v21 = vrot.slane %v554_v53, 2  ;;  %v591_v13 = vrot.slane %v555_v54, 2 }
  0x36   : > { %v518_v14 = vsel %vm324_vm0, %v516_v58, %v517_v61  ;;  %v537_v15 = vadd.f32 %v515_v12, %v460_v59  ;;  %v593_v16 = vrot.slane %v556_v2, 2  ;;  %v594_v22 = vrot.slane %v557_v3, 2 }
  0x37   : > { %v538_v24 = vadd.f32 %v518_v14, %v461_v10  ;;  %v592_v25 = vsel %vm402_vm1, %v590_v21, %v591_v13  ;;  %v627_v26 = vmul.f32 %v1276_v1, %v1331_v0  ;;  %v628_v27 = vmul.f32 %v1276_v1, %v1336_v8 }
  0x38   : > { %v595_v28 = vsel %vm402_vm1, %v593_v16, %v594_v22  ;;  %v614_v31 = vadd.f32 %v592_v25, %v537_v15  ;;  %v652_v32 = vmul.f32 %v1286_v9, %v1331_v0  ;;  %v653_v33 = vmul.f32 %v1286_v9, %v1334_v7 }
  0x39   : > { %v615_v34 = vadd.f32 %v595_v28, %v538_v24  ;;  %v654_v35 = vmul.f32 %v1286_v9, %v1336_v8  ;;  %v655_v36 = vmul.f32 %v1286_v9, %v1338_v11  ;;  %v729_v37 = vmul.f32 %v1294_v23, %v1331_v0 }
  0x3a   : > { %v635_v38 = vadd.f32 %v627_v26, %v614_v31  ;;  %v688_v40 = vrot.slane %v652_v32, 1  ;;  %v689_v41 = vrot.slane %v653_v33, 1  ;;  %v730_v42 = vmul.f32 %v1294_v23, %v1334_v7 }
  0x3b   : > { %v636_v43 = vadd.f32 %v628_v27, %v615_v34  ;;  %v691_v44 = vrot.slane %v654_v35, 1  ;;  %v692_v45 = vrot.slane %v655_v36, 1  ;;  %v731_v46 = vmul.f32 %v1294_v23, %v1336_v8 }
  0x3c   : > { %v690_v47 = vsel %vm324_vm0, %v688_v40, %v689_v41  ;;  %v732_v49 = vmul.f32 %v1294_v23, %v1338_v11  ;;  %v765_v50 = vrot.slane %v729_v37, 2  ;;  %v766_v51 = vrot.slane %v730_v42, 2 }
  0x3d   : > { %v693_v52 = vsel %vm324_vm0, %v691_v44, %v692_v45  ;;  %v712_v53 = vadd.f32 %v690_v47, %v635_v38  ;;  %v768_v54 = vrot.slane %v731_v46, 2  ;;  %v273_v55 = vmul.f32 %v1201_v4, %v1219_v17 }
  0x3e   : > { %v713_v56 = vadd.f32 %v693_v52, %v636_v43  ;;  %v767_v57 = vsel %vm402_vm1, %v765_v50, %v766_v51  ;;  %v769_v58 = vrot.slane %v732_v49, 2  ;;  %v274_v59 = vmul.f32 %v1201_v4, %v1223_v19 }
  0x3f   : > { %v789_v61 = vadd.f32 %v767_v57, %v712_v53  ;;  %v296_v2 = vmul.f32 %v1206_v5, %v1219_v17  ;;  %v297_v3 = vmul.f32 %v1206_v5, %v1221_v18  ;;  %v298_v10 = vmul.f32 %v1206_v5, %v1223_v19 }
  0x40   : > { %v770_v12 = vsel %vm402_vm1, %v768_v54, %v769_v58  ;;  %v299_v21 = vmul.f32 %v1206_v5, %v1225_v20  ;;  %v374_v13 = vmul.f32 %v1211_v6, %v1219_v17  ;;  %v375_v14 = vmul.f32 %v1211_v6, %v1221_v18 }
  0x41   : > { %v790_v15 = vadd.f32 %v770_v12, %v713_v56  ;;  %v331_v16 = vrot.slane %v296_v2, 1  ;;  %v332_v22 = vrot.slane %v297_v3, 1  ;;  %v334_v24 = vrot.slane %v298_v10, 1 }
  0x42   : > { %v335_v25 = vrot.slane %v299_v21, 1  ;;  %v376_v26 = vmul.f32 %v1211_v6, %v1223_v19  ;;  %v377_v27 = vmul.f32 %v1211_v6, %v1225_v20  ;;  %v409_v28 = vrot.slane %v374_v13, 2 }
  0x43   : > { %v795_v31 = vpack.c.bf16 %v790_v15, %v789_v61  ;;  %v333_v32 = vsel %vm324_vm0, %v331_v16, %v332_v22  ;;  %v410_v33 = vrot.slane %v375_v14, 2  ;;  %v450_v17 = vmul.f32 %v1240_v29, %v1223_v19 }
  0x44   : > { %v336_v18 = vsel %vm324_vm0, %v334_v24, %v335_v25  ;;  %v359_v34 = vadd.f32 %v333_v32, %v273_v55  ;;  %v412_v35 = vrot.slane %v376_v26, 2  ;;  %v413_v36 = vrot.slane %v377_v27, 2  ;;  %v242_v32 = vld [vmem:[%s1196_s6 + $0x40] ss:$8 sps:$4 sm:$0xff]  }
  0x45   : > { %1107 = vmatprep.mubr.msk.bf16.mxu1 %vm829_vm2, %v795_v31  ;;  %v360_v37 = vadd.f32 %v336_v18, %v274_v59  ;;  %v411_v38 = vsel %vm402_vm1, %v409_v28, %v410_v33  ;;  %v451_v40 = vmul.f32 %v1240_v29, %v1243_v30  ;;  %v473_v41 = vmul.f32 %v1251_v39, %v1223_v19 }
  0x46   : > { %v414_v42 = vsel %vm402_vm1, %v412_v35, %v413_v36  ;;  %v437_v43 = vadd.f32 %v411_v38, %v359_v34  ;;  %v474_v44 = vmul.f32 %v1251_v39, %v1225_v20  ;;  %v475_v45 = vmul.f32 %v1251_v39, %v1243_v30 }
  0x47   : > { %v438_v46 = vadd.f32 %v414_v42, %v360_v37  ;;  %v476_v47 = vmul.f32 %v1251_v39, %v1323_v60  ;;  %v507_v49 = vrot.slane %v473_v41, 1  ;;  %v550_v50 = vmul.f32 %v1261_v48, %v1223_v19 }
  0x48   : > { %v458_v51 = vadd.f32 %v450_v17, %v437_v43  ;;  %v508_v52 = vrot.slane %v474_v44, 1  ;;  %v510_v53 = vrot.slane %v475_v45, 1  ;;  %v551_v54 = vmul.f32 %v1261_v48, %v1225_v20  ;;  %v1486_v43 = vld [vmem:[%s1196_s6 + $0x4c] sm:$0x1] }
  0x49   : > { %v459_v55 = vadd.f32 %v451_v40, %v438_v46  ;;  %v511_v56 = vrot.slane %v476_v47, 1  ;;  %v552_v57 = vmul.f32 %v1261_v48, %v1243_v30  ;;  %v553_v58 = vmul.f32 %v1261_v48, %v1323_v60  ;;  %v243_v40 = vld [vmem:[%s1196_s6 + $0x44] sm:$0x1]  ;;  %s1078_s6 = sshll.u32 %s1612_s19, 5 }
  0x4a   : > { %v509_v59 = vsel %vm324_vm0, %v507_v49, %v508_v52  ;;  %v584_v61 = vrot.slane %v550_v50, 2  ;;  %v585_v2 = vrot.slane %v551_v54, 2  ;;  %v625_v19 = vmul.f32 %v1276_v1, %v1243_v30  ;;  %s1584_s9 = scalar_lea.vmem %s1610_s5, %s1078_s6 }
  0x4b   : > { %v512_v3 = vsel %vm324_vm0, %v510_v53, %v511_v56  ;;  %v535_v10 = vadd.f32 %v509_v59, %v458_v51  ;;  %v587_v20 = vrot.slane %v552_v57, 2  ;;  %v588_v12 = vrot.slane %v553_v58, 2 }
  0x4c   : > { %v536_v21 = vadd.f32 %v512_v3, %v459_v55  ;;  %v586_v13 = vsel %vm402_vm1, %v584_v61, %v585_v2  ;;  %v626_v14 = vmul.f32 %v1276_v1, %v1327_v62  ;;  %v648_v15 = vmul.f32 %v1286_v9, %v1243_v30 }
  0x4d   : > { %v589_v16 = vsel %vm402_vm1, %v587_v20, %v588_v12  ;;  %v612_v22 = vadd.f32 %v586_v13, %v535_v10  ;;  %v649_v24 = vmul.f32 %v1286_v9, %v1323_v60  ;;  %v650_v25 = vmul.f32 %v1286_v9, %v1327_v62 }
  0x4e   : > { %v613_v26 = vadd.f32 %v589_v16, %v536_v21  ;;  %v651_v27 = vmul.f32 %v1286_v9, %v1329_v63  ;;  %v682_v28 = vrot.slane %v648_v15, 1  ;;  %v725_v31 = vmul.f32 %v1294_v23, %v1243_v30 }
  0x4f   : > { %v633_v33 = vadd.f32 %v625_v19, %v612_v22  ;;  %v683_v17 = vrot.slane %v649_v24, 1  ;;  %v685_v18 = vrot.slane %v650_v25, 1  ;;  %v726_v34 = vmul.f32 %v1294_v23, %v1323_v60 }
  0x50   : > { %v634_v35 = vadd.f32 %v626_v14, %v613_v26  ;;  %v686_v36 = vrot.slane %v651_v27, 1  ;;  %v727_v37 = vmul.f32 %v1294_v23, %v1327_v62  ;;  %v728_v38 = vmul.f32 %v1294_v23, %v1329_v63 }
  0x51   : > { %v684_v41 = vsel %vm324_vm0, %v682_v28, %v683_v17  ;;  %v759_v42 = vrot.slane %v725_v31, 2  ;;  %v760_v30 = vrot.slane %v726_v34, 2  ;;  %v1488_v44 = vunpack.c.l.bf16 %v242_v32 }
  0x52   : > { %v687_v45 = vsel %vm324_vm0, %v685_v18, %v686_v36  ;;  %v710_v60 = vadd.f32 %v684_v41, %v633_v33  ;;  %v762_v46 = vrot.slane %v727_v37, 2  ;;  %v763_v47 = vrot.slane %v728_v38, 2 }
  0x53   : > { %v711_v49 = vadd.f32 %v687_v45, %v634_v35  ;;  %v761_v62 = vsel %vm402_vm1, %v759_v42, %v760_v30  ;;  %v1492_v50 = vunpack.c.l.bf16 %v243_v40  ;;  %v1494_v63 = vunpack.c.h.bf16 %v242_v32 }
  0x54   : > { %v764_v51 = vsel %vm402_vm1, %v762_v46, %v763_v47  ;;  %v787_v52 = vadd.f32 %v761_v62, %v710_v60  ;;  %v265_v53 = vunpack.c.l.bf16 %v1486_v43  ;;  %v277_v54 = vmul.f32 %v1201_v4, %v1331_v0 }
  0x55   : > { %v788_v55 = vadd.f32 %v764_v51, %v711_v49  ;;  %v278_v56 = vmul.f32 %v1201_v4, %v1336_v8  ;;  %v304_v57 = vmul.f32 %v1206_v5, %v1331_v0  ;;  %v305_v58 = vmul.f32 %v1206_v5, %v1334_v7 }
  0x56   : > { %v306_v59 = vmul.f32 %v1206_v5, %v1336_v8  ;;  %v307_v61 = vmul.f32 %v1206_v5, %v1338_v11  ;;  %v382_v2 = vmul.f32 %v1211_v6, %v1331_v0  ;;  %v383_v19 = vmul.f32 %v1211_v6, %v1334_v7 }
  0x57   : > { %v794_v3 = vpack.c.bf16 %v788_v55, %v787_v52  ;;  %v343_v4 = vrot.slane %v304_v57, 1  ;;  %v344_v10 = vrot.slane %v305_v58, 1  ;;  %v384_v20 = vmul.f32 %v1211_v6, %v1336_v8 }
  0x58   : > { %v346_v12 = vrot.slane %v306_v59, 1  ;;  %v347_v21 = vrot.slane %v307_v61, 1  ;;  %v385_v13 = vmul.f32 %v1211_v6, %v1338_v11  ;;  %v421_v14 = vrot.slane %v382_v2, 2 }
  0x59   : > { %1104 = vmatmul.mubr.msk.bf16.vlgmr.msra.gmra.mrb[0].mxu0 %vm829_vm2, %v794_v3  ;;  %v345_v5 = vsel %vm324_vm0, %v343_v4, %v344_v10  ;;  %v422_v0 = vrot.slane %v383_v19, 2  ;;  %v424_v15 = vrot.slane %v384_v20, 2  ;;  %v454_v7 = vmul.f32 %v1240_v29, %v1336_v8 }
  0x5a   : > { %v348_v16 = vsel %vm324_vm0, %v346_v12, %v347_v21  ;;  %v363_v22 = vadd.f32 %v345_v5, %v277_v54  ;;  %v425_v24 = vrot.slane %v385_v13, 2  ;;  %v455_v25 = vmul.f32 %v1240_v29, %v1488_v44 }
  0x5b   : > { %v364_v26 = vadd.f32 %v348_v16, %v278_v56  ;;  %v423_v6 = vsel %vm402_vm1, %v421_v14, %v422_v0  ;;  %v481_v27 = vmul.f32 %v1251_v39, %v1336_v8  ;;  %v482_v28 = vmul.f32 %v1251_v39, %v1338_v11 }
  0x5c   : > { %v426_v31 = vsel %vm402_vm1, %v424_v15, %v425_v24  ;;  %v441_v32 = vadd.f32 %v423_v6, %v363_v22  ;;  %v483_v33 = vmul.f32 %v1251_v39, %v1488_v44  ;;  %v484_v17 = vmul.f32 %v1251_v39, %v1492_v50 }
  0x5d   : > { %v442_v18 = vadd.f32 %v426_v31, %v364_v26  ;;  %v519_v29 = vrot.slane %v481_v27, 1  ;;  %v520_v34 = vrot.slane %v482_v28, 1  ;;  %v558_v35 = vmul.f32 %v1261_v48, %v1336_v8 }
  0x5e   : > { %v462_v36 = vadd.f32 %v454_v7, %v441_v32  ;;  %v522_v37 = vrot.slane %v483_v33, 1  ;;  %v523_v38 = vrot.slane %v484_v17, 1  ;;  %v559_v40 = vmul.f32 %v1261_v48, %v1338_v11 }
  0x5f   : > { %v463_v41 = vadd.f32 %v455_v25, %v442_v18  ;;  %v521_v42 = vsel %vm324_vm0, %v519_v29, %v520_v34  ;;  %v560_v30 = vmul.f32 %v1261_v48, %v1488_v44  ;;  %v561_v39 = vmul.f32 %v1261_v48, %v1492_v50 }
  0x60   : > { %v524_v45 = vsel %vm324_vm0, %v522_v37, %v523_v38  ;;  %v539_v60 = vadd.f32 %v521_v42, %v462_v36  ;;  %v596_v46 = vrot.slane %v558_v35, 2  ;;  %v597_v8 = vrot.slane %v559_v40, 2 }
  0x61   : > { %v540_v47 = vadd.f32 %v524_v45, %v463_v41  ;;  %v599_v49 = vrot.slane %v560_v30, 2  ;;  %v600_v62 = vrot.slane %v561_v39, 2  ;;  %v629_v11 = vmul.f32 %v1276_v1, %v1488_v44 }
  0x62   : > { %v598_v51 = vsel %vm402_vm1, %v596_v46, %v597_v8  ;;  %v630_v52 = vmul.f32 %v1276_v1, %v1494_v63  ;;  %v656_v54 = vmul.f32 %v1286_v9, %v1488_v44  ;;  %v657_v48 = vmul.f32 %v1286_v9, %v1492_v50 }
  0x63   : > { %v601_v55 = vsel %vm402_vm1, %v599_v49, %v600_v62  ;;  %v616_v56 = vadd.f32 %v598_v51, %v539_v60  ;;  %v658_v57 = vmul.f32 %v1286_v9, %v1494_v63  ;;  %v659_v58 = vmul.f32 %v1286_v9, %v265_v53 }
  0x64   : > { %v617_v59 = vadd.f32 %v601_v55, %v540_v47  ;;  %v694_v61 = vrot.slane %v656_v54, 1  ;;  %v695_v2 = vrot.slane %v657_v48, 1  ;;  %v733_v1 = vmul.f32 %v1294_v23, %v1488_v44 }
  0x65   : > { %v637_v19 = vadd.f32 %v629_v11, %v616_v56  ;;  %v697_v3 = vrot.slane %v658_v57, 1  ;;  %v698_v4 = vrot.slane %v659_v58, 1  ;;  %v734_v10 = vmul.f32 %v1294_v23, %v1492_v50 }
  0x66   : > { %v638_v20 = vadd.f32 %v630_v52, %v617_v59  ;;  %v696_v12 = vsel %vm324_vm0, %v694_v61, %v695_v2  ;;  %v735_v21 = vmul.f32 %v1294_v23, %v1494_v63  ;;  %v736_v9 = vmul.f32 %v1294_v23, %v265_v53  ;;  %v1066_v23 = vld [vmem:[%s1608_s3] ss:$0 sm:$0xff] }
  0x67   : > { %v699_v13 = vsel %vm324_vm0, %v697_v3, %v698_v4  ;;  %v714_v14 = vadd.f32 %v696_v12, %v637_v19  ;;  %v771_v44 = vrot.slane %v733_v1, 2  ;;  %v772_v5 = vrot.slane %v734_v10, 2  ;;  %v1067_v53 = vld [vmem:[%s1609_s4] ss:$0 sm:$0xff] }
  0x68   : > { %v715_v0 = vadd.f32 %v699_v13, %v638_v20  ;;  %v774_v15 = vrot.slane %v735_v21, 2  ;;  %v775_v7 = vrot.slane %v736_v9, 2 }
  0x69   : > { %v773_v50 = vsel %vm402_vm1, %v771_v44, %v772_v5 }
  0x6a   : > { %v776_v16 = vsel %vm402_vm1, %v774_v15, %v775_v7  ;;  %v791_v22 = vadd.f32 %v773_v50, %v714_v14 }
  0x6b   : > { %v792_v24 = vadd.f32 %v776_v16, %v715_v0 }
  0x6d   : > { %v796_v63 = vpack.c.bf16 %v792_v24, %v791_v22 }
  0x6f   : > { %1108 = vmatmul.mubr.msk.bf16.vlgmr.msra.gmra.mrb[0].mxu1 %vm829_vm2, %v796_v63 }
 0x12c   : > { %v1105_v43 = vpop.f32.mrb[0].mxu0 }
 0x12d   : > { %v916_v25 = vmul.f32 %v1105_v43, %v1066_v23  ;;  %v876_v26 = vpop.f32.mrb[1].mxu0 }
 0x12e   : > { %v914_v6 = vmul.f32 %v1066_v23, %v876_v26  ;;  %v1106_v27 = vpop.f32.mrb[2].mxu0 }
 0x12f   : > { %v931_v28 = vadd.f32 %v1067_v53, %v916_v25  ;;  %v917_v31 = vmul.f32 %v1106_v27, %v1066_v23  ;;  %v879_v32 = vpop.f32.mrb[3].mxu0 }
 0x130   : > { %v929_v33 = vadd.f32 %v1067_v53, %v914_v6  ;;  %v915_v17 = vmul.f32 %v1066_v23, %v879_v32 }
 0x131   : > { %v939_v18 = vmax.f32 %v931_v28, 0.0  ;;  %v932_v29 = vadd.f32 %v1067_v53, %v917_v31 }
 0x132   : > { %v937_v34 = vmax.f32 %v929_v33, 0.0  ;;  %v930_v35 = vadd.f32 %v1067_v53, %v915_v17 }
 0x133   : > { %v1081_v36 = vpack.c.bf16 %v939_v18, %v939_v18  ;;  %v940_v37 = vmax.f32 %v932_v29, 0.0 }
 0x134   : > { %v1079_v38 = vpack.c.bf16 %v937_v34, %v937_v34  ;;  %v938_v40 = vmax.f32 %v930_v35, 0.0 }
 0x135   : > { %980 = vst.msk [vmem:[%s1584_s9 + $0x8] sm:$0xf] %vm977_vm3, %v1081_v36  ;;  %v1082_v41 = vpack.c.bf16 %v940_v37, %v940_v37 }
 0x136   : > { %978 = vst.msk [vmem:[%s1584_s9] sm:$0xf] %vm977_vm3, %v1079_v38  ;;  %v1080_v42 = vpack.c.bf16 %v938_v40, %v938_v40 }
 0x137   : > { %981 = vst.msk [vmem:[%s1584_s9 + $0xc] sm:$0xf] %vm977_vm3, %v1082_v41 }
 0x138   : > { %979 = vst.msk [vmem:[%s1584_s9 + $0x4] sm:$0xf] %vm977_vm3, %v1080_v42 }
 0x142   : > { %v1109_v30 = vpop.f32.mrb[0].mxu1 }
 0x143   : > { %v920_v39 = vmul.f32 %v1109_v30, %v1066_v23  ;;  %v892_v45 = vpop.f32.mrb[1].mxu1 }
 0x144   : > { %v918_v60 = vmul.f32 %v1066_v23, %v892_v45  ;;  %v1110_v46 = vpop.f32.mrb[2].mxu1 }
 0x145   : > { %v935_v8 = vadd.f32 %v1067_v53, %v920_v39  ;;  %v921_v47 = vmul.f32 %v1110_v46, %v1066_v23  ;;  %v895_v49 = vpop.f32.mrb[3].mxu1 }
 0x146   : > { %v933_v62 = vadd.f32 %v1067_v53, %v918_v60  ;;  %v919_v11 = vmul.f32 %v1066_v23, %v895_v49 }
 0x147   : > { %v943_v51 = vmax.f32 %v935_v8, 0.0  ;;  %v936_v52 = vadd.f32 %v1067_v53, %v921_v47 }
 0x148   : > { %v941_v54 = vmax.f32 %v933_v62, 0.0  ;;  %v934_v48 = vadd.f32 %v1067_v53, %v919_v11 }
 0x149   : > { %v1085_v55 = vpack.c.bf16 %v943_v51, %v943_v51  ;;  %v944_v56 = vmax.f32 %v936_v52, 0.0 }
 0x14a   : > { %v1083_v57 = vpack.c.bf16 %v941_v54, %v941_v54  ;;  %v942_v58 = vmax.f32 %v934_v48, 0.0 }
 0x14b   : > { %984 = vst.msk [vmem:[%s1584_s9 + $0x18] sm:$0xf] %vm977_vm3, %v1085_v55  ;;  %v1086_v59 = vpack.c.bf16 %v944_v56, %v944_v56 }
 0x14c   : > { %982 = vst.msk [vmem:[%s1584_s9 + $0x10] sm:$0xf] %vm977_vm3, %v1083_v57  ;;  %v1084_v61 = vpack.c.bf16 %v942_v58, %v942_v58 }
 0x14d   : > { %985 = vst.msk [vmem:[%s1584_s9 + $0x1c] sm:$0xf] %vm977_vm3, %v1086_v59 }
 0x14e   : > { %983 = vst.msk [vmem:[%s1584_s9 + $0x14] sm:$0xf] %vm977_vm3, %v1084_v61 }
 0x14f PF: > { %s15_s18 = sadd.s32 1, %s1138_s18  }
 0x150   : > { %p12_p4 = scmp.ge.s32.totalorder %s15_s18, 4  }
 0x152   :  { %14 = sbr.rel (!%p12_p4) target bundleno = 1 (0x1), region = 70 }

// kernel: hsimsi_forward.12
= control target key start
LH: loop header
LB: loop body
LE: loop exit
PB: predicated region body
PF: predicated region fallthrough
CT: control target
= control target key end

     0   :  { %vm113_vm0 = vcmask 523264   ;;  %vm299_vm1 = vcmask 60416   ;;  %s568_s20 = smov 120   ;;  %s569_s8 = smov 112   ;;  %vm428_vm2 = vcmask 519168   ;;  %s871_s1 = inlined_call_operand.vmem [shape: bf16[64,80], index: 1, kind: input, shape index: {}]   ;;  %s872_s0 = inlined_call_operand.vmem [shape: bf16[128,64], index: 0, kind: input, shape index: {}]   ;;  %s873_s2 = inlined_call_operand.vmem [shape: f32[1,80], index: 2, kind: input, shape index: {}]   ;;  %s874_s3 = inlined_call_operand.vmem [shape: bf16[128,8], index: 3, kind: output, shape index: {0}]   ;;  %s875_s4 = inlined_call_operand.vmem [shape: bf16[128,8], index: 4, kind: output, shape index: {1}]   ;;  %s876_s5 = inlined_call_operand.vmem [shape: bf16[128,64], index: 5, kind: output, shape index: {2}]  }
   0x1   :  { %v556_v0 = vld [vmem:[%s871_s1] sm:$0xff]   ;;  %v557_v1 = vld [vmem:[%s871_s1 + $0x8] sm:$0xff]   ;;  %v558_v2 = vld [vmem:[%s871_s1 + $0x10] sm:$0xff]  }
   0x2   :  { %522 = vmatprep.subr.bf16.mxu0 %v556_v0  ;;  %546 = vmatprep.subr.bf16.mxu1 %v556_v0  ;;  %v560_v3 = vld [vmem:[%s872_s0] sm:$0xff]   ;;  %v559_v5 = vld [vmem:[%s871_s1 + $0x18] sm:$0xff]   ;;  %v562_v6 = vld [vmem:[%s872_s0 + $0x8] sm:$0xff]  }
   0x3   :  { %523 = vmatpush3.bf16.msra.mxu0 %v556_v0  ;;  %550 = vmatpush3.bf16.msra.mxu1 %v556_v0  ;;  %v561_v4 = vld [vmem:[%s872_s0 + $0x20] sm:$0xff]   ;;  %v563_v7 = vld [vmem:[%s872_s0 + $0x28] sm:$0xff]   ;;  %v564_v8 = vld [vmem:[%s872_s0 + $0x10] sm:$0xff]  }
   0x4   :  { %524 = vmatprep.subr.bf16.mxu0 %v557_v1  ;;  %547 = vmatprep.subr.bf16.mxu1 %v557_v1  ;;  %v566_v9 = vld [vmem:[%s872_s0 + $0x30] sm:$0xff]   ;;  %v565_v10 = vld [vmem:[%s872_s0 + $0x18] sm:$0xff]   ;;  %v457_v12 = vld [vmem:[%s873_s2] ss:$0 sm:$0xff] }
   0x5   :  { %530 = vmatprep.mubr.msk.bf16.mxu0 %vm113_vm0, %v560_v3  ;;  %538 = vmatprep.mubr.msk.bf16.mxu1 %vm113_vm0, %v561_v4  ;;  %v567_v11 = vld [vmem:[%s872_s0 + $0x38] sm:$0xff]  }
   0x7   :  { %525 = vmatpush3.bf16.msra.mxu0 %v557_v1  ;;  %551 = vmatpush3.bf16.msra.mxu1 %v557_v1 }
   0x8   :  { %526 = vmatprep.subr.bf16.mxu0 %v558_v2  ;;  %548 = vmatprep.subr.bf16.mxu1 %v558_v2 }
   0xb   :  { %527 = vmatpush3.bf16.msra.mxu0 %v558_v2  ;;  %552 = vmatpush3.bf16.msra.mxu1 %v558_v2 }
   0xc   :  { %528 = vmatprep.subr.bf16.mxu0 %v559_v5  ;;  %549 = vmatprep.subr.bf16.mxu1 %v559_v5 }
   0xf   :  { %529 = vmatpush3.bf16.msra.mxu0 %v559_v5  ;;  %553 = vmatpush3.bf16.msra.mxu1 %v559_v5 }
  0x12   :  { %531 = vmatmul.mubr.msk.bf16.vlgmr.msra.gmra.mrb[0].mxu0 %vm113_vm0, %v562_v6  ;;  %539 = vmatmul.mubr.msk.bf16.vlgmr.msra.gmra.mrb[0].mxu1 %vm113_vm0, %v563_v7 }
  0x13   :  { %534 = vmatprep.mubr.msk.bf16.mxu0 %vm113_vm0, %v564_v8  ;;  %542 = vmatprep.mubr.msk.bf16.mxu1 %vm113_vm0, %v566_v9 }
  0x1a   :  { %535 = vmatmul.mubr.msk.bf16.gmra.mrb[4].mxu0 %vm113_vm0, %v565_v10  ;;  %543 = vmatmul.mubr.msk.bf16.gmra.mrb[4].mxu1 %vm113_vm0, %v567_v11 }
  0xe5   :  { %v532_v13 = vpop.f32.mrb[0].mxu0  ;;  %v540_v14 = vpop.f32.mrb[0].mxu1 }
  0xe6   :  { %v181_v15 = vadd.f32 %v532_v13, %v457_v12  ;;  %v213_v16 = vadd.f32 %v540_v14, %v457_v12  ;;  %v172_v17 = vpop.f32.mrb[1].mxu0  ;;  %v204_v18 = vpop.f32.mrb[1].mxu1 }
  0xe7   :  { %v173_v19 = vadd.f32 %v457_v12, %v172_v17  ;;  %v205_v20 = vadd.f32 %v457_v12, %v204_v18  ;;  %v533_v21 = vpop.f32.mrb[2].mxu0  ;;  %v541_v22 = vpop.f32.mrb[2].mxu1 }
  0xe8   :  { %v496_v23 = vpack.c.bf16 %v181_v15, %v181_v15  ;;  %v504_v24 = vpack.c.bf16 %v213_v16, %v213_v16  ;;  %v184_v25 = vadd.f32 %v533_v21, %v457_v12  ;;  %v216_v26 = vadd.f32 %v541_v22, %v457_v12  ;;  %v175_v27 = vpop.f32.mrb[3].mxu0  ;;  %v207_v28 = vpop.f32.mrb[3].mxu1 }
  0xe9   :  { %v494_v29 = vpack.c.bf16 %v173_v19, %v173_v19  ;;  %v502_v30 = vpack.c.bf16 %v205_v20, %v205_v20  ;;  %v176_v31 = vadd.f32 %v457_v12, %v175_v27  ;;  %v208_v32 = vadd.f32 %v457_v12, %v207_v28 }
  0xea   :  { %302 = vst.msk [vmem:[%s874_s3 + $0x8] sm:$0xf] %vm299_vm1, %v496_v23  ;;  %310 = vst.msk [vmem:[%s874_s3 + $0x28] sm:$0xf] %vm299_vm1, %v504_v24  ;;  %v497_v33 = vpack.c.bf16 %v184_v25, %v184_v25  ;;  %v505_v34 = vpack.c.bf16 %v216_v26, %v216_v26  ;;  %336 = vrot.lane.b32.xlu0 %v504_v24, %s568_s20  ;;  %320 = vrot.lane.b32.xlu1 %v496_v23, %s568_s20 }
  0xeb   :  { %300 = vst.msk [vmem:[%s874_s3] sm:$0xf] %vm299_vm1, %v494_v29  ;;  %308 = vst.msk [vmem:[%s874_s3 + $0x20] sm:$0xf] %vm299_vm1, %v502_v30  ;;  %v495_v35 = vpack.c.bf16 %v176_v31, %v176_v31  ;;  %v503_v36 = vpack.c.bf16 %v208_v32, %v208_v32 }
  0xec   :  { %303 = vst.msk [vmem:[%s874_s3 + $0xc] sm:$0xf] %vm299_vm1, %v497_v33  ;;  %311 = vst.msk [vmem:[%s874_s3 + $0x2c] sm:$0xf] %vm299_vm1, %v505_v34 }
  0xed   :  { %301 = vst.msk [vmem:[%s874_s3 + $0x4] sm:$0xf] %vm299_vm1, %v495_v35  ;;  %309 = vst.msk [vmem:[%s874_s3 + $0x24] sm:$0xf] %vm299_vm1, %v503_v36  ;;  %v536_v37 = vpop.f32.mrb[4].mxu0  ;;  %v544_v38 = vpop.f32.mrb[4].mxu1 }
  0xee   :  { %384 = vrot.lane.b32.xlu0 %v496_v23, %s569_s8  ;;  %322 = vrot.lane.b32.xlu1 %v497_v33, %s568_s20  ;;  %v197_v39 = vadd.f32 %v536_v37, %v457_v12  ;;  %v188_v40 = vpop.f32.mrb[5].mxu0  ;;  %v229_v41 = vadd.f32 %v544_v38, %v457_v12  ;;  %v220_v42 = vpop.f32.mrb[5].mxu1 }
  0xef   :  { %v189_v43 = vadd.f32 %v457_v12, %v188_v40  ;;  %v537_v44 = vpop.f32.mrb[6].mxu0  ;;  %v221_v45 = vadd.f32 %v457_v12, %v220_v42  ;;  %v545_v46 = vpop.f32.mrb[6].mxu1 }
  0xf0   :  { %v500_v47 = vpack.c.bf16 %v197_v39, %v197_v39  ;;  %v200_v48 = vadd.f32 %v537_v44, %v457_v12  ;;  %v191_v49 = vpop.f32.mrb[7].mxu0  ;;  %v508_v50 = vpack.c.bf16 %v229_v41, %v229_v41  ;;  %v232_v51 = vadd.f32 %v545_v46, %v457_v12  ;;  %v223_v52 = vpop.f32.mrb[7].mxu1 }
  0xf1   :  { %v498_v53 = vpack.c.bf16 %v189_v43, %v189_v43  ;;  %v192_v54 = vadd.f32 %v457_v12, %v191_v49  ;;  %v506_v55 = vpack.c.bf16 %v221_v45, %v221_v45  ;;  %v224_v56 = vadd.f32 %v457_v12, %v223_v52 }
  0xf2   :  { %400 = vrot.lane.b32.xlu0 %v504_v24, %s569_s8  ;;  %338 = vrot.lane.b32.xlu1 %v505_v34, %s568_s20  ;;  %306 = vst.msk [vmem:[%s874_s3 + $0x18] sm:$0xf] %vm299_vm1, %v500_v47  ;;  %v501_v57 = vpack.c.bf16 %v200_v48, %v200_v48  ;;  %314 = vst.msk [vmem:[%s874_s3 + $0x38] sm:$0xf] %vm299_vm1, %v508_v50  ;;  %v509_v58 = vpack.c.bf16 %v232_v51, %v232_v51 }
  0xf3   :  { %304 = vst.msk [vmem:[%s874_s3 + $0x10] sm:$0xf] %vm299_vm1, %v498_v53  ;;  %v499_v59 = vpack.c.bf16 %v192_v54, %v192_v54  ;;  %312 = vst.msk [vmem:[%s874_s3 + $0x30] sm:$0xf] %vm299_vm1, %v506_v55  ;;  %v507_v60 = vpack.c.bf16 %v224_v56, %v224_v56 }
  0xf4   :  { %307 = vst.msk [vmem:[%s874_s3 + $0x1c] sm:$0xf] %vm299_vm1, %v501_v57  ;;  %315 = vst.msk [vmem:[%s874_s3 + $0x3c] sm:$0xf] %vm299_vm1, %v509_v58 }
  0xf5   :  { %305 = vst.msk [vmem:[%s874_s3 + $0x14] sm:$0xf] %vm299_vm1, %v499_v59  ;;  %313 = vst.msk [vmem:[%s874_s3 + $0x34] sm:$0xf] %vm299_vm1, %v507_v60 }
  0xf6   :  { %386 = vrot.lane.b32.xlu1 %v497_v33, %s569_s8  ;;  %316 = vrot.lane.b32.xlu0 %v494_v29, %s568_s20 }
  0xfa   :  { %402 = vrot.lane.b32.xlu1 %v505_v34, %s569_s8  ;;  %332 = vrot.lane.b32.xlu0 %v502_v30, %s568_s20 }
  0xfe   :  { %334 = vrot.lane.b32.xlu1 %v503_v36, %s568_s20  ;;  %380 = vrot.lane.b32.xlu0 %v494_v29, %s569_s8 }
 0x102   :  { %382 = vrot.lane.b32.xlu1 %v495_v35, %s569_s8  ;;  %396 = vrot.lane.b32.xlu0 %v502_v30, %s569_s8 }
 0x106   :  { %398 = vrot.lane.b32.xlu1 %v503_v36, %s569_s8  ;;  %318 = vrot.lane.b32.xlu0 %v495_v35, %s568_s20 }
 0x10a   :  { %330 = vrot.lane.b32.xlu1 %v501_v57, %s568_s20  ;;  %328 = vrot.lane.b32.xlu0 %v500_v47, %s568_s20 }
 0x10e   :  { %346 = vrot.lane.b32.xlu1 %v509_v58, %s568_s20  ;;  %344 = vrot.lane.b32.xlu0 %v508_v50, %s568_s20 }
 0x112   :  { %394 = vrot.lane.b32.xlu1 %v501_v57, %s569_s8  ;;  %392 = vrot.lane.b32.xlu0 %v500_v47, %s569_s8 }
 0x116   :  { %326 = vrot.lane.b32.xlu1 %v499_v59, %s568_s20  ;;  %324 = vrot.lane.b32.xlu0 %v498_v53, %s568_s20 }
 0x11a   :  { %342 = vrot.lane.b32.xlu1 %v507_v60, %s568_s20  ;;  %340 = vrot.lane.b32.xlu0 %v506_v55, %s568_s20 }
 0x11e   :  { %390 = vrot.lane.b32.xlu1 %v499_v59, %s569_s8  ;;  %388 = vrot.lane.b32.xlu0 %v498_v53, %s569_s8 }
 0x122   :  { %406 = vrot.lane.b32.xlu1 %v507_v60, %s569_s8  ;;  %404 = vrot.lane.b32.xlu0 %v506_v55, %s569_s8 }
 0x126   :  { %410 = vrot.lane.b32.xlu1 %v509_v58, %s569_s8  ;;  %408 = vrot.lane.b32.xlu0 %v508_v50, %s569_s8 }
 0x15c   :  { %v337_v61 = vpop.permute.xlu0 %336  ;;  %v321_v62 = vpop.permute.xlu1 %320 }
 0x15d   :  { %374 = vst.msk [vmem:[%s875_s4 + $0x28] sm:$0xf] %vm299_vm1, %v337_v61  ;;  %366 = vst.msk [vmem:[%s875_s4 + $0x8] sm:$0xf] %vm299_vm1, %v321_v62 }
 0x160   :  { %v385_v63 = vpop.permute.xlu0 %384  ;;  %v323_v0 = vpop.permute.xlu1 %322 }
 0x161   :  { %431 = vst.msk [vmem:[%s876_s5 + $0x8] sm:$0xf] %vm428_vm2, %v385_v63 }
 0x162   :  { %367 = vst.msk [vmem:[%s875_s4 + $0xc] sm:$0xf] %vm299_vm1, %v323_v0 }
 0x164   :  { %v401_v1 = vpop.permute.xlu0 %400  ;;  %v339_v2 = vpop.permute.xlu1 %338 }
 0x165   :  { %439 = vst.msk [vmem:[%s876_s5 + $0x28] sm:$0xf] %vm428_vm2, %v401_v1 }
 0x166   :  { %375 = vst.msk [vmem:[%s875_s4 + $0x2c] sm:$0xf] %vm299_vm1, %v339_v2 }
 0x168   :  { %v387_v3 = vpop.permute.xlu1 %386  ;;  %v317_v4 = vpop.permute.xlu0 %316 }
 0x169   :  { %432 = vst.msk [vmem:[%s876_s5 + $0xc] sm:$0xf] %vm428_vm2, %v387_v3 }
 0x16a   :  { %364 = vst.msk [vmem:[%s875_s4] sm:$0xf] %vm299_vm1, %v317_v4 }
 0x16c   :  { %v403_v5 = vpop.permute.xlu1 %402  ;;  %v333_v6 = vpop.permute.xlu0 %332 }
 0x16d   :  { %440 = vst.msk [vmem:[%s876_s5 + $0x2c] sm:$0xf] %vm428_vm2, %v403_v5 }
 0x16e   :  { %372 = vst.msk [vmem:[%s875_s4 + $0x20] sm:$0xf] %vm299_vm1, %v333_v6 }
 0x170   :  { %v335_v7 = vpop.permute.xlu1 %334  ;;  %v381_v8 = vpop.permute.xlu0 %380 }
 0x171   :  { %373 = vst.msk [vmem:[%s875_s4 + $0x24] sm:$0xf] %vm299_vm1, %v335_v7 }
 0x172   :  { %429 = vst.msk [vmem:[%s876_s5] sm:$0xf] %vm428_vm2, %v381_v8 }
 0x174   :  { %v383_v9 = vpop.permute.xlu1 %382  ;;  %v397_v10 = vpop.permute.xlu0 %396 }
 0x175   :  { %430 = vst.msk [vmem:[%s876_s5 + $0x4] sm:$0xf] %vm428_vm2, %v383_v9  ;;  %437 = vst.msk [vmem:[%s876_s5 + $0x20] sm:$0xf] %vm428_vm2, %v397_v10 }
 0x178   :  { %v399_v11 = vpop.permute.xlu1 %398  ;;  %v319_v12 = vpop.permute.xlu0 %318 }
 0x179   :  { %438 = vst.msk [vmem:[%s876_s5 + $0x24] sm:$0xf] %vm428_vm2, %v399_v11 }
 0x17a   :  { %365 = vst.msk [vmem:[%s875_s4 + $0x4] sm:$0xf] %vm299_vm1, %v319_v12 }
 0x17c   :  { %v331_v13 = vpop.permute.xlu1 %330  ;;  %v329_v14 = vpop.permute.xlu0 %328 }
 0x17d   :  { %371 = vst.msk [vmem:[%s875_s4 + $0x1c] sm:$0xf] %vm299_vm1, %v331_v13  ;;  %370 = vst.msk [vmem:[%s875_s4 + $0x18] sm:$0xf] %vm299_vm1, %v329_v14 }
 0x180   :  { %v347_v15 = vpop.permute.xlu1 %346  ;;  %v345_v16 = vpop.permute.xlu0 %344 }
 0x181   :  { %379 = vst.msk [vmem:[%s875_s4 + $0x3c] sm:$0xf] %vm299_vm1, %v347_v15  ;;  %378 = vst.msk [vmem:[%s875_s4 + $0x38] sm:$0xf] %vm299_vm1, %v345_v16 }
 0x184   :  { %v395_v17 = vpop.permute.xlu1 %394  ;;  %v393_v18 = vpop.permute.xlu0 %392 }
 0x185   :  { %436 = vst.msk [vmem:[%s876_s5 + $0x1c] sm:$0xf] %vm428_vm2, %v395_v17  ;;  %435 = vst.msk [vmem:[%s876_s5 + $0x18] sm:$0xf] %vm428_vm2, %v393_v18 }
 0x188   :  { %v327_v19 = vpop.permute.xlu1 %326  ;;  %v325_v20 = vpop.permute.xlu0 %324 }
 0x189   :  { %369 = vst.msk [vmem:[%s875_s4 + $0x14] sm:$0xf] %vm299_vm1, %v327_v19  ;;  %368 = vst.msk [vmem:[%s875_s4 + $0x10] sm:$0xf] %vm299_vm1, %v325_v20 }
 0x18c   :  { %v343_v21 = vpop.permute.xlu1 %342  ;;  %v341_v22 = vpop.permute.xlu0 %340 }
 0x18d   :  { %377 = vst.msk [vmem:[%s875_s4 + $0x34] sm:$0xf] %vm299_vm1, %v343_v21  ;;  %376 = vst.msk [vmem:[%s875_s4 + $0x30] sm:$0xf] %vm299_vm1, %v341_v22 }
 0x190   :  { %v391_v23 = vpop.permute.xlu1 %390  ;;  %v389_v24 = vpop.permute.xlu0 %388 }
 0x191   :  { %434 = vst.msk [vmem:[%s876_s5 + $0x14] sm:$0xf] %vm428_vm2, %v391_v23  ;;  %433 = vst.msk [vmem:[%s876_s5 + $0x10] sm:$0xf] %vm428_vm2, %v389_v24 }
 0x194   :  { %v407_v25 = vpop.permute.xlu1 %406  ;;  %v405_v26 = vpop.permute.xlu0 %404 }
 0x195   :  { %442 = vst.msk [vmem:[%s876_s5 + $0x34] sm:$0xf] %vm428_vm2, %v407_v25  ;;  %441 = vst.msk [vmem:[%s876_s5 + $0x30] sm:$0xf] %vm428_vm2, %v405_v26 }
 0x198   :  { %v411_v27 = vpop.permute.xlu1 %410  ;;  %v409_v28 = vpop.permute.xlu0 %408 }
 0x199   :  { %444 = vst.msk [vmem:[%s876_s5 + $0x3c] sm:$0xf] %vm428_vm2, %v411_v27  ;;  %443 = vst.msk [vmem:[%s876_s5 + $0x38] sm:$0xf] %vm428_vm2, %v409_v28 }

// kernel: hsimsi_forward.13
= control target key start
LH: loop header
LB: loop body
LE: loop exit
PB: predicated region body
PF: predicated region fallthrough
CT: control target
= control target key end

     0   :  { %s1532_s20 = smov 0   ;;  %s1534_s21 = smov 0   ;;  %s1805_s0 = inlined_call_operand.vmem [shape: bf16[2,64,8], index: 0, kind: input, shape index: {}]   ;;  %s1806_s1 = inlined_call_operand.vmem [shape: bf16[2,64,8], index: 1, kind: input, shape index: {}]   ;;  %s1807_s2 = inlined_call_operand.vmem [shape: bf16[2,64,64], index: 2, kind: input, shape index: {}]   ;;  %s1808_s3 = inlined_call_operand.vmem [shape: bf16[2,64,64], index: 3, kind: input, shape index: {}]   ;;  %s1809_s4 = inlined_call_operand.<no memory space> [shape: f32[1,1], index: 4, kind: input, shape index: {}]   ;;  %s1810_s5 = inlined_call_operand.vmem [shape: bf16[2,64,64], index: 5, kind: output, shape index: {}]  }
   0x1   :  { %v10_v0 = vstv %s1809_s4  ;;  %s1536_s22 = smov 0  }
   0x2   :  { %11 = vst [vmem:[#allocation5] sm:$0x1] %v10_v0 }
   0x3 LB: > { %s36_s4 = sadd.s32 1, %s1490_s21  ;;  %p1257_p0 = scmp.ge.s32.totalorder %s1494_s22, 1  ;;  %s1494_s22 = sphi %s1536_s22, %s17_s22   ;;  %s1490_s21 = sphi %s1534_s21, %s1812_s21   ;;  %s1486_s20 = sphi %s1532_s20, %s1811_s20  }
   0x4   : > { %p38_p1 = scmp.ge.s32.totalorder %s36_s4, 2  ;;  %p268_p2 = scmp.lt.s32.totalorder %s1494_s22, 3 }
   0x6   : > { %s1814_s4 = smov (%p38_p1, %s36_s4), 0  ;;  %p269_p3 = pnand %p1257_p0, %p268_p2 }
   0x7   : > { %p332_p4 = scmp.lt.s32.totalorder (!%p269_p3), %s1486_s20, 1  ;;  %vm468_vm0 = vcmask (!%p269_p3), 64512   ;;  %vm386_vm1 = vcmask (!%p269_p3), 7168   ;;  %v1496_v13 = vmov (!%p269_p3), -inf   ;;  %v559_v14 = vlaneseq (!%p269_p3) }
   0x8   : > { %272 = sbr.rel (%p269_p3) target bundleno = 883 (0x373), region = 40  ;;  %389 = vst.msk [vmem:[#allocation2 + $0x10] sm:$0xff] (!%p269_p3), %vm386_vm1, %v1496_v13  ;;  %387 = vst.msk [vmem:[#allocation2] sm:$0xff] (!%p269_p3), %vm386_vm1, %v1496_v13  ;;  %vm403_vm3 = vcmask (!%p269_p3), 523264   ;;  %v1497_v40 = vmov (!%p269_p3), 0   ;;  %v1498_v41 = vmov (!%p269_p3), 0.0  }
   0x9   : > { %388 = vst.msk [vmem:[#allocation2 + $0x8] sm:$0xff] (!%p269_p3), %vm386_vm1, %v1496_v13  ;;  %390 = vst.msk [vmem:[#allocation2 + $0x18] sm:$0xff] (!%p269_p3), %vm386_vm1, %v1496_v13  ;;  %v560_v15 = vand.u32 (!%p269_p3), 127, %v559_v14  ;;  %1410 = vset.pattern.permute.xlu0 (!%p269_p3), %v1497_v40  ;;  %1411 = vset.pattern.permute.xlu1 (!%p269_p3), %v1497_v40  ;;  %vm1100_vm4 = vcmask (!%p269_p3), 519168  }
   0xa   : > { %391 = vst.msk [vmem:[#allocation2 + $0x20] sm:$0xff] (!%p269_p3), %vm386_vm1, %v1496_v13  ;;  %392 = vst.msk [vmem:[#allocation2 + $0x28] sm:$0xff] (!%p269_p3), %vm386_vm1, %v1496_v13 }
   0xb   : > { %393 = vst.msk [vmem:[#allocation2 + $0x30] sm:$0xff] (!%p269_p3), %vm386_vm1, %v1496_v13  ;;  %394 = vst.msk [vmem:[#allocation2 + $0x38] sm:$0xff] (!%p269_p3), %vm386_vm1, %v1496_v13  ;;  %vm563_vm2 = vcmp.lt.s32.totalorder (!%p269_p3), %v560_v15, 64 }
   0xc   : > { %397 = vst.msk [vmem:[#allocation3 + $0x10] sm:$0xff] (!%p269_p3), %vm386_vm1, %v1498_v41  ;;  %395 = vst.msk [vmem:[#allocation3] sm:$0xff] (!%p269_p3), %vm386_vm1, %v1498_v41 }
   0xd   : > { %396 = vst.msk [vmem:[#allocation3 + $0x8] sm:$0xff] (!%p269_p3), %vm386_vm1, %v1498_v41  ;;  %398 = vst.msk [vmem:[#allocation3 + $0x18] sm:$0xff] (!%p269_p3), %vm386_vm1, %v1498_v41 }
   0xe   : > { %399 = vst.msk [vmem:[#allocation3 + $0x20] sm:$0xff] (!%p269_p3), %vm386_vm1, %v1498_v41  ;;  %400 = vst.msk [vmem:[#allocation3 + $0x28] sm:$0xff] (!%p269_p3), %vm386_vm1, %v1498_v41 }
   0xf   : > { %s1816_s20 = smov (!%p332_p4, %s1486_s20), 1  ;;  %401 = vst.msk [vmem:[#allocation3 + $0x30] sm:$0xff] %vm386_vm1, %v1498_v41  ;;  %402 = vst.msk [vmem:[#allocation3 + $0x38] sm:$0xff] %vm386_vm1, %v1498_v41  ;;  %v1636_v42 = vld [vmem:[#allocation2 + $0x10] sm:$0xff]  ;;  %v1638_v43 = vld [vmem:[#allocation2] sm:$0xff] }
  0x10   : > { %s1550_s23 = sshll.u32 %s1816_s20, 5  ;;  %404 = vst.msk [vmem:[#allocation4] sm:$0xff] %vm403_vm3, %v1498_v41  ;;  %405 = vst.msk [vmem:[#allocation4 + $0x8] sm:$0xff] %vm403_vm3, %v1498_v41  ;;  %v1646_v48 = vld [vmem:[#allocation2 + $0x18] sm:$0xff]  ;;  %v1653_v50 = vld [vmem:[#allocation2 + $0x8] sm:$0xff] }
  0x11   : > { %s349_s26 = scalar_lea.vmem %s1806_s1, %s1550_s23  ;;  %s339_s29 = scalar_lea.vmem %s1805_s0, %s1550_s23  ;;  %406 = vst.msk [vmem:[#allocation4 + $0x10] sm:$0xff] %vm403_vm3, %v1498_v41  ;;  %407 = vst.msk [vmem:[#allocation4 + $0x18] sm:$0xff] %vm403_vm3, %v1498_v41  ;;  %v1671_v57 = vld [vmem:[#allocation2 + $0x20] sm:$0xff]  ;;  %v1677_v60 = vld [vmem:[#allocation2 + $0x28] sm:$0xff] }
  0x12   : > { %v1412_v1 = vld [vmem:[%s349_s26] sm:$0xff]   ;;  %v1413_v2 = vld [vmem:[%s349_s26 + $0x8] sm:$0xff]   ;;  %v1414_v6 = vld [vmem:[%s349_s26 + $0x10] sm:$0xff]   ;;  %408 = vst.msk [vmem:[#allocation4 + $0x20] sm:$0xff] %vm403_vm3, %v1498_v41  ;;  %s359_s7 = scalar_lea.vmem %s1807_s2, %s1550_s23  ;;  %s369_s10 = scalar_lea.vmem %s1808_s3, %s1550_s23 }
  0x13   : > { %1379 = vmatprep.subr.msk.bf16.mxu0 %vm468_vm0, %v1412_v1  ;;  %v482_v3 = vsel %vm468_vm0, %v1412_v1, 0  ;;  %v1416_v4 = vld [vmem:[%s339_s29] sm:$0xff]   ;;  %v485_v5 = vsel %vm468_vm0, %v1413_v2, 0  ;;  %v488_v7 = vsel %vm468_vm0, %v1414_v6, 0  ;;  %v1415_v8 = vld [vmem:[%s349_s26 + $0x18] sm:$0xff]   ;;  %v1417_v10 = vld [vmem:[%s339_s29 + $0x8] sm:$0xff]   ;;  %s379_s13 = scalar_lea.vmem %s1810_s5, %s1550_s23 }
  0x14   : > { %1348 = vmatpush3.bf16.xpose.msra.mxu0 %v482_v3  ;;  %1355 = vmatprep.mubr.msk.bf16.mxu0 %vm468_vm0, %v1416_v4  ;;  %v491_v9 = vsel %vm468_vm0, %v1415_v8, 0  ;;  %v1418_v11 = vld [vmem:[%s339_s29 + $0x10] sm:$0xff]   ;;  %v1419_v12 = vld [vmem:[%s339_s29 + $0x18] sm:$0xff]   ;;  %409 = vst.msk [vmem:[#allocation4 + $0x28] sm:$0xff] %vm403_vm3, %v1498_v41  ;;  %410 = vst.msk [vmem:[#allocation4 + $0x30] sm:$0xff] %vm403_vm3, %v1498_v41 }
  0x15   : > { %1380 = vmatprep.subr.msk.bf16.mxu0 %vm468_vm0, %v1413_v2  ;;  %411 = vst.msk [vmem:[#allocation4 + $0x38] sm:$0xff] %vm403_vm3, %v1498_v41  ;;  %v1682_v62 = vld [vmem:[#allocation2 + $0x30] sm:$0xff]  ;;  %v1689_v0 = vld [vmem:[#allocation2 + $0x38] sm:$0xff]  ;;  %v1420_v1 = vld [vmem:[%s359_s7] sm:$0xff]  }
  0x16   : > { %1363 = vmatprep.subr.bf16.mxu1 %v1420_v1  ;;  %v1423_v13 = vld [vmem:[%s359_s7 + $0x18] sm:$0xff]  }
  0x17   : > { %1364 = vmatpush3.bf16.msra.mxu1 %v1420_v1 }
  0x1c   : > { %1350 = vmatpush3.bf16.xpose.msra.mxu0 %v485_v5 }
  0x1d   : > { %1381 = vmatprep.subr.msk.bf16.mxu0 %vm468_vm0, %v1414_v6 }
  0x24   : > { %1352 = vmatpush3.bf16.xpose.msra.mxu0 %v488_v7 }
  0x25   : > { %1382 = vmatprep.subr.msk.bf16.mxu0 %vm468_vm0, %v1415_v8  ;;  %v1421_v8 = vld [vmem:[%s359_s7 + $0x8] sm:$0xff]  }
  0x26   : > { %1365 = vmatprep.subr.bf16.mxu1 %v1421_v8 }
  0x27   : > { %1366 = vmatpush3.bf16.msra.mxu1 %v1421_v8 }
  0x2c   : > { %1354 = vmatpush3.bf16.xpose.msra.mxu0 %v491_v9 }
  0x33   : > { %1356 = vmatmul.mubr.msk.bf16.vlgmr.msra.gmra.mrb[0].mxu0 %vm468_vm0, %v1417_v10 }
  0x34   : > { %1359 = vmatprep.mubr.msk.bf16.mxu0 %vm468_vm0, %v1418_v11 }
  0x3b   : > { %1360 = vmatmul.mubr.msk.bf16.gmra.mrb[4].mxu0 %vm468_vm0, %v1419_v12  ;;  %v1422_v12 = vld [vmem:[%s359_s7 + $0x10] sm:$0xff]  }
  0x3c   : > { %1367 = vmatprep.subr.bf16.mxu1 %v1422_v12 }
  0x3d   : > { %1368 = vmatpush3.bf16.msra.mxu1 %v1422_v12 }
  0x3e   : > { %1369 = vmatprep.subr.bf16.mxu1 %v1423_v13 }
  0x41   : > { %1370 = vmatpush3.bf16.msra.mxu1 %v1423_v13 }
 0x106   : > { %v1357_v16 = vpop.f32.mrb[0].mxu0 }
 0x107   : > { %v1581_v17 = vsel %vm563_vm2, %v1357_v16, -inf  ;;  %v527_v18 = vpop.f32.mrb[1].mxu0 }
 0x108   : > { %v1584_v19 = vsel %vm563_vm2, %v527_v18, -inf  ;;  %v1358_v20 = vpop.f32.mrb[2].mxu0  ;;  %v587_v21 = vsel %vm403_vm3, %v1581_v17, -inf }
 0x109   : > { %v1589_v22 = vsel %vm563_vm2, %v1358_v20, -inf  ;;  %588 = vmax.xlane.f32.xlu1 %v587_v21  ;;  %v530_v23 = vpop.f32.mrb[3].mxu0  ;;  %v581_v24 = vsel %vm403_vm3, %v1584_v19, -inf }
 0x10a   : > { %v1594_v25 = vsel %vm563_vm2, %v530_v23, -inf  ;;  %582 = vmax.xlane.f32.xlu0 %v581_v24  ;;  %v590_v26 = vsel %vm403_vm3, %v1589_v22, -inf }
 0x10b   : > { %v584_v27 = vsel %vm403_vm3, %v1594_v25, -inf }
 0x10d   : > { %591 = vmax.xlane.f32.xlu1 %v590_v26 }
 0x10e   : > { %585 = vmax.xlane.f32.xlu0 %v584_v27  ;;  %v1361_v28 = vpop.f32.mrb[4].mxu0 }
 0x10f   : > { %v543_v29 = vpop.f32.mrb[5].mxu0  ;;  %v1606_v34 = vsel %vm563_vm2, %v1361_v28, -inf }
 0x110   : > { %v1601_v30 = vsel %vm563_vm2, %v543_v29, -inf  ;;  %v1362_v31 = vpop.f32.mrb[6].mxu0  ;;  %v599_v38 = vsel %vm403_vm3, %v1606_v34, -inf }
 0x111   : > { %v546_v32 = vpop.f32.mrb[7].mxu0  ;;  %v593_v33 = vsel %vm403_vm3, %v1601_v30, -inf  ;;  %v1614_v37 = vsel %vm563_vm2, %v1362_v31, -inf }
 0x112   : > { %v1609_v35 = vsel %vm563_vm2, %v546_v32, -inf  ;;  %594 = vmax.xlane.f32.xlu0 %v593_v33  ;;  %v602_v39 = vsel %vm403_vm3, %v1614_v37, -inf }
 0x113   : > { %v596_v36 = vsel %vm403_vm3, %v1609_v35, -inf }
 0x114   : > { %597 = vmax.xlane.f32.xlu1 %v596_v36 }
 0x116   : > { %600 = vmax.xlane.f32.xlu0 %v599_v38 }
 0x118   : > { %603 = vmax.xlane.f32.xlu1 %v602_v39 }
 0x196   : > { %v589_v44 = vpop.xlane.xlu1 %588 }
 0x197   : > { %v1641_v45 = vmax.f32 %v1636_v42, %v589_v44  ;;  %v583_v46 = vpop.xlane.xlu0 %582 }
 0x198   : > { %v1644_v47 = vmax.f32 %v1638_v43, %v583_v46 }
 0x199   : > { %v615_v49 = vsub.f32 %v1636_v42, %v1641_v45  ;;  %945 = vst.msk [vmem:[#allocation2 + $0x10] sm:$0xff] %vm386_vm1, %v1641_v45  ;;  %649 = vperm.xlu1 %1411, %v1641_v45  }
 0x19a   : > { %v613_v51 = vsub.f32 %v1638_v43, %v1644_v47  ;;  %943 = vst.msk [vmem:[#allocation2] sm:$0xff] %vm386_vm1, %v1644_v47  ;;  %v592_v52 = vpop.xlane.xlu1 %591  ;;  %639 = vperm.xlu0 %1410, %v1644_v47  }
 0x19b   : > { %v1661_v53 = vmax.f32 %v1646_v48, %v592_v52  ;;  %v586_v54 = vpop.xlane.xlu0 %585 }
 0x19c   : > { %v1664_v55 = vmax.f32 %v1653_v50, %v586_v54 }
 0x19d   : > { %v616_v56 = vsub.f32 %v1646_v48, %v1661_v53  ;;  %946 = vst.msk [vmem:[#allocation2 + $0x18] sm:$0xff] %vm386_vm1, %v1661_v53  ;;  %654 = vperm.xlu1 %1411, %v1661_v53  }
 0x19e   : > { %v614_v58 = vsub.f32 %v1653_v50, %v1664_v55  ;;  %944 = vst.msk [vmem:[#allocation2 + $0x8] sm:$0xff] %vm386_vm1, %v1664_v55 }
 0x19f   : > { %v595_v59 = vpop.xlane.xlu0 %594 }
 0x1a0   : > { %v1680_v61 = vmax.f32 %v1671_v57, %v595_v59 }
 0x1a1   : > { %644 = vperm.xlu1 %1411, %v1664_v55   ;;  %v598_v63 = vpop.xlane.xlu1 %597 }
 0x1a2   : > { %v617_v2 = vsub.f32 %v1671_v57, %v1680_v61  ;;  %947 = vst.msk [vmem:[#allocation2 + $0x20] sm:$0xff] %vm386_vm1, %v1680_v61  ;;  %v1696_v3 = vmax.f32 %v1677_v60, %v598_v63 }
 0x1a3   : > { %v601_v4 = vpop.xlane.xlu0 %600 }
 0x1a4   : > { %v618_v5 = vsub.f32 %v1677_v60, %v1696_v3  ;;  %948 = vst.msk [vmem:[#allocation2 + $0x28] sm:$0xff] %vm386_vm1, %v1696_v3  ;;  %v1703_v6 = vmax.f32 %v1682_v62, %v601_v4  ;;  %v629_v50 = vmul.f32 1.442695, %v617_v2  ;;  %v701_v60 = vld [vmem:[#allocation3] sm:$0xff] }
 0x1a5   : > { %v604_v7 = vpop.xlane.xlu1 %603 }
 0x1a6   : > { %v619_v9 = vsub.f32 %v1682_v62, %v1703_v6  ;;  %949 = vst.msk [vmem:[#allocation2 + $0x30] sm:$0xff] %vm386_vm1, %v1703_v6  ;;  %v1710_v10 = vmax.f32 %v1689_v0, %v604_v7  ;;  %669 = vperm.xlu1 %1411, %v1703_v6   ;;  %v631_v43 = vmul.f32 1.442695, %v618_v5  ;;  %v704_v5 = vld [vmem:[#allocation3 + $0x18] sm:$0xff] }
 0x1a8   : > { %v620_v11 = vsub.f32 %v1689_v0, %v1710_v10  ;;  %950 = vst.msk [vmem:[#allocation2 + $0x38] sm:$0xff] %vm386_vm1, %v1710_v10  ;;  %v633_v42 = vmul.f32 1.442695, %v619_v9 }
 0x1aa   : > { %659 = vperm.xlu1 %1411, %v1680_v61   ;;  %v635_v45 = vmul.f32 1.442695, %v620_v11 }
 0x1ae   : > { %664 = vperm.xlu1 %1411, %v1696_v3  }
 0x1b2   : > { %674 = vperm.xlu1 %1411, %v1710_v10   ;;  %v702_v10 = vld [vmem:[#allocation3 + $0x8] sm:$0xff] }
 0x218   : > { %v650_v14 = vpop.permute.xlu1 %649 }
 0x219   : > { %v679_v15 = vsub.f32 %v1581_v17, %v650_v14  ;;  %v640_v16 = vpop.permute.xlu0 %639 }
 0x21a   : > { %v677_v18 = vsub.f32 %v1584_v19, %v640_v16 }
 0x21b   : > { %v689_v20 = vmul.f32 1.442695, %v679_v15 }
 0x21c   : > { %v685_v21 = vmul.f32 1.442695, %v677_v18  ;;  %v655_v23 = vpop.permute.xlu1 %654 }
 0x21d   : > { %1424 = vpow2.f32 %v689_v20  ;;  %v680_v24 = vsub.f32 %v1589_v22, %v655_v23  ;;  %v623_v20 = vmul.f32 1.442695, %v614_v58  ;;  %v625_v23 = vmul.f32 1.442695, %v615_v49  ;;  %v703_v58 = vld [vmem:[#allocation3 + $0x10] sm:$0xff] }
 0x21e   : > { %1426 = vpow2.f32 %v685_v21  ;;  %v621_v21 = vmul.f32 1.442695, %v613_v51 }
 0x21f   : > { %v691_v26 = vmul.f32 1.442695, %v680_v24  ;;  %v627_v24 = vmul.f32 1.442695, %v616_v56 }
 0x220   : > { %v645_v27 = vpop.permute.xlu1 %644 }
 0x221   : > { %1428 = vpow2.f32 %v691_v26  ;;  %v678_v28 = vsub.f32 %v1594_v25, %v645_v27 }
 0x223   : > { %v687_v29 = vmul.f32 1.442695, %v678_v28 }
 0x225   : > { %1430 = vpow2.f32 %v687_v29  ;;  %v670_v31 = vpop.permute.xlu1 %669 }
 0x226   : > { %v683_v33 = vsub.f32 %v1606_v34, %v670_v31 }
 0x227   : > { %v1425_v32 = vpop.eup %1424 }
 0x228   : > { %v1427_v17 = vpop.eup %1426  ;;  %v723_v19 = vsel %vm403_vm3, %v1425_v32, 0.0  ;;  %v697_v40 = vmul.f32 1.442695, %v683_v33 }
 0x229   : > { %724 = vadd.xlane.f32.xlu0 %v723_v19  ;;  %v660_v36 = vpop.permute.xlu1 %659  ;;  %v717_v38 = vsel %vm403_vm3, %v1427_v17, 0.0 }
 0x22a   : > { %v681_v22 = vsub.f32 %v1601_v30, %v660_v36  ;;  %718 = vadd.xlane.f32.xlu1 %v717_v38  ;;  %v707_v38 = vld [vmem:[#allocation3 + $0x30] sm:$0xff] }
 0x22b   : > { %v1429_v39 = vpop.eup %1428 }
 0x22c   : > { %v693_v41 = vmul.f32 1.442695, %v681_v22  ;;  %v726_v25 = vsel %vm403_vm3, %v1429_v39, 0.0  ;;  %v815_v30 = vpack.c.bf16 %v1429_v39, %v1425_v32  ;;  %v706_v22 = vld [vmem:[#allocation3 + $0x28] sm:$0xff] }
 0x22d   : > { %v665_v44 = vpop.permute.xlu1 %664 }
 0x22e   : > { %1432 = vpow2.f32 %v693_v41  ;;  %v682_v46 = vsub.f32 %v1609_v35, %v665_v44  ;;  %727 = vadd.xlane.f32.xlu1 %v726_v25 }
 0x22f   : > { %v1431_v34 = vpop.eup %1430  ;;  %1434 = vpow2.f32 %v697_v40 }
 0x230   : > { %v695_v52 = vmul.f32 1.442695, %v682_v46  ;;  %v720_v54 = vsel %vm403_vm3, %v1431_v34, 0.0  ;;  %v814_v59 = vpack.c.bf16 %v1431_v34, %v1427_v17  ;;  %v705_v17 = vld [vmem:[#allocation3 + $0x20] sm:$0xff] }
 0x231   : > { %721 = vadd.xlane.f32.xlu0 %v720_v54  ;;  %v675_v63 = vpop.permute.xlu1 %674 }
 0x232   : > { %1436 = vpow2.f32 %v695_v52  ;;  %v684_v1 = vsub.f32 %v1614_v37, %v675_v63  ;;  %1371 = vmatprep.mubr.msk.bf16.mxu1 %vm403_vm3, %v814_v59  ;;  %v708_v52 = vld [vmem:[#allocation3 + $0x38] sm:$0xff] }
 0x233   : > { %1372 = vmatmul.mubr.msk.bf16.vlgmr.msra.gmra.mrb[0].mxu1 %vm403_vm3, %v815_v30 }
 0x234   : > { %v699_v4 = vmul.f32 1.442695, %v684_v1 }
 0x236   : > { %1438 = vpow2.f32 %v699_v4 }
 0x237   : > { %1440 = vpow2.f32 %v623_v20  ;;  %v1288_v20 = vld [vmem:[#allocation5] ss:$0 sm:$0xff] }
 0x238   : > { %v1433_v35 = vpop.eup %1432  ;;  %1442 = vpow2.f32 %v621_v21 }
 0x239   : > { %v729_v7 = vsel %vm403_vm3, %v1433_v35, 0.0  ;;  %v1435_v8 = vpop.eup %1434  ;;  %1444 = vpow2.f32 %v625_v23 }
 0x23a   : > { %730 = vadd.xlane.f32.xlu0 %v729_v7  ;;  %v735_v13 = vsel %vm403_vm3, %v1435_v8, 0.0  ;;  %1446 = vpow2.f32 %v627_v24  ;;  %v760_v24 = vld [vmem:[#allocation4 + $0x10] sm:$0xff] }
 0x23b   : > { %1448 = vpow2.f32 %v629_v50 }
 0x23c   : > { %v1437_v12 = vpop.eup %1436  ;;  %1450 = vpow2.f32 %v631_v43  ;;  %v758_v43 = vld [vmem:[#allocation4] sm:$0xff] }
 0x23d   : > { %v732_v14 = vsel %vm403_vm3, %v1437_v12, 0.0  ;;  %v816_v15 = vpack.c.bf16 %v1437_v12, %v1433_v35  ;;  %1452 = vpow2.f32 %v633_v42  ;;  %v761_v42 = vld [vmem:[#allocation4 + $0x18] sm:$0xff] }
 0x23e   : > { %736 = vadd.xlane.f32.xlu0 %v735_v13  ;;  %733 = vadd.xlane.f32.xlu1 %v732_v14  ;;  %1454 = vpow2.f32 %v635_v45 }
 0x23f   : > { %1375 = vmatprep.mubr.msk.bf16.mxu1 %vm403_vm3, %v816_v15 }
 0x240   : > { %v1439_v37 = vpop.eup %1438 }
 0x241   : > { %v738_v16 = vsel %vm403_vm3, %v1439_v37, 0.0  ;;  %v817_v18 = vpack.c.bf16 %v1439_v37, %v1435_v8  ;;  %v1441_v47 = vpop.eup %1440 }
 0x242   : > { %739 = vadd.xlane.f32.xlu1 %v738_v16  ;;  %v1443_v48 = vpop.eup %1442  ;;  %v710_v27 = vmul.f32 %v1441_v47, %v702_v10  ;;  %v765_v10 = vld [vmem:[#allocation4 + $0x38] sm:$0xff] }
 0x243   : > { %1376 = vmatmul.mubr.msk.bf16.gmra.mrb[4].mxu1 %vm403_vm3, %v817_v18  ;;  %v1445_v49 = vpop.eup %1444  ;;  %v709_v0 = vmul.f32 %v1443_v48, %v701_v60 }
 0x244   : > { %v1447_v51 = vpop.eup %1446  ;;  %v711_v61 = vmul.f32 %v1445_v49, %v703_v58 }
 0x245   : > { %v1449_v53 = vpop.eup %1448  ;;  %v712_v9 = vmul.f32 %v1447_v51, %v704_v5  ;;  %v764_v5 = vld [vmem:[#allocation4 + $0x30] sm:$0xff] }
 0x246   : > { %v1451_v55 = vpop.eup %1450  ;;  %v713_v19 = vmul.f32 %v1449_v53, %v705_v17 }
 0x247   : > { %v1453_v56 = vpop.eup %1452  ;;  %v714_v25 = vmul.f32 %v1451_v55, %v706_v22 }
 0x248   : > { %v1455_v57 = vpop.eup %1454  ;;  %v715_v41 = vmul.f32 %v1453_v56, %v707_v38 }
 0x249   : > { %v716_v63 = vmul.f32 %v1455_v57, %v708_v52  ;;  %v1313_v52 = vld [vmem:[%s369_s10] sm:$0xff]  }
 0x253   : > { %773 = vperm.xlu1 %1411, %v1441_v47   ;;  %v759_v47 = vld [vmem:[#allocation4 + $0x8] sm:$0xff] }
 0x254   : > { %768 = vperm.xlu0 %1410, %v1443_v48  }
 0x257   : > { %778 = vperm.xlu1 %1411, %v1445_v49  }
 0x258   : > { %783 = vperm.xlu0 %1410, %v1447_v51  }
 0x25b   : > { %788 = vperm.xlu1 %1411, %v1449_v53  }
 0x25c   : > { %793 = vperm.xlu0 %1410, %v1451_v55  }
 0x25f   : > { %798 = vperm.xlu1 %1411, %v1453_v56  }
 0x260   : > { %803 = vperm.xlu0 %1410, %v1455_v57  }
 0x2b6   : > { %v725_v62 = vpop.xlane.xlu0 %724 }
 0x2b7   : > { %v743_v2 = vadd.f32 %v725_v62, %v711_v61  ;;  %v719_v3 = vpop.xlane.xlu1 %718 }
 0x2b8   : > { %v741_v6 = vadd.f32 %v719_v3, %v709_v0 }
 0x2b9   : > { %752 = vst.msk [vmem:[#allocation3 + $0x10] sm:$0xff] %vm386_vm1, %v743_v2 }
 0x2ba   : > { %750 = vst.msk [vmem:[#allocation3] sm:$0xff] %vm386_vm1, %v741_v6 }
 0x2bb   : > { %v728_v11 = vpop.xlane.xlu1 %727 }
 0x2bc   : > { %v744_v26 = vadd.f32 %v728_v11, %v712_v9  ;;  %v762_v9 = vld [vmem:[#allocation4 + $0x20] sm:$0xff] }
 0x2be   : > { %753 = vst.msk [vmem:[#allocation3 + $0x18] sm:$0xff] %vm386_vm1, %v744_v26  ;;  %v722_v28 = vpop.xlane.xlu0 %721  ;;  %v763_v26 = vld [vmem:[#allocation4 + $0x28] sm:$0xff] }
 0x2bf   : > { %v742_v29 = vadd.f32 %v722_v28, %v710_v27 }
 0x2c0   : > { %v964_v31 = vld [vmem:[#allocation3 + $0x10] sm:$0xff] }
 0x2c1   : > { %751 = vst.msk [vmem:[#allocation3 + $0x8] sm:$0xff] %vm386_vm1, %v742_v29  ;;  %1456 = vrcp.f32 %v964_v31  ;;  %v962_v32 = vld [vmem:[#allocation3] sm:$0xff] }
 0x2c2   : > { %1458 = vrcp.f32 %v962_v32 }
 0x2c5   : > { %v965_v33 = vld [vmem:[#allocation3 + $0x18] sm:$0xff] }
 0x2c6   : > { %1460 = vrcp.f32 %v965_v33 }
 0x2c7   : > { %v731_v36 = vpop.xlane.xlu0 %730 }
 0x2c8   : > { %v745_v39 = vadd.f32 %v731_v36, %v713_v19  ;;  %v963_v40 = vld [vmem:[#allocation3 + $0x8] sm:$0xff] }
 0x2c9   : > { %1462 = vrcp.f32 %v963_v40 }
 0x2ca   : > { %754 = vst.msk [vmem:[#allocation3 + $0x20] sm:$0xff] %vm386_vm1, %v745_v39 }
 0x2cb   : > { %v1457_v44 = vpop.eup %1456  ;;  %v737_v46 = vpop.xlane.xlu0 %736 }
 0x2cc   : > { %v734_v34 = vpop.xlane.xlu1 %733  ;;  %v747_v54 = vadd.f32 %v737_v46, %v715_v41  ;;  %990 = vperm.xlu1 %1411, %v1457_v44   ;;  %v1459_v30 = vpop.eup %1458 }
 0x2cd   : > { %v746_v59 = vadd.f32 %v734_v34, %v714_v25 }
 0x2ce   : > { %756 = vst.msk [vmem:[#allocation3 + $0x30] sm:$0xff] %vm386_vm1, %v747_v54  ;;  %v1328_v54 = vld [vmem:[%s369_s10 + $0x8] sm:$0xff]  }
 0x2cf   : > { %755 = vst.msk [vmem:[#allocation3 + $0x28] sm:$0xff] %vm386_vm1, %v746_v59  ;;  %v1329_v59 = vld [vmem:[%s369_s10 + $0x10] sm:$0xff]  }
 0x2d0   : > { %v740_v1 = vpop.xlane.xlu1 %739  ;;  %v1461_v4 = vpop.eup %1460  ;;  %980 = vperm.xlu1 %1411, %v1459_v30  }
 0x2d1   : > { %v748_v35 = vadd.f32 %v740_v1, %v716_v63  ;;  %995 = vperm.xlu0 %1410, %v1461_v4   ;;  %v966_v13 = vld [vmem:[#allocation3 + $0x20] sm:$0xff]  ;;  %v1330_v63 = vld [vmem:[%s369_s10 + $0x18] sm:$0xff]  }
 0x2d3   : > { %757 = vst.msk [vmem:[#allocation3 + $0x38] sm:$0xff] %vm386_vm1, %v748_v35  ;;  %v1463_v7 = vpop.eup %1462  ;;  %v769_v23 = vpop.permute.xlu0 %768 }
 0x2d4   : > { %v774_v21 = vpop.permute.xlu1 %773  ;;  %v806_v49 = vmul.f32 %v769_v23, %v758_v43 }
 0x2d5   : > { %985 = vperm.xlu0 %1410, %v1463_v7   ;;  %v968_v8 = vld [vmem:[#allocation3 + $0x30] sm:$0xff]  ;;  %v807_v57 = vmul.f32 %v774_v21, %v759_v47  ;;  %v1314_v7 = vunpack.c.l.bf16 %v1313_v52  ;;  %v1327_v21 = vunpack.c.h.bf16 %v1330_v63 }
 0x2d6   : > { %v967_v12 = vld [vmem:[#allocation3 + $0x28] sm:$0xff]  ;;  %1464 = vrcp.f32 %v968_v8  ;;  %v1315_v8 = vunpack.c.h.bf16 %v1313_v52 }
 0x2d7   : > { %1466 = vrcp.f32 %v967_v12  ;;  %v784_v45 = vpop.permute.xlu0 %783  ;;  %v1318_v12 = vunpack.c.l.bf16 %v1328_v54 }
 0x2d8   : > { %1468 = vrcp.f32 %v966_v13  ;;  %v779_v50 = vpop.permute.xlu1 %778  ;;  %v809_v53 = vmul.f32 %v784_v45, %v761_v42  ;;  %v1319_v13 = vunpack.c.h.bf16 %v1328_v54 }
 0x2d9   : > { %v808_v48 = vmul.f32 %v779_v50, %v760_v24 }
 0x2da   : > { %v969_v14 = vld [vmem:[#allocation3 + $0x38] sm:$0xff] }
 0x2db   : > { %1470 = vrcp.f32 %v969_v14  ;;  %v794_v3 = vpop.permute.xlu0 %793 }
 0x2dc   : > { %v789_v2 = vpop.permute.xlu1 %788  ;;  %v811_v33 = vmul.f32 %v794_v3, %v763_v26 }
 0x2dd   : > { %v810_v28 = vmul.f32 %v789_v2, %v762_v9 }
 0x2df   : > { %v804_v11 = vpop.permute.xlu0 %803 }
 0x2e0   : > { %v1465_v15 = vpop.eup %1464  ;;  %v799_v6 = vpop.permute.xlu1 %798  ;;  %v813_v31 = vmul.f32 %v804_v11, %v765_v10 }
 0x2e1   : > { %v1467_v37 = vpop.eup %1466  ;;  %1010 = vperm.xlu1 %1411, %v1465_v15   ;;  %v812_v27 = vmul.f32 %v799_v6, %v764_v5 }
 0x2e2   : > { %1005 = vperm.xlu0 %1410, %v1467_v37   ;;  %v1469_v16 = vpop.eup %1468 }
 0x2e5   : > { %v1471_v18 = vpop.eup %1470  ;;  %1000 = vperm.xlu1 %1411, %v1469_v16   ;;  %v1322_v16 = vunpack.c.l.bf16 %v1329_v59 }
 0x2e6   : > { %1015 = vperm.xlu0 %1410, %v1471_v18   ;;  %v1323_v18 = vunpack.c.h.bf16 %v1329_v59 }
 0x2e9   : > { %1033 = vperm.xlu1 %1411, %v1288_v20   ;;  %v1326_v20 = vunpack.c.l.bf16 %v1330_v63 }
 0x306   : > { %v1373_v51 = vpop.f32.mrb[0].mxu1 }
 0x307   : > { %v929_v55 = vadd.f32 %v1373_v51, %v808_v48  ;;  %v896_v56 = vpop.f32.mrb[1].mxu1 }
 0x308   : > { %v927_v58 = vadd.f32 %v896_v56, %v806_v49  ;;  %v1374_v60 = vpop.f32.mrb[2].mxu1 }
 0x309   : > { %937 = vst.msk [vmem:[#allocation4 + $0x10] sm:$0xff] %vm403_vm3, %v929_v55  ;;  %v930_v61 = vadd.f32 %v1374_v60, %v809_v53  ;;  %v899_v62 = vpop.f32.mrb[3].mxu1 }
 0x30a   : > { %935 = vst.msk [vmem:[#allocation4] sm:$0xff] %vm403_vm3, %v927_v58  ;;  %v928_v0 = vadd.f32 %v899_v62, %v807_v57 }
 0x30b   : > { %938 = vst.msk [vmem:[#allocation4 + $0x18] sm:$0xff] %vm403_vm3, %v930_v61 }
 0x30c   : > { %936 = vst.msk [vmem:[#allocation4 + $0x8] sm:$0xff] %vm403_vm3, %v928_v0 }
 0x310   : > { %v956_v1 = vld [vmem:[#allocation4 + $0x10] sm:$0xff] }
 0x311   : > { %v954_v4 = vld [vmem:[#allocation4] sm:$0xff] }
 0x312   : > { %v957_v14 = vld [vmem:[#allocation4 + $0x18] sm:$0xff] }
 0x313   : > { %v955_v15 = vld [vmem:[#allocation4 + $0x8] sm:$0xff] }
 0x316   : > { %v1377_v29 = vpop.f32.mrb[4].mxu1 }
 0x317   : > { %v933_v32 = vadd.f32 %v1377_v29, %v812_v27  ;;  %v912_v17 = vpop.f32.mrb[5].mxu1 }
 0x318   : > { %v931_v19 = vadd.f32 %v912_v17, %v810_v28  ;;  %v1378_v36 = vpop.f32.mrb[6].mxu1 }
 0x319   : > { %941 = vst.msk [vmem:[#allocation4 + $0x30] sm:$0xff] %vm403_vm3, %v933_v32  ;;  %v934_v38 = vadd.f32 %v1378_v36, %v813_v31  ;;  %v915_v22 = vpop.f32.mrb[7].mxu1 }
 0x31a   : > { %939 = vst.msk [vmem:[#allocation4 + $0x20] sm:$0xff] %vm403_vm3, %v931_v19  ;;  %v932_v39 = vadd.f32 %v915_v22, %v811_v33 }
 0x31b   : > { %942 = vst.msk [vmem:[#allocation4 + $0x38] sm:$0xff] %vm403_vm3, %v934_v38 }
 0x31c   : > { %940 = vst.msk [vmem:[#allocation4 + $0x28] sm:$0xff] %vm403_vm3, %v932_v39 }
 0x320   : > { %v960_v37 = vld [vmem:[#allocation4 + $0x30] sm:$0xff] }
 0x321   : > { %v958_v47 = vld [vmem:[#allocation4 + $0x20] sm:$0xff] }
 0x322   : > { %v961_v45 = vld [vmem:[#allocation4 + $0x38] sm:$0xff] }
 0x323   : > { %v959_v42 = vld [vmem:[#allocation4 + $0x28] sm:$0xff] }
 0x34b   : > { %v991_v40 = vpop.permute.xlu1 %990 }
 0x34c   : > { %v1020_v23 = vmul.f32 %v991_v40, %v956_v1 }
 0x34f   : > { %v981_v25 = vpop.permute.xlu1 %980 }
 0x350   : > { %v996_v41 = vpop.permute.xlu0 %995  ;;  %v1018_v24 = vmul.f32 %v981_v25, %v954_v4 }
 0x351   : > { %v1021_v50 = vmul.f32 %v996_v41, %v957_v14 }
 0x354   : > { %v986_v44 = vpop.permute.xlu0 %985 }
 0x355   : > { %v1019_v43 = vmul.f32 %v986_v44, %v955_v15 }
 0x360   : > { %v1011_v46 = vpop.permute.xlu1 %1010 }
 0x361   : > { %v1006_v34 = vpop.permute.xlu0 %1005  ;;  %v1024_v49 = vmul.f32 %v1011_v46, %v960_v37 }
 0x362   : > { %v1023_v48 = vmul.f32 %v1006_v34, %v959_v42 }
 0x364   : > { %v1001_v30 = vpop.permute.xlu1 %1000 }
 0x365   : > { %v1016_v35 = vpop.permute.xlu0 %1015  ;;  %v1022_v53 = vmul.f32 %v1001_v30, %v958_v47 }
 0x366   : > { %v1025_v51 = vmul.f32 %v1016_v35, %v961_v45 }
 0x368   : > { %v1034_v55 = vpop.permute.xlu1 %1033 }
 0x369   : > { %v1036_v56 = vmul.f32 %v1034_v55, %v1018_v24  ;;  %v1037_v57 = vmul.f32 %v1034_v55, %v1019_v43  ;;  %v1038_v58 = vmul.f32 %v1034_v55, %v1020_v23  ;;  %v1039_v60 = vmul.f32 %v1034_v55, %v1021_v50 }
 0x36a   : > { %v1040_v61 = vmul.f32 %v1034_v55, %v1022_v53  ;;  %v1041_v62 = vmul.f32 %v1034_v55, %v1023_v48  ;;  %v1042_v0 = vmul.f32 %v1034_v55, %v1024_v49  ;;  %v1043_v2 = vmul.f32 %v1034_v55, %v1025_v51 }
 0x36b   : > { %v1060_v3 = vadd.f32 %v1314_v7, %v1036_v56  ;;  %v1061_v5 = vadd.f32 %v1315_v8, %v1037_v57  ;;  %v1062_v6 = vadd.f32 %v1318_v12, %v1038_v58  ;;  %v1063_v9 = vadd.f32 %v1319_v13, %v1039_v60 }
 0x36c   : > { %v1064_v10 = vadd.f32 %v1322_v16, %v1040_v61  ;;  %v1065_v11 = vadd.f32 %v1323_v18, %v1041_v62  ;;  %v1066_v26 = vadd.f32 %v1326_v20, %v1042_v0  ;;  %v1067_v27 = vadd.f32 %v1327_v21, %v1043_v2 }
 0x36d   : > { %v1304_v28 = vpack.c.bf16 %v1060_v3, %v1060_v3  ;;  %v1305_v29 = vpack.c.bf16 %v1061_v5, %v1061_v5  ;;  %v1306_v31 = vpack.c.bf16 %v1062_v6, %v1062_v6  ;;  %v1307_v32 = vpack.c.bf16 %v1063_v9, %v1063_v9 }
 0x36e   : > { %v1308_v17 = vpack.c.bf16 %v1064_v10, %v1064_v10  ;;  %v1309_v33 = vpack.c.bf16 %v1065_v11, %v1065_v11  ;;  %v1310_v19 = vpack.c.bf16 %v1066_v26, %v1066_v26  ;;  %v1311_v36 = vpack.c.bf16 %v1067_v27, %v1067_v27 }
 0x36f   : > { %1101 = vst.msk [vmem:[%s379_s13] sm:$0xf] %vm1100_vm4, %v1304_v28  ;;  %1102 = vst.msk [vmem:[%s379_s13 + $0x4] sm:$0xf] %vm1100_vm4, %v1305_v29 }
 0x370   : > { %1103 = vst.msk [vmem:[%s379_s13 + $0x8] sm:$0xf] %vm1100_vm4, %v1306_v31  ;;  %1104 = vst.msk [vmem:[%s379_s13 + $0xc] sm:$0xf] %vm1100_vm4, %v1307_v32 }
 0x371   : > { %1105 = vst.msk [vmem:[%s379_s13 + $0x10] sm:$0xf] %vm1100_vm4, %v1308_v17  ;;  %1106 = vst.msk [vmem:[%s379_s13 + $0x14] sm:$0xf] %vm1100_vm4, %v1309_v33 }
 0x372   : > { %1107 = vst.msk [vmem:[%s379_s13 + $0x18] sm:$0xf] %vm1100_vm4, %v1310_v19  ;;  %1108 = vst.msk [vmem:[%s379_s13 + $0x1c] sm:$0xf] %vm1100_vm4, %v1311_v36 }
 0x373 PF: > { %s17_s22 = sadd.s32 1, %s1494_s22   ;;  %s1811_s20 = smov %s1490_s21 }
 0x374   : > { %p14_p5 = scmp.ge.s32.totalorder %s17_s22, 4   ;;  %s1812_s21 = smov %s1814_s4 }
 0x376   :  { %16 = sbr.rel (!%p14_p5) target bundleno = 3 (0x3), region = 87 }

// kernel: hsimsi_forward.14
= control target key start
LH: loop header
LB: loop body
LE: loop exit
PB: predicated region body
PF: predicated region fallthrough
CT: control target
= control target key end

     0   :  { %vm108_vm0 = vcmask 523264   ;;  %vm294_vm1 = vcmask 257024   ;;  %vm437_vm2 = vcmask 519168   ;;  %s848_s1 = inlined_call_operand.vmem [shape: bf16[64,64], index: 1, kind: input, shape index: {}]   ;;  %s849_s0 = inlined_call_operand.vmem [shape: bf16[128,64], index: 0, kind: input, shape index: {}]   ;;  %s850_s2 = inlined_call_operand.vmem [shape: f32[1,64], index: 2, kind: input, shape index: {}]   ;;  %s851_s3 = inlined_call_operand.vmem [shape: f32[1,64], index: 3, kind: input, shape index: {}]   ;;  %s852_s4 = inlined_call_operand.vmem [shape: bf16[128,32], index: 4, kind: output, shape index: {0}]   ;;  %s853_s5 = inlined_call_operand.vmem [shape: bf16[128,64], index: 5, kind: output, shape index: {1}]  }
   0x1   :  { %v592_v0 = vld [vmem:[%s848_s1] sm:$0xff]   ;;  %v593_v1 = vld [vmem:[%s848_s1 + $0x8] sm:$0xff]   ;;  %v594_v2 = vld [vmem:[%s848_s1 + $0x10] sm:$0xff]  }
   0x2   :  { %560 = vmatprep.subr.bf16.mxu0 %v592_v0  ;;  %584 = vmatprep.subr.bf16.mxu1 %v592_v0  ;;  %v596_v3 = vld [vmem:[%s849_s0] sm:$0xff]   ;;  %v595_v5 = vld [vmem:[%s848_s1 + $0x18] sm:$0xff]   ;;  %v598_v6 = vld [vmem:[%s849_s0 + $0x8] sm:$0xff]  }
   0x3   :  { %561 = vmatpush3.bf16.msra.mxu0 %v592_v0  ;;  %588 = vmatpush3.bf16.msra.mxu1 %v592_v0  ;;  %v597_v4 = vld [vmem:[%s849_s0 + $0x20] sm:$0xff]   ;;  %v599_v7 = vld [vmem:[%s849_s0 + $0x28] sm:$0xff]   ;;  %v600_v8 = vld [vmem:[%s849_s0 + $0x10] sm:$0xff]  }
   0x4   :  { %562 = vmatprep.subr.bf16.mxu0 %v593_v1  ;;  %585 = vmatprep.subr.bf16.mxu1 %v593_v1  ;;  %v601_v9 = vld [vmem:[%s849_s0 + $0x30] sm:$0xff]   ;;  %v602_v10 = vld [vmem:[%s849_s0 + $0x18] sm:$0xff]   ;;  %v681_v12 = vld [vmem:[%s850_s2] ss:$0 sm:$0xff] }
   0x5   :  { %568 = vmatprep.mubr.msk.bf16.mxu0 %vm108_vm0, %v596_v3  ;;  %576 = vmatprep.mubr.msk.bf16.mxu1 %vm108_vm0, %v597_v4  ;;  %v603_v11 = vld [vmem:[%s849_s0 + $0x38] sm:$0xff]   ;;  %v686_v14 = vld [vmem:[%s851_s3] ss:$0 sm:$0xff] }
   0x7   :  { %563 = vmatpush3.bf16.msra.mxu0 %v593_v1  ;;  %589 = vmatpush3.bf16.msra.mxu1 %v593_v1 }
   0x8   :  { %564 = vmatprep.subr.bf16.mxu0 %v594_v2  ;;  %586 = vmatprep.subr.bf16.mxu1 %v594_v2 }
   0xb   :  { %565 = vmatpush3.bf16.msra.mxu0 %v594_v2  ;;  %590 = vmatpush3.bf16.msra.mxu1 %v594_v2 }
   0xc   :  { %566 = vmatprep.subr.bf16.mxu0 %v595_v5  ;;  %587 = vmatprep.subr.bf16.mxu1 %v595_v5 }
   0xf   :  { %567 = vmatpush3.bf16.msra.mxu0 %v595_v5  ;;  %591 = vmatpush3.bf16.msra.mxu1 %v595_v5 }
  0x12   :  { %569 = vmatmul.mubr.msk.bf16.vlgmr.msra.gmra.mrb[0].mxu0 %vm108_vm0, %v598_v6  ;;  %577 = vmatmul.mubr.msk.bf16.vlgmr.msra.gmra.mrb[0].mxu1 %vm108_vm0, %v599_v7 }
  0x13   :  { %572 = vmatprep.mubr.msk.bf16.mxu0 %vm108_vm0, %v600_v8  ;;  %580 = vmatprep.mubr.msk.bf16.mxu1 %vm108_vm0, %v601_v9 }
  0x1a   :  { %573 = vmatmul.mubr.msk.bf16.gmra.mrb[4].mxu0 %vm108_vm0, %v602_v10  ;;  %581 = vmatmul.mubr.msk.bf16.gmra.mrb[4].mxu1 %vm108_vm0, %v603_v11 }
  0xe5   :  { %v570_v13 = vpop.f32.mrb[0].mxu0  ;;  %v578_v15 = vpop.f32.mrb[0].mxu1 }
  0xe6   :  { %v518_v16 = vpack.c.bf16 %v570_v13, %v570_v13  ;;  %v320_v17 = vmul.f32 %v570_v13, %v681_v12  ;;  %v526_v18 = vpack.c.bf16 %v578_v15, %v578_v15  ;;  %v328_v19 = vmul.f32 %v578_v15, %v681_v12  ;;  %v167_v20 = vpop.f32.mrb[1].mxu0  ;;  %v199_v21 = vpop.f32.mrb[1].mxu1 }
  0xe7   :  { %v516_v22 = vpack.c.bf16 %v167_v20, %v167_v20  ;;  %v318_v23 = vmul.f32 %v681_v12, %v167_v20  ;;  %v524_v24 = vpack.c.bf16 %v199_v21, %v199_v21  ;;  %v326_v25 = vmul.f32 %v681_v12, %v199_v21  ;;  %v571_v26 = vpop.f32.mrb[2].mxu0  ;;  %v579_v27 = vpop.f32.mrb[2].mxu1 }
  0xe8   :  { %297 = vst.msk [vmem:[%s852_s4 + $0x8] sm:$0xf] %vm294_vm1, %v518_v16  ;;  %v343_v28 = vadd.f32 %v686_v14, %v320_v17  ;;  %305 = vst.msk [vmem:[%s852_s4 + $0x28] sm:$0xf] %vm294_vm1, %v526_v18  ;;  %v351_v29 = vadd.f32 %v686_v14, %v328_v19  ;;  %v519_v30 = vpack.c.bf16 %v571_v26, %v571_v26  ;;  %v170_v32 = vpop.f32.mrb[3].mxu0  ;;  %v202_v33 = vpop.f32.mrb[3].mxu1 }
  0xe9   :  { %v321_v31 = vmul.f32 %v571_v26, %v681_v12  ;;  %295 = vst.msk [vmem:[%s852_s4] sm:$0xf] %vm294_vm1, %v516_v22  ;;  %v341_v34 = vadd.f32 %v686_v14, %v318_v23  ;;  %303 = vst.msk [vmem:[%s852_s4 + $0x20] sm:$0xf] %vm294_vm1, %v524_v24  ;;  %v349_v35 = vadd.f32 %v686_v14, %v326_v25 }
  0xea   :  { %v527_v36 = vpack.c.bf16 %v579_v27, %v579_v27  ;;  %v329_v37 = vmul.f32 %v579_v27, %v681_v12  ;;  %v359_v38 = vmax.f32 %v343_v28, 0.0  ;;  %v367_v39 = vmax.f32 %v351_v29, 0.0  ;;  %298 = vst.msk [vmem:[%s852_s4 + $0xc] sm:$0xf] %vm294_vm1, %v519_v30 }
  0xeb   :  { %v344_v40 = vadd.f32 %v686_v14, %v321_v31  ;;  %v517_v41 = vpack.c.bf16 %v170_v32, %v170_v32  ;;  %v357_v42 = vmax.f32 %v341_v34, 0.0  ;;  %v365_v43 = vmax.f32 %v349_v35, 0.0 }
  0xec   :  { %306 = vst.msk [vmem:[%s852_s4 + $0x2c] sm:$0xf] %vm294_vm1, %v527_v36  ;;  %v352_v44 = vadd.f32 %v686_v14, %v329_v37  ;;  %v319_v45 = vmul.f32 %v681_v12, %v170_v32  ;;  %v534_v46 = vpack.c.bf16 %v359_v38, %v359_v38  ;;  %v542_v47 = vpack.c.bf16 %v367_v39, %v367_v39 }
  0xed   :  { %v360_v48 = vmax.f32 %v344_v40, 0.0  ;;  %296 = vst.msk [vmem:[%s852_s4 + $0x4] sm:$0xf] %vm294_vm1, %v517_v41  ;;  %v525_v49 = vpack.c.bf16 %v202_v33, %v202_v33  ;;  %v532_v50 = vpack.c.bf16 %v357_v42, %v357_v42  ;;  %v540_v51 = vpack.c.bf16 %v365_v43, %v365_v43  ;;  %v574_v54 = vpop.f32.mrb[4].mxu0  ;;  %v582_v55 = vpop.f32.mrb[4].mxu1 }
  0xee   :  { %v368_v52 = vmax.f32 %v352_v44, 0.0  ;;  %v342_v53 = vadd.f32 %v686_v14, %v319_v45  ;;  %440 = vst.msk [vmem:[%s853_s5 + $0x8] sm:$0xf] %vm437_vm2, %v534_v46  ;;  %448 = vst.msk [vmem:[%s853_s5 + $0x28] sm:$0xf] %vm437_vm2, %v542_v47  ;;  %v327_v57 = vmul.f32 %v681_v12, %v202_v33  ;;  %v522_v58 = vpack.c.bf16 %v574_v54, %v574_v54  ;;  %v183_v60 = vpop.f32.mrb[5].mxu0 }
  0xef   :  { %v535_v56 = vpack.c.bf16 %v360_v48, %v360_v48  ;;  %304 = vst.msk [vmem:[%s852_s4 + $0x24] sm:$0xf] %vm294_vm1, %v525_v49  ;;  %v324_v59 = vmul.f32 %v574_v54, %v681_v12  ;;  %v215_v61 = vpop.f32.mrb[5].mxu1  ;;  %v530_v0 = vpack.c.bf16 %v582_v55, %v582_v55  ;;  %v332_v1 = vmul.f32 %v582_v55, %v681_v12  ;;  %v575_v2 = vpop.f32.mrb[6].mxu0 }
  0xf0   :  { %438 = vst.msk [vmem:[%s853_s5] sm:$0xf] %vm437_vm2, %v532_v50  ;;  %446 = vst.msk [vmem:[%s853_s5 + $0x20] sm:$0xf] %vm437_vm2, %v540_v51  ;;  %v543_v62 = vpack.c.bf16 %v368_v52, %v368_v52  ;;  %v358_v63 = vmax.f32 %v342_v53, 0.0  ;;  %v583_v3 = vpop.f32.mrb[6].mxu1  ;;  %v350_v4 = vadd.f32 %v686_v14, %v327_v57  ;;  %v520_v6 = vpack.c.bf16 %v183_v60, %v183_v60 }
  0xf1   :  { %441 = vst.msk [vmem:[%s853_s5 + $0xc] sm:$0xf] %vm437_vm2, %v535_v56  ;;  %v347_v5 = vadd.f32 %v686_v14, %v324_v59  ;;  %v322_v7 = vmul.f32 %v681_v12, %v183_v60  ;;  %v186_v8 = vpop.f32.mrb[7].mxu0  ;;  %v218_v9 = vpop.f32.mrb[7].mxu1  ;;  %v355_v11 = vadd.f32 %v686_v14, %v332_v1  ;;  %v528_v13 = vpack.c.bf16 %v215_v61, %v215_v61 }
  0xf2   :  { %301 = vst.msk [vmem:[%s852_s4 + $0x18] sm:$0xf] %vm294_vm1, %v522_v58  ;;  %v533_v10 = vpack.c.bf16 %v358_v63, %v358_v63  ;;  %309 = vst.msk [vmem:[%s852_s4 + $0x38] sm:$0xf] %vm294_vm1, %v530_v0  ;;  %v330_v15 = vmul.f32 %v681_v12, %v215_v61  ;;  %v366_v16 = vmax.f32 %v350_v4, 0.0  ;;  %v523_v19 = vpack.c.bf16 %v575_v2, %v575_v2 }
  0xf3   :  { %449 = vst.msk [vmem:[%s853_s5 + $0x2c] sm:$0xf] %vm437_vm2, %v543_v62  ;;  %v363_v17 = vmax.f32 %v347_v5, 0.0  ;;  %v345_v18 = vadd.f32 %v686_v14, %v322_v7  ;;  %v371_v20 = vmax.f32 %v355_v11, 0.0  ;;  %v325_v22 = vmul.f32 %v575_v2, %v681_v12 }
  0xf4   :  { %299 = vst.msk [vmem:[%s852_s4 + $0x10] sm:$0xf] %vm294_vm1, %v520_v6  ;;  %307 = vst.msk [vmem:[%s852_s4 + $0x30] sm:$0xf] %vm294_vm1, %v528_v13  ;;  %v353_v21 = vadd.f32 %v686_v14, %v330_v15  ;;  %v531_v23 = vpack.c.bf16 %v583_v3, %v583_v3  ;;  %v541_v24 = vpack.c.bf16 %v366_v16, %v366_v16 }
  0xf5   :  { %439 = vst.msk [vmem:[%s853_s5 + $0x4] sm:$0xf] %vm437_vm2, %v533_v10  ;;  %v538_v25 = vpack.c.bf16 %v363_v17, %v363_v17  ;;  %v361_v26 = vmax.f32 %v345_v18, 0.0  ;;  %v333_v27 = vmul.f32 %v583_v3, %v681_v12  ;;  %v546_v28 = vpack.c.bf16 %v371_v20, %v371_v20 }
  0xf6   :  { %302 = vst.msk [vmem:[%s852_s4 + $0x1c] sm:$0xf] %vm294_vm1, %v523_v19  ;;  %v369_v29 = vmax.f32 %v353_v21, 0.0  ;;  %v348_v30 = vadd.f32 %v686_v14, %v325_v22  ;;  %310 = vst.msk [vmem:[%s852_s4 + $0x3c] sm:$0xf] %vm294_vm1, %v531_v23  ;;  %v521_v31 = vpack.c.bf16 %v186_v8, %v186_v8  ;;  %v323_v34 = vmul.f32 %v681_v12, %v186_v8 }
  0xf7   :  { %447 = vst.msk [vmem:[%s853_s5 + $0x24] sm:$0xf] %vm437_vm2, %v541_v24  ;;  %444 = vst.msk [vmem:[%s853_s5 + $0x18] sm:$0xf] %vm437_vm2, %v538_v25  ;;  %v536_v32 = vpack.c.bf16 %v361_v26, %v361_v26  ;;  %v356_v33 = vadd.f32 %v686_v14, %v333_v27  ;;  %v529_v35 = vpack.c.bf16 %v218_v9, %v218_v9 }
  0xf8   :  { %452 = vst.msk [vmem:[%s853_s5 + $0x38] sm:$0xf] %vm437_vm2, %v546_v28  ;;  %v544_v36 = vpack.c.bf16 %v369_v29, %v369_v29  ;;  %v364_v37 = vmax.f32 %v348_v30, 0.0  ;;  %v331_v38 = vmul.f32 %v681_v12, %v218_v9  ;;  %v346_v40 = vadd.f32 %v686_v14, %v323_v34 }
  0xf9   :  { %300 = vst.msk [vmem:[%s852_s4 + $0x14] sm:$0xf] %vm294_vm1, %v521_v31  ;;  %v372_v39 = vmax.f32 %v356_v33, 0.0  ;;  %308 = vst.msk [vmem:[%s852_s4 + $0x34] sm:$0xf] %vm294_vm1, %v529_v35 }
  0xfa   :  { %442 = vst.msk [vmem:[%s853_s5 + $0x10] sm:$0xf] %vm437_vm2, %v536_v32  ;;  %450 = vst.msk [vmem:[%s853_s5 + $0x30] sm:$0xf] %vm437_vm2, %v544_v36  ;;  %v539_v41 = vpack.c.bf16 %v364_v37, %v364_v37  ;;  %v354_v12 = vadd.f32 %v686_v14, %v331_v38  ;;  %v362_v43 = vmax.f32 %v346_v40, 0.0 }
  0xfb   :  { %v547_v42 = vpack.c.bf16 %v372_v39, %v372_v39 }
  0xfc   :  { %445 = vst.msk [vmem:[%s853_s5 + $0x1c] sm:$0xf] %vm437_vm2, %v539_v41  ;;  %v370_v44 = vmax.f32 %v354_v12, 0.0  ;;  %v537_v45 = vpack.c.bf16 %v362_v43, %v362_v43 }
  0xfd   :  { %453 = vst.msk [vmem:[%s853_s5 + $0x3c] sm:$0xf] %vm437_vm2, %v547_v42 }
  0xfe   :  { %v545_v46 = vpack.c.bf16 %v370_v44, %v370_v44  ;;  %443 = vst.msk [vmem:[%s853_s5 + $0x14] sm:$0xf] %vm437_vm2, %v537_v45 }
 0x100   :  { %451 = vst.msk [vmem:[%s853_s5 + $0x34] sm:$0xf] %vm437_vm2, %v545_v46 }

// kernel: hsimsi_forward.15
= control target key start
LH: loop header
LB: loop body
LE: loop exit
PB: predicated region body
PF: predicated region fallthrough
CT: control target
= control target key end

     0   :  { %s1051_s15 = smov 0   ;;  %s1053_s16 = smov 0   ;;  %s1227_s0 = inlined_call_operand.vmem [shape: bf16[2,6,10,32], index: 0, kind: input, shape index: {}]   ;;  %s1228_s1 = inlined_call_operand.vmem [shape: bf16[3,96,32], index: 1, kind: input, shape index: {}]   ;;  %s1229_s2 = inlined_call_operand.vmem [shape: f32[1,32], index: 2, kind: input, shape index: {}]   ;;  %s1230_s3 = inlined_call_operand.vmem [shape: f32[1,32], index: 3, kind: input, shape index: {}]   ;;  %s1231_s4 = inlined_call_operand.vmem [shape: bf16[2,32,32], index: 4, kind: output, shape index: {}]  }
   0x1   :  { %s1055_s17 = smov 0   ;;  %s1057_s18 = smov 0  }
   0x2   :  { %s1059_s19 = smov 0  }
   0x3 LB: > { %s23_s20 = sadd.s32 1, %s1012_s17  ;;  %s26_s21 = sadd.s32 1, %s1016_s18  ;;  %s1020_s19 = sphi %s1059_s19, %s14_s19   ;;  %s1016_s18 = sphi %s1057_s18, %s1237_s18   ;;  %s1012_s17 = sphi %s1055_s17, %s1236_s17   ;;  %s1008_s16 = sphi %s1053_s16, %s1235_s16   ;;  %s1004_s15 = sphi %s1051_s15, %s1234_s15  }
   0x4   : > { %p24_p0 = scmp.ge.s32.totalorder %s23_s20, 2  ;;  %p758_p1 = scmp.ge.s32.totalorder %s1020_s19, 1 }
   0x5   : > { %p176_p2 = scmp.lt.s32.totalorder %s1020_s19, 5 }
   0x6   : > { %s1239_s20 = smov (%p24_p0, %s23_s20), 0  ;;  %s1241_s21 = smov (!%p24_p0, %s26_s21), %s1016_s18 }
   0x7   : > { %p177_p3 = pnand %p758_p1, %p176_p2  ;;  %p28_p4 = scmp.ge.s32.totalorder %s1241_s21, 2 }
   0x8   : > { %p206_p5 = scmp.lt.s32.totalorder (!%p177_p3), %s1008_s16, 1  ;;  %v963_v0 = vld [vmem:[%s1228_s1] sm:$0xff] (!%p177_p3)   ;;  %v1022_v1 = vmov (!%p177_p3), 0.0   ;;  %v964_v2 = vld [vmem:[%s1228_s1 + $0x8] sm:$0xff] (!%p177_p3)   ;;  %s834_s27 = sshll.u32 (!%p177_p3), %s1004_s15, 4  ;;  %v965_v3 = vld [vmem:[%s1228_s1 + $0x10] sm:$0xff] (!%p177_p3)  }
   0x9   : > { %s1243_s21 = smov (%p28_p4, %s1241_s21), 0  ;;  %180 = sbr.rel (%p177_p3) target bundleno = 394 (0x18a), region = 36 }
   0xa   : > { %874 = vmatprep.subr.bf16.mxu0 (!%p177_p3), %v1022_v1  ;;  %858 = vmatprep.subr.bf16.mxu1 (!%p177_p3), %v1022_v1  ;;  %v969_v4 = vld [vmem:[%s1228_s1 + $0x30] sm:$0xff] (!%p177_p3)   ;;  %vm1023_vm0 = vmmov (!%p177_p3), 0   ;;  %v966_v11 = vld [vmem:[%s1228_s1 + $0x18] sm:$0xff] (!%p177_p3)   ;;  %s1024_s12 = smov (!%p177_p3), 64   ;;  %s1025_s13 = smov (!%p177_p3), 32   ;;  %v973_v15 = vld [vmem:[%s1228_s1 + $0x40] sm:$0xff] (!%p177_p3)  }
   0xb   : > { %875 = vmatpush3.bf16.msra.mxu0 (!%p177_p3), %v963_v0  ;;  %886 = vmatprep.mubr.msk.bf16.mxu0 (!%p177_p3), %vm1023_vm0, %v1022_v1  ;;  %v971_v13 = vld [vmem:[%s1228_s1 + $0x38] sm:$0xff] (!%p177_p3)   ;;  %v968_v16 = vld [vmem:[%s1228_s1 + $0x20] sm:$0xff] (!%p177_p3)   ;;  %v975_v20 = vld [vmem:[%s1228_s1 + $0x48] sm:$0xff] (!%p177_p3)   ;;  %vm251_vm1 = vcmask (!%p177_p3), 261120   ;;  %vm258_vm2 = vcmask (!%p177_p3), 523264   ;;  %vm400_vm3 = vcmask (!%p177_p3), 785408  }
   0xc   : > { %876 = vmatprep.subr.bf16.mxu0 (!%p177_p3), %v1022_v1  ;;  %859 = vmatpush3.bf16.msra.mxu1 (!%p177_p3), %v969_v4  ;;  %v970_v21 = vld [vmem:[%s1228_s1 + $0x28] sm:$0xff] (!%p177_p3)   ;;  %v977_v23 = vld [vmem:[%s1228_s1 + $0x50] sm:$0xff] (!%p177_p3)   ;;  %v979_v24 = vld [vmem:[%s1228_s1 + $0x58] sm:$0xff] (!%p177_p3)   ;;  %vm317_vm4 = vsmask.f32 (!%p177_p3), 3328  ;;  %vm530_vm7 = vcmask (!%p177_p3), 1042432  }
   0xd   : > { %870 = vmatprep.mubr.msk.bf16.mxu1 (!%p177_p3), %vm1023_vm0, %v1022_v1  ;;  %860 = vmatprep.subr.bf16.mxu1 (!%p177_p3), %v1022_v1  ;;  %v972_v36 = vld [vmem:[%s1228_s1 + $0x60] sm:$0xff] (!%p177_p3)   ;;  %v974_v42 = vld [vmem:[%s1228_s1 + $0x68] sm:$0xff] (!%p177_p3)   ;;  %v976_v50 = vld [vmem:[%s1228_s1 + $0x70] sm:$0xff] (!%p177_p3)   ;;  %vm318_vm5 = vsmask.f32 (!%p177_p3), 7440  ;;  %vm531_vm8 = vcmask (!%p177_p3), 1046532  }
   0xe   : > { %v978_v59 = vld [vmem:[%s1228_s1 + $0x78] sm:$0xff] (!%p177_p3)   ;;  %vm1183_vm6 = vmor (!%p177_p3), %vm317_vm4, %vm318_vm5  ;;  %s760_s28 = sshll.u32 (!%p177_p3), %s1004_s15, 1  ;;  %vm665_vm10 = vcmask (!%p177_p3), 257024  }
   0xf   : > { %877 = vmatpush3.bf16.msra.mxu0 (!%p177_p3), %v964_v2  ;;  %vm532_vm9 = vmor (!%p177_p3), %vm530_vm7, %vm531_vm8  ;;  %p214_p6 = scmp.lt.s32.totalorder (!%p177_p3), %s760_s28, 3 }
  0x10   : > { %s1245_s16 = smov (!%p206_p5, %s1008_s16), 1  ;;  %878 = vmatprep.subr.bf16.mxu0 %v1022_v1  ;;  %861 = vmatpush3.bf16.msra.mxu1 %v971_v13 }
  0x11   : > { %s912_s26 = smul.u32 48, %s1245_s16  ;;  %862 = vmatprep.subr.bf16.mxu1 %v1022_v1  ;;  %s1247_s28 = smov (!%p214_p6, %s760_s28), 3 }
  0x12   : > { %s761_s29 = sshll.u32 %s1245_s16, 2 }
  0x13   : > { %s210_s6 = scalar_lea.vmem %s1227_s0, %s912_s26  ;;  %879 = vmatpush3.bf16.msra.mxu0 %v965_v3  ;;  %s217_s30 = sadd.s32 %s761_s29, %s1247_s28 }
  0x14   : > { %s1105_s9 = scalar_lea.vmem %s210_s6, %s834_s27  ;;  %880 = vmatprep.subr.bf16.mxu0 %v1022_v1  ;;  %863 = vmatpush3.bf16.msra.mxu1 %v973_v15  ;;  %v981_v15 = vld [vmem:[%s1228_s1 + $0x88] sm:$0xff]   ;;  %s762_s15 = sshll.u32 %s217_s30, 2 }
  0x15   : > { %v230_v5 = vld [vmem:[%s1105_s9 + $0x10] sm:$0xf]  ;;  %v228_v6 = vld [vmem:[%s1105_s9 + $0x8] sm:$0xf]  ;;  %v232_v9 = vld [vmem:[%s1105_s9 + $0x18] sm:$0xf]  ;;  %864 = vmatprep.subr.bf16.mxu1 %v1022_v1  ;;  %s219_s11 = scalar_lea.vmem %s1231_s4, %s762_s15 }
  0x16   : > { %v767_v7 = vcombine.low %v230_v5, %v230_v5  ;;  %v766_v8 = vcombine.low %v228_v6, %v228_v6  ;;  %v231_v10 = vld [vmem:[%s1105_s9 + $0x14] sm:$0x1]  ;;  %v768_v12 = vcombine.low %v232_v9, %v232_v9  ;;  %v229_v14 = vld [vmem:[%s1105_s9 + $0xc] sm:$0x1]  ;;  %v233_v19 = vld [vmem:[%s1105_s9 + $0x1c] sm:$0x1] }
  0x17   : > { %881 = vmatpush3.bf16.msra.mxu0 %v966_v11  ;;  %v771_v17 = vcombine.low %v230_v5, %v231_v10  ;;  %v770_v18 = vcombine.low %v228_v6, %v229_v14  ;;  %v772_v22 = vcombine.low %v232_v9, %v233_v19  ;;  %v226_v27 = vld [vmem:[%s1105_s9] sm:$0xf]  ;;  %v227_v28 = vld [vmem:[%s1105_s9 + $0x4] sm:$0x1] }
  0x18   : > { %247 = vrot.lane.b32.xlu1 %v767_v7, %s1024_s12  ;;  %240 = vrot.lane.b32.xlu0 %v766_v8, %s1025_s13  ;;  %v769_v34 = vcombine.low %v226_v27, %v227_v28  ;;  %v980_v5 = vld [vmem:[%s1228_s1 + $0x80] sm:$0xff]  }
  0x19   : > { %882 = vmatprep.subr.bf16.mxu0 %v1022_v1  ;;  %865 = vmatpush3.bf16.msra.mxu1 %v975_v20 }
  0x1a   : > { %866 = vmatprep.subr.bf16.mxu1 %v1022_v1 }
  0x1b   : > { %883 = vmatpush3.bf16.msra.mxu0 %v968_v16 }
  0x1c   : > { %249 = vrot.lane.b32.xlu1 %v768_v12, %s1024_s12  ;;  %242 = vrot.lane.b32.xlu0 %v767_v7, %s1025_s13 }
  0x1d   : > { %884 = vmatprep.subr.bf16.mxu0 %v1022_v1  ;;  %867 = vmatpush3.bf16.msra.mxu1 %v977_v23 }
  0x1e   : > { %868 = vmatprep.subr.bf16.mxu1 %v1022_v1 }
  0x1f   : > { %885 = vmatpush3.bf16.msra.mxu0 %v970_v21 }
  0x20   : > { %288 = vrot.lane.b32.xlu1 %v771_v17, %s1025_s13  ;;  %286 = vrot.lane.b32.xlu0 %v770_v18, %s1025_s13 }
  0x21   : > { %890 = vmatprep.subr.bf16.mxu0 %v1022_v1  ;;  %869 = vmatpush3.bf16.msra.mxu1 %v979_v24 }
  0x24   : > { %295 = vrot.lane.b32.xlu1 %v772_v22, %s1024_s12  ;;  %293 = vrot.lane.b32.xlu0 %v771_v17, %s1024_s12 }
  0x8a   : > { %v248_v25 = vpop.permute.xlu1 %247  ;;  %v241_v26 = vpop.permute.xlu0 %240 }
  0x8b   : > { %v254_v29 = vsel %vm251_vm1, %v226_v27, %v241_v26  ;;  %v828_v26 = vld [vmem:[%s1230_s3] ss:$0 sm:$0xff] }
  0x8c   : > { %v260_v33 = vsel %vm258_vm2, %v254_v29, %v248_v25 }
  0x8e   : > { %v250_v30 = vpop.permute.xlu1 %249  ;;  %v243_v31 = vpop.permute.xlu0 %242 }
  0x8f   : > { %v257_v32 = vsel %vm251_vm1, %v228_v6, %v243_v31 }
  0x90   : > { %v262_v35 = vsel %vm258_vm2, %v257_v32, %v250_v30 }
  0x91   : > { %v797_v37 = vcombine.low %v260_v33, %v262_v35 }
  0x92   : > { %v289_v38 = vpop.permute.xlu1 %288  ;;  %v287_v39 = vpop.permute.xlu0 %286 }
  0x93   : > { %887 = vmatmul.mubr.msk.bf16.vlgmr.msra.gmra.mrb[0].mxu0 %vm400_vm3, %v797_v37  ;;  %v302_v40 = vsel %vm251_vm1, %v770_v18, %v289_v38  ;;  %v299_v41 = vsel %vm251_vm1, %v769_v34, %v287_v39 }
  0x94   : > { %891 = vmatpush3.bf16.msra.mxu0 %v972_v36  ;;  %902 = vmatprep.mubr.msk.bf16.mxu0 %vm1023_vm0, %v1022_v1 }
  0x95   : > { %892 = vmatprep.subr.bf16.mxu0 %v1022_v1 }
  0x96   : > { %v296_v43 = vpop.permute.xlu1 %295  ;;  %v294_v44 = vpop.permute.xlu0 %293 }
  0x97   : > { %v306_v45 = vsel %vm258_vm2, %v302_v40, %v296_v43  ;;  %v304_v46 = vsel %vm258_vm2, %v299_v41, %v294_v44 }
  0x98   : > { %v775_v47 = vcombine.low %v306_v45, %v306_v45  ;;  %v776_v48 = vcombine.high %v306_v45, %v306_v45  ;;  %v773_v49 = vcombine.low %v304_v46, %v304_v46  ;;  %893 = vmatpush3.bf16.msra.mxu0 %v974_v42  ;;  %v774_v51 = vcombine.high %v304_v46, %v304_v46 }
  0x99   : > { %894 = vmatprep.subr.bf16.mxu0 %v1022_v1 }
  0x9a   : > { %v335_v52 = vshrl.u32 %v775_v47, 16  ;;  %v338_v53 = vshll.u32 %v775_v47, 16  ;;  %v321_v54 = vshrl.u32 %v773_v49, 16  ;;  %v324_v55 = vshll.u32 %v773_v49, 16 }
  0x9b   : > { %v344_v58 = vshll.u32 %v776_v48, 16  ;;  %v330_v62 = vshll.u32 %v774_v51, 16  ;;  %v806_v6 = vrot.slane %v775_v47, 9  ;;  %v539_v9 = vrot.slane %v776_v48, 5 }
  0x9c   : > { %v337_v56 = vrot.slane %v335_v52, 4  ;;  %v340_v57 = vrot.slane %v338_v53, 5  ;;  %895 = vmatpush3.bf16.msra.mxu0 %v976_v50  ;;  %v323_v60 = vrot.slane %v321_v54, 4  ;;  %v326_v61 = vrot.slane %v324_v55, 5 }
  0x9d   : > { %896 = vmatprep.subr.bf16.mxu0 %v1022_v1  ;;  %v346_v4 = vrot.slane %v344_v58, 5  ;;  %v332_v8 = vrot.slane %v330_v62, 5  ;;  %v805_v10 = vrot.slane %v773_v49, 9  ;;  %v535_v11 = vrot.slane %v774_v51, 5 }
  0x9e   : > { %v341_v63 = vor.u32 %v340_v57, %v337_v56  ;;  %v327_v0 = vor.u32 %v326_v61, %v323_v60  ;;  %v540_v16 = vsel %vm532_vm9, %v806_v6, %v539_v9 }
  0x9f   : > { %v536_v17 = vsel %vm532_vm9, %v805_v10, %v535_v11 }
  0xa0   : > { %v342_v3 = vrot.slane %v341_v63, 4  ;;  %897 = vmatpush3.bf16.msra.mxu0 %v978_v59  ;;  %v328_v7 = vrot.slane %v327_v0, 4  ;;  %v819_v18 = vcombine.low %v536_v17, %v540_v16 }
  0xa1   : > { %898 = vmatprep.subr.bf16.mxu0 %v1022_v1 }
  0xa2   : > { %v347_v12 = vsel %vm1183_vm6, %v342_v3, %v346_v4  ;;  %v333_v13 = vsel %vm1183_vm6, %v328_v7, %v332_v8 }
  0xa3   : > { %v789_v14 = vcombine.low %v333_v13, %v347_v12 }
  0xa4   : > { %899 = vmatpush3.bf16.msra.mxu0 %v980_v5 }
  0xa5   : > { %900 = vmatprep.subr.bf16.mxu0 %v1022_v1  ;;  %871 = vmatmul.mubr.msk.bf16.vlgmr.msra.gmra.mrb[0].mxu1 %vm400_vm3, %v789_v14  ;;  %v827_v1 = vld [vmem:[%s1229_s2] ss:$0 sm:$0xff] }
  0xa8   : > { %901 = vmatpush3.bf16.msra.mxu0 %v981_v15 }
  0xab   : > { %903 = vmatmul.mubr.msk.bf16.vlgmr.msra.gmra.mrb[0].mxu0 %vm400_vm3, %v819_v18 }
 0x178   : > { %v438_v19 = vpop.f32.mrb[0].mxu1 }
 0x179   : > { %v872_v20 = vpop.f32.mrb[1].mxu1 }
 0x17a   : > { %v441_v21 = vpop.f32.mrb[2].mxu1 }
 0x17b   : > { %v873_v22 = vpop.f32.mrb[3].mxu1 }
 0x17e   : > { %v630_v23 = vpop.f32.mrb[0].mxu0 }
 0x17f   : > { %v906_v24 = vadd.f32 %v630_v23, %v438_v19  ;;  %v904_v25 = vpop.f32.mrb[1].mxu0 }
 0x180   : > { %v633_v27 = vpop.f32.mrb[2].mxu0 }
 0x181   : > { %v646_v28 = vmul.f32 %v906_v24, %v827_v1  ;;  %v907_v29 = vadd.f32 %v633_v27, %v441_v21  ;;  %v905_v30 = vpop.f32.mrb[3].mxu0 }
 0x183   : > { %v655_v31 = vadd.f32 %v828_v26, %v646_v28  ;;  %v647_v32 = vmul.f32 %v907_v29, %v827_v1 }
 0x185   : > { %v835_v33 = vpack.c.bf16 %v655_v31, %v655_v31  ;;  %v656_v34 = vadd.f32 %v828_v26, %v647_v32 }
 0x187   : > { %666 = vst.msk [vmem:[%s219_s11] sm:$0xf] %vm665_vm10, %v835_v33  ;;  %v836_v35 = vpack.c.bf16 %v656_v34, %v656_v34 }
 0x189   : > { %667 = vst.msk [vmem:[%s219_s11 + $0x4] sm:$0xf] %vm665_vm10, %v836_v35 }
 0x18a PF: > { %s14_s19 = sadd.s32 1, %s1020_s19   ;;  %s1234_s15 = smov %s1012_s17 }
 0x18b   : > { %p11_p7 = scmp.ge.s32.totalorder %s14_s19, 6   ;;  %s1235_s16 = smov %s1016_s18 }
 0x18c   : > { %s1236_s17 = smov %s1239_s20  ;;  %s1237_s18 = smov %s1243_s21 }
 0x18d   :  { %13 = sbr.rel (!%p11_p7) target bundleno = 3 (0x3), region = 69 }

// kernel: hsimsi_forward.19
= control target key start
LH: loop header
LB: loop body
LE: loop exit
PB: predicated region body
PF: predicated region fallthrough
CT: control target
= control target key end

     0   :  { %vm57_vm0 = vcmask 261120   ;;  %v509_v39 = vmov 0.0   ;;  %s676_s0 = inlined_call_operand.vmem [shape: bf16[2,64,32], index: 0, kind: input, shape index: {}]   ;;  %s677_s1 = inlined_call_operand.vmem [shape: bf16[2,64,32], index: 1, kind: input, shape index: {}]   ;;  %s678_s2 = inlined_call_operand.vmem [shape: bf16[64,32], index: 2, kind: input, shape index: {}]   ;;  %s679_s3 = inlined_call_operand.vmem [shape: f32[1,32], index: 3, kind: input, shape index: {}]   ;;  %s680_s4 = inlined_call_operand.vmem [shape: bf16[32,16], index: 4, kind: input, shape index: {}]   ;;  %s681_s5 = inlined_call_operand.vmem [shape: f32[1,16], index: 5, kind: input, shape index: {}]   ;;  %s682_s6 = inlined_call_operand.hbm [shape: f32[2,16], index: 6, kind: output, shape index: {}]  }
   0x1   :  { %v402_v0 = vld [vmem:[%s677_s1] sm:$0xff]   ;;  %v440_v1 = vld [vmem:[%s677_s1 + $0x8] sm:$0xff]   ;;  %v441_v5 = vld [vmem:[%s677_s1 + $0x10] sm:$0xff]   ;;  %455 = vmatprep.subr.bf16.mxu0 %v509_v39  ;;  %467 = vmatprep.subr.bf16.mxu1 %v509_v39 }
   0x2   :  { %v403_v2 = vunpack.c.l.bf16 %v402_v0  ;;  %v404_v3 = vunpack.c.h.bf16 %v402_v0  ;;  %v407_v4 = vunpack.c.l.bf16 %v440_v1  ;;  %v443_v6 = vld [vmem:[%s677_s1 + $0x20] sm:$0xff]   ;;  %v444_v7 = vld [vmem:[%s677_s1 + $0x28] sm:$0xff]   ;;  %v445_v8 = vld [vmem:[%s677_s1 + $0x30] sm:$0xff]   ;;  %v408_v9 = vunpack.c.h.bf16 %v440_v1 }
   0x3   :  { %v442_v10 = vld [vmem:[%s677_s1 + $0x18] sm:$0xff]   ;;  %v419_v11 = vunpack.c.l.bf16 %v443_v6  ;;  %v420_v12 = vunpack.c.h.bf16 %v443_v6  ;;  %v423_v13 = vunpack.c.l.bf16 %v444_v7  ;;  %v411_v14 = vunpack.c.l.bf16 %v441_v5  ;;  %v479_v27 = vld [vmem:[%s678_s2] sm:$0xff]   ;;  %v480_v36 = vld [vmem:[%s678_s2 + $0x8] sm:$0xff]  }
   0x4   :  { %v412_v15 = vunpack.c.h.bf16 %v441_v5  ;;  %v424_v16 = vunpack.c.h.bf16 %v444_v7  ;;  %v427_v17 = vunpack.c.l.bf16 %v445_v8  ;;  %v135_v18 = vsel %vm57_vm0, %v403_v2, 0.0  ;;  %v446_v29 = vld [vmem:[%s677_s1 + $0x38] sm:$0xff]   ;;  %456 = vmatpush3.bf16.msra.mxu0 %v479_v27 }
   0x5   :  { %v136_v19 = vsel %vm57_vm0, %v404_v3, 0.0  ;;  %v138_v20 = vsel %vm57_vm0, %v407_v4, 0.0  ;;  %v415_v21 = vunpack.c.l.bf16 %v442_v10  ;;  %v140_v23 = vsel %vm57_vm0, %v408_v9, 0.0  ;;  %457 = vmatprep.subr.bf16.mxu0 %v509_v39 }
   0x6   :  { %v137_v22 = vadd.f32 %v136_v19, %v135_v18  ;;  %v156_v24 = vsel %vm57_vm0, %v419_v11, 0.0  ;;  %v157_v25 = vsel %vm57_vm0, %v420_v12, 0.0  ;;  %v159_v26 = vsel %vm57_vm0, %v423_v13, 0.0 }
   0x7   :  { %v428_v28 = vunpack.c.h.bf16 %v445_v8  ;;  %v142_v31 = vsel %vm57_vm0, %v411_v14, 0.0  ;;  %v158_v32 = vadd.f32 %v157_v25, %v156_v24  ;;  %v144_v33 = vsel %vm57_vm0, %v412_v15, 0.0 }
   0x8   :  { %v139_v30 = vadd.f32 %v138_v20, %v137_v22  ;;  %v161_v34 = vsel %vm57_vm0, %v424_v16, 0.0  ;;  %v163_v35 = vsel %vm57_vm0, %v427_v17, 0.0  ;;  %v416_v40 = vunpack.c.h.bf16 %v442_v10 }
   0x9   :  { %v160_v38 = vadd.f32 %v159_v26, %v158_v32  ;;  %v431_v41 = vunpack.c.l.bf16 %v446_v29 }
   0xa   :  { %v141_v37 = vadd.f32 %v140_v23, %v139_v30 }
   0xb   :  { %v162_v43 = vadd.f32 %v161_v34, %v160_v38 }
   0xc   :  { %v143_v42 = vadd.f32 %v142_v31, %v141_v37 }
   0xd   :  { %11 = vsyncpa [#allocation3], 0  ;;  %v432_v44 = vunpack.c.h.bf16 %v446_v29  ;;  %v146_v45 = vsel %vm57_vm0, %v415_v21, 0.0  ;;  %v165_v46 = vsel %vm57_vm0, %v428_v28, 0.0  ;;  %v164_v48 = vadd.f32 %v163_v35, %v162_v43  ;;  %458 = vmatpush3.bf16.msra.mxu0 %v480_v36  ;;  %v481_v51 = vld [vmem:[%s678_s2 + $0x10] sm:$0xff]   ;;  %v482_v61 = vld [vmem:[%s678_s2 + $0x18] sm:$0xff]  }
   0xe   :  { %v145_v47 = vadd.f32 %v144_v33, %v143_v42  ;;  %v148_v49 = vsel %vm57_vm0, %v416_v40, 0.0  ;;  %v167_v50 = vsel %vm57_vm0, %v431_v41, 0.0  ;;  %459 = vmatprep.subr.bf16.mxu0 %v509_v39  ;;  %vm510_vm1 = vmmov 0   ;;  %s511_s2 = smov 32   ;;  %v370_v10 = vld [vmem:[%s676_s0] sm:$0xff]   ;;  %v433_v14 = vld [vmem:[%s676_s0 + $0x8] sm:$0xff]  }
   0xf   :  { %v166_v53 = vadd.f32 %v165_v46, %v164_v48  ;;  %v169_v54 = vsel %vm57_vm0, %v432_v44, 0.0  ;;  %463 = vmatprep.mubr.msk.bf16.mxu0 %vm510_vm1, %v509_v39  ;;  %471 = vmatprep.mubr.msk.bf16.mxu1 %vm510_vm1, %v509_v39  ;;  %vm181_vm2 = vcmask 1041409   ;;  %v436_v11 = vld [vmem:[%s676_s0 + $0x20] sm:$0xff]   ;;  %v371_v12 = vunpack.c.l.bf16 %v370_v10  ;;  %v437_v17 = vld [vmem:[%s676_s0 + $0x28] sm:$0xff]   ;;  %v434_v30 = vld [vmem:[%s676_s0 + $0x10] sm:$0xff]   ;;  %s512_s18 = smov [#allocation2]  }
  0x10   :  { %v147_v52 = vadd.f32 %v146_v45, %v145_v47  ;;  %v372_v13 = vunpack.c.h.bf16 %v370_v10  ;;  %v387_v15 = vunpack.c.l.bf16 %v436_v11  ;;  %v388_v16 = vunpack.c.h.bf16 %v436_v11  ;;  %v438_v31 = vld [vmem:[%s676_s0 + $0x30] sm:$0xff]   ;;  %v435_v45 = vld [vmem:[%s676_s0 + $0x18] sm:$0xff]  }
  0x11   :  { %v168_v56 = vadd.f32 %v167_v50, %v166_v53  ;;  %460 = vmatpush3.bf16.msra.mxu0 %v481_v51  ;;  %v375_v18 = vunpack.c.l.bf16 %v433_v14  ;;  %v391_v19 = vunpack.c.l.bf16 %v437_v17  ;;  %v58_v20 = vsel %vm57_vm0, %v371_v12, 0.0  ;;  %v439_v46 = vld [vmem:[%s676_s0 + $0x38] sm:$0xff]  }
  0x12   :  { %v149_v55 = vadd.f32 %v148_v49, %v147_v52  ;;  %461 = vmatprep.subr.bf16.mxu0 %v509_v39  ;;  %v59_v21 = vsel %vm57_vm0, %v372_v13, 0.0  ;;  %v79_v22 = vsel %vm57_vm0, %v387_v15, 0.0  ;;  %v80_v23 = vsel %vm57_vm0, %v388_v16, 0.0 }
  0x13   :  { %v170_v58 = vadd.f32 %v169_v54, %v168_v56  ;;  %v60_v24 = vadd.f32 %v59_v21, %v58_v20  ;;  %v81_v25 = vadd.f32 %v80_v23, %v79_v22  ;;  %v376_v26 = vunpack.c.h.bf16 %v433_v14  ;;  %v484_v20 = vld [vmem:[%s680_s4 + $0x8] sm:$0xff]   ;;  %v359_v21 = vld [vmem:[%s679_s3] ss:$0 sm:$0xff] }
  0x14   :  { %v150_v57 = vrot.slane %v149_v55, 4  ;;  %v392_v27 = vunpack.c.h.bf16 %v437_v17  ;;  %v61_v28 = vsel %vm57_vm0, %v375_v18, 0.0  ;;  %v82_v29 = vsel %vm57_vm0, %v391_v19, 0.0  ;;  %v483_v19 = vld [vmem:[%s680_s4] sm:$0xff]   ;;  %s351_s4 = sshll.u32 %s512_s18, 4  ;;  %s352_s4 = int_to_ptr.vmem [resolvable:$true] %s351_s4 }
  0x15   :  { %v171_v60 = vrot.slane %v170_v58, 4  ;;  %462 = vmatpush3.bf16.msra.mxu0 %v482_v61  ;;  %v62_v32 = vadd.f32 %v61_v28, %v60_v24  ;;  %v83_v33 = vadd.f32 %v82_v29, %v81_v25  ;;  %v379_v34 = vunpack.c.l.bf16 %v434_v30  ;;  %468 = vmatpush3.bf16.msra.mxu1 %v483_v19  ;;  %s485_s3 = scalar_lea.vmem %s352_s4, 32  ;;  %p490_p1 = scmp.lt.s32.totalorder %s352_s4, %s352_s4 }
  0x16   :  { %v151_v59 = vadd.f32 %v150_v57, %v149_v55  ;;  %v395_v35 = vunpack.c.l.bf16 %v438_v31  ;;  %v63_v36 = vsel %vm57_vm0, %v376_v26, 0.0  ;;  %v84_v37 = vsel %vm57_vm0, %v392_v27, 0.0  ;;  %469 = vmatprep.subr.bf16.mxu1 %v509_v39  ;;  %v365_v39 = vld [vmem:[%s681_s5] ss:$0 sm:$0xff]  ;;  %p486_p0 = scmp.ne.s32.totalorder %s352_s4, %s485_s3  ;;  %p491_p2 = scmp.lt.s32.totalorder %s485_s3, %s485_s3 }
  0x17   :  { %v172_v63 = vadd.f32 %v171_v60, %v170_v58  ;;  %v64_v38 = vadd.f32 %v63_v36, %v62_v32  ;;  %v85_v40 = vadd.f32 %v84_v37, %v83_v33  ;;  %v380_v41 = vunpack.c.h.bf16 %v434_v30 }
  0x18   :  { %v152_v62 = vrot.slane %v151_v59, 2  ;;  %v396_v42 = vunpack.c.h.bf16 %v438_v31  ;;  %v65_v43 = vsel %vm57_vm0, %v379_v34, 0.0  ;;  %v86_v44 = vsel %vm57_vm0, %v395_v35, 0.0  ;;  %p492_p3 = por %p491_p2, %p490_p1 }
  0x19   :  { %v173_v1 = vrot.slane %v172_v63, 2  ;;  %v66_v47 = vadd.f32 %v65_v43, %v64_v38  ;;  %v87_v48 = vadd.f32 %v86_v44, %v85_v40  ;;  %v383_v49 = vunpack.c.l.bf16 %v435_v45  ;;  %470 = vmatpush3.bf16.msra.mxu1 %v484_v20 }
  0x1a   :  { %v153_v0 = vadd.f32 %v152_v62, %v151_v59  ;;  %v399_v50 = vunpack.c.l.bf16 %v439_v46  ;;  %v67_v51 = vsel %vm57_vm0, %v380_v41, 0.0  ;;  %v88_v52 = vsel %vm57_vm0, %v396_v42, 0.0  ;;  %p493_p4 = pnand %p492_p3, %p486_p0 }
  0x1b   :  { %v174_v3 = vadd.f32 %v173_v1, %v172_v63  ;;  %v68_v53 = vadd.f32 %v67_v51, %v66_v47  ;;  %v89_v54 = vadd.f32 %v88_v52, %v87_v48  ;;  %v384_v55 = vunpack.c.h.bf16 %v435_v45 }
  0x1c   :  { %v154_v2 = vrot.slane %v153_v0, 1  ;;  %v400_v56 = vunpack.c.h.bf16 %v439_v46  ;;  %v69_v57 = vsel %vm57_vm0, %v383_v49, 0.0  ;;  %v90_v58 = vsel %vm57_vm0, %v399_v50, 0.0 }
  0x1d   :  { %v175_v5 = vrot.slane %v174_v3, 1  ;;  %v70_v59 = vadd.f32 %v69_v57, %v68_v53  ;;  %v91_v60 = vadd.f32 %v90_v58, %v89_v54  ;;  %v71_v61 = vsel %vm57_vm0, %v384_v55, 0.0 }
  0x1e   :  { %v155_v4 = vadd.f32 %v154_v2, %v153_v0  ;;  %v92_v62 = vsel %vm57_vm0, %v400_v56, 0.0  ;;  %vm231_vm3 = vcmask 523264   ;;  %vm343_vm4 = vcmask 123904  }
  0x1f   :  { %v176_v6 = vadd.f32 %v175_v5, %v174_v3  ;;  %v72_v63 = vadd.f32 %v71_v61, %v70_v59  ;;  %v93_v0 = vadd.f32 %v92_v62, %v91_v60 }
  0x20   :  { %v177_v7 = vmul.f32 0.015625, %v155_v4 }
  0x21   :  { %v178_v8 = vmul.f32 0.015625, %v176_v6  ;;  %v73_v1 = vrot.slane %v72_v63, 4  ;;  %v94_v2 = vrot.slane %v93_v0, 4 }
  0x23   :  { %v186_v9 = vsel %vm181_vm2, %v178_v8, %v177_v7  ;;  %v74_v3 = vadd.f32 %v73_v1, %v72_v63  ;;  %v95_v4 = vadd.f32 %v94_v2, %v93_v0 }
  0x24   :  { %187 = vrot.lane.b32.xlu0 %v186_v9, %s511_s2 }
  0x25   :  { %v75_v5 = vrot.slane %v74_v3, 2  ;;  %v96_v6 = vrot.slane %v95_v4, 2 }
  0x27   :  { %v76_v7 = vadd.f32 %v75_v5, %v74_v3  ;;  %v97_v8 = vadd.f32 %v96_v6, %v95_v4 }
  0x29   :  { %v77_v9 = vrot.slane %v76_v7, 1  ;;  %v98_v10 = vrot.slane %v97_v8, 1 }
  0x2b   :  { %v78_v11 = vadd.f32 %v77_v9, %v76_v7  ;;  %v99_v12 = vadd.f32 %v98_v10, %v97_v8 }
  0x2d   :  { %v101_v13 = vmul.f32 0.015625, %v78_v11  ;;  %v102_v14 = vmul.f32 0.015625, %v99_v12 }
  0x2f   :  { %v182_v15 = vsel %vm181_vm2, %v102_v14, %v101_v13 }
  0x96   :  { %v188_v16 = vpop.permute.xlu0 %187 }
  0x97   :  { %v190_v17 = vsel %vm57_vm0, %v182_v15, %v188_v16 }
  0x98   :  { %v191_v18 = vpack.c.bf16 %v190_v17, %v190_v17 }
  0x9a   :  { %464 = vmatmul.mubr.msk.bf16.vlgmr.msra.gmra.mrb[0].mxu0 %vm231_vm3, %v191_v18 }
 0x16d   :  { %v269_v22 = vpop.f32.mrb[0].mxu0 }
 0x16e   :  { %v270_v23 = vadd.f32 %v359_v21, %v269_v22  ;;  %v465_v24 = vpop.f32.mrb[1].mxu0 }
 0x16f   :  { %v272_v25 = vpop.f32.mrb[2].mxu0 }
 0x170   :  { %v275_v26 = vmax.f32 %v270_v23, 0.0  ;;  %v466_v27 = vpop.f32.mrb[3].mxu0 }
 0x172   :  { %v276_v28 = vpack.c.bf16 %v275_v26, %v275_v26 }
 0x174   :  { %472 = vmatmul.mubr.msk.bf16.vlgmr.msra.gmra.mrb[0].mxu1 %vm57_vm0, %v276_v28 }
 0x247   :  { %v337_v29 = vpop.f32.mrb[0].mxu1 }
 0x248   :  { %v338_v30 = vadd.f32 %v365_v39, %v337_v29  ;;  %v473_v31 = vpop.f32.mrb[1].mxu1 }
 0x249   :  { %v340_v32 = vpop.f32.mrb[2].mxu1 }
 0x24a   :  { %v474_v33 = vpop.f32.mrb[3].mxu1  ;;  %344 = vst.msk [vmem:[#allocation2] sm:$0x3] %vm343_vm4, %v338_v30 }
 0x24b   :  { %496 = shalt.err (!%p493_p4)
}
 0x24c   :  { %s497_s5 = scalar_lea.hbm %s682_s6, 32 }
 0x24d   :  { %p498_p5 = scmp.ne.s32.totalorder %s682_s6, %s497_s5  ;;  %p501_p6 = scmp.lt.u32.totalorder %s497_s5, %s682_s6 }
 0x24f   :  { %p503_p7 = pnand %p501_p6, %p498_p5 }
 0x251   :  { %506 = shalt.err (!%p503_p7)
}
 0x252   :  { %354 = dma.vmem_to_hbm [thread:$0]  %s352_s4, 32, %s682_s6, [#allocation3]  }
 0x253   :  { %507 = dma.done.wait [#allocation3], 32  }
 0x254   :  { %508 = vsyncadd [#allocation3], 4294967264 }
 0x255   :  { %358 = vsyncpa [#allocation3], 1 }

// kernel: hsimsi_forward.17
= control target key start
LH: loop header
LB: loop body
LE: loop exit
PB: predicated region body
PF: predicated region fallthrough
CT: control target
= control target key end

     0   :  { %s1234_s15 = smov 0   ;;  %s1236_s16 = smov 0   ;;  %s1465_s0 = inlined_call_operand.vmem [shape: bf16[2,10,10,32], index: 0, kind: input, shape index: {}]   ;;  %s1466_s1 = inlined_call_operand.vmem [shape: bf16[3,96,32], index: 1, kind: input, shape index: {}]   ;;  %s1467_s2 = inlined_call_operand.vmem [shape: f32[1,32], index: 2, kind: input, shape index: {}]   ;;  %s1468_s3 = inlined_call_operand.vmem [shape: f32[1,32], index: 3, kind: input, shape index: {}]   ;;  %s1469_s4 = inlined_call_operand.vmem [shape: bf16[2,64,32], index: 4, kind: output, shape index: {}]  }
   0x1   :  { %s1238_s17 = smov 0   ;;  %s1240_s18 = smov 0  }
   0x2   :  { %s1242_s19 = smov 0  }
   0x3 LB: > { %s23_s20 = sadd.s32 1, %s1197_s17  ;;  %s26_s21 = sadd.s32 1, %s1201_s18  ;;  %s1205_s19 = sphi %s1242_s19, %s14_s19   ;;  %s1201_s18 = sphi %s1240_s18, %s1477_s18   ;;  %s1197_s17 = sphi %s1238_s17, %s1476_s17   ;;  %s1193_s16 = sphi %s1236_s16, %s1475_s16   ;;  %s1189_s15 = sphi %s1234_s15, %s1474_s15  }
   0x4   : > { %p24_p0 = scmp.ge.s32.totalorder %s23_s20, 2  ;;  %p916_p1 = scmp.ge.s32.totalorder %s1205_s19, 1 }
   0x5   : > { %p176_p2 = scmp.lt.s32.totalorder %s1205_s19, 5 }
   0x6   : > { %s1479_s20 = smov (%p24_p0, %s23_s20), 0  ;;  %s1481_s21 = smov (!%p24_p0, %s26_s21), %s1201_s18 }
   0x7   : > { %p177_p3 = pnand %p916_p1, %p176_p2  ;;  %p28_p4 = scmp.ge.s32.totalorder %s1481_s21, 2 }
   0x8   : > { %p206_p5 = scmp.lt.s32.totalorder (!%p177_p3), %s1193_s16, 1  ;;  %v1148_v0 = vld [vmem:[%s1466_s1] sm:$0xff] (!%p177_p3)   ;;  %v1149_v1 = vld [vmem:[%s1466_s1 + $0x8] sm:$0xff] (!%p177_p3)   ;;  %s1010_s27 = sshll.u32 (!%p177_p3), %s1189_s15, 5  ;;  %v1150_v2 = vld [vmem:[%s1466_s1 + $0x10] sm:$0xff] (!%p177_p3)   ;;  %vm269_vm0 = vcmask (!%p177_p3), 261120  }
   0x9   : > { %s1483_s21 = smov (%p28_p4, %s1481_s21), 0  ;;  %180 = sbr.rel (%p177_p3) target bundleno = 408 (0x198), region = 36 }
   0xa   : > { %1055 = vmatprep.subr.bf16.mxu0 (!%p177_p3), %v1148_v0  ;;  %v1152_v9 = vld [vmem:[%s1466_s1 + $0x18] sm:$0xff] (!%p177_p3)   ;;  %s1207_s10 = smov (!%p177_p3), 32   ;;  %v1153_v12 = vld [vmem:[%s1466_s1 + $0x20] sm:$0xff] (!%p177_p3)   ;;  %v1156_v14 = vld [vmem:[%s1466_s1 + $0x30] sm:$0xff] (!%p177_p3)   ;;  %vm282_vm1 = vcmask (!%p177_p3), 523264   ;;  %vm493_vm2 = vcmask (!%p177_p3), 785408  }
   0xb   : > { %1056 = vmatpush3.bf16.msra.mxu0 (!%p177_p3), %v1148_v0  ;;  %v1154_v15 = vld [vmem:[%s1466_s1 + $0x28] sm:$0xff] (!%p177_p3)   ;;  %1039 = vmatprep.subr.bf16.mxu1 (!%p177_p3), %v1156_v14  ;;  %v1158_v18 = vld [vmem:[%s1466_s1 + $0x38] sm:$0xff] (!%p177_p3)   ;;  %v1155_v20 = vld [vmem:[%s1466_s1 + $0x60] sm:$0xff] (!%p177_p3)   ;;  %vm650_vm3 = vcmask (!%p177_p3), 1042432   ;;  %vm651_vm4 = vcmask (!%p177_p3), 1046532   ;;  %s918_s28 = sshll.u32 (!%p177_p3), %s1189_s15, 2 }
   0xc   : > { %1057 = vmatprep.subr.bf16.mxu0 (!%p177_p3), %v1149_v1  ;;  %1040 = vmatpush3.bf16.msra.mxu1 (!%p177_p3), %v1156_v14  ;;  %v1160_v25 = vld [vmem:[%s1466_s1 + $0x40] sm:$0xff] (!%p177_p3)   ;;  %v1162_v29 = vld [vmem:[%s1466_s1 + $0x48] sm:$0xff] (!%p177_p3)   ;;  %v1164_v31 = vld [vmem:[%s1466_s1 + $0x50] sm:$0xff] (!%p177_p3)   ;;  %vm379_vm5 = vsmask.f32 (!%p177_p3), 3328  ;;  %p214_p6 = scmp.lt.s32.totalorder (!%p177_p3), %s918_s28, 7 }
   0xd   : > { %1041 = vmatprep.subr.bf16.mxu1 (!%p177_p3), %v1158_v18  ;;  %v1166_v32 = vld [vmem:[%s1466_s1 + $0x58] sm:$0xff] (!%p177_p3)   ;;  %v1157_v52 = vld [vmem:[%s1466_s1 + $0x68] sm:$0xff] (!%p177_p3)   ;;  %v1159_v56 = vld [vmem:[%s1466_s1 + $0x70] sm:$0xff] (!%p177_p3)   ;;  %vm380_vm7 = vsmask.f32 (!%p177_p3), 7440  ;;  %vm821_vm9 = vcmask (!%p177_p3), 257024  }
   0xe   : > { %v1161_v60 = vld [vmem:[%s1466_s1 + $0x78] sm:$0xff] (!%p177_p3)   ;;  %vm1407_vm6 = vmor (!%p177_p3), %vm650_vm3, %vm651_vm4 }
   0xf   : > { %1058 = vmatpush3.bf16.msra.mxu0 (!%p177_p3), %v1149_v1  ;;  %vm1419_vm8 = vmor (!%p177_p3), %vm379_vm5, %vm380_vm7 }
  0x10   : > { %s1485_s16 = smov (!%p206_p5, %s1193_s16), 1  ;;  %1059 = vmatprep.subr.bf16.mxu0 %v1150_v2  ;;  %1042 = vmatpush3.bf16.msra.mxu1 %v1158_v18  ;;  %s1487_s28 = smov (!%p214_p6, %s918_s28), 7 }
  0x11   : > { %s1095_s26 = smul.u32 80, %s1485_s16  ;;  %1043 = vmatprep.subr.bf16.mxu1 %v1160_v25  ;;  %s919_s29 = sshll.u32 %s1485_s16, 3 }
  0x12   : > { %s217_s30 = sadd.s32 %s919_s29, %s1487_s28 }
  0x13   : > { %s210_s6 = scalar_lea.vmem %s1465_s0, %s1095_s26  ;;  %1060 = vmatpush3.bf16.msra.mxu0 %v1150_v2  ;;  %s1208_s26 = smov 64  }
  0x14   : > { %s1282_s7 = scalar_lea.vmem %s210_s6, %s1010_s27  ;;  %1061 = vmatprep.subr.bf16.mxu0 %v1152_v9  ;;  %1044 = vmatpush3.bf16.msra.mxu1 %v1160_v25  ;;  %s920_s15 = sshll.u32 %s217_s30, 2 }
  0x15   : > { %v1285_v3 = vld [vmem:[%s1282_s7 + $0x18] sm:$0xf]  ;;  %v1288_v4 = vld [vmem:[%s1282_s7 + $0x8] sm:$0xf]  ;;  %v234_v5 = vld [vmem:[%s1282_s7 + $0x20] sm:$0xf]  ;;  %1045 = vmatprep.subr.bf16.mxu1 %v1162_v29  ;;  %s219_s11 = scalar_lea.vmem %s1469_s4, %s920_s15 }
  0x16   : > { %v926_v6 = vcombine.low %v1285_v3, %v1285_v3  ;;  %v924_v7 = vcombine.low %v1288_v4, %v1288_v4  ;;  %v1296_v8 = vld [vmem:[%s1282_s7 + $0x10] sm:$0xf]  ;;  %v927_v10 = vcombine.low %v234_v5, %v234_v5  ;;  %v236_v13 = vld [vmem:[%s1282_s7 + $0x28] sm:$0xf]  ;;  %v231_v16 = vld [vmem:[%s1282_s7 + $0x14] sm:$0x1] }
  0x17   : > { %v925_v11 = vcombine.low %v1296_v8, %v1296_v8  ;;  %1062 = vmatpush3.bf16.msra.mxu0 %v1152_v9  ;;  %v229_v17 = vld [vmem:[%s1282_s7 + $0xc] sm:$0x1]  ;;  %v928_v19 = vcombine.low %v236_v13, %v236_v13  ;;  %v1330_v21 = vcombine.low %v1296_v8, %v231_v16  ;;  %v235_v23 = vld [vmem:[%s1282_s7 + $0x24] sm:$0x1]  ;;  %v233_v24 = vld [vmem:[%s1282_s7 + $0x1c] sm:$0x1] }
  0x18   : > { %254 = vrot.lane.b32.xlu1 %v926_v6, %s1207_s10  ;;  %250 = vrot.lane.b32.xlu0 %v924_v7, %s1207_s10  ;;  %v1333_v22 = vcombine.low %v1288_v4, %v229_v17  ;;  %v933_v26 = vcombine.low %v234_v5, %v235_v23  ;;  %v1345_v27 = vcombine.low %v1285_v3, %v233_v24  ;;  %v237_v28 = vld [vmem:[%s1282_s7 + $0x2c] sm:$0x1]  ;;  %v226_v37 = vld [vmem:[%s1282_s7] sm:$0xf] }
  0x19   : > { %1063 = vmatprep.subr.bf16.mxu0 %v1153_v12  ;;  %v934_v30 = vcombine.low %v236_v13, %v237_v28  ;;  %1046 = vmatpush3.bf16.msra.mxu1 %v1162_v29  ;;  %v227_v55 = vld [vmem:[%s1282_s7 + $0x4] sm:$0x1]  ;;  %v1165_v23 = vld [vmem:[%s1466_s1 + $0x88] sm:$0xff]  }
  0x1a   : > { %1047 = vmatprep.subr.bf16.mxu1 %v1164_v31  ;;  %v929_v57 = vcombine.low %v226_v37, %v227_v55  ;;  %v1163_v7 = vld [vmem:[%s1466_s1 + $0x80] sm:$0xff]  }
  0x1b   : > { %1064 = vmatpush3.bf16.msra.mxu0 %v1153_v12 }
  0x1c   : > { %256 = vrot.lane.b32.xlu1 %v927_v10, %s1207_s10  ;;  %252 = vrot.lane.b32.xlu0 %v925_v11, %s1207_s10 }
  0x1d   : > { %1065 = vmatprep.subr.bf16.mxu0 %v1154_v15  ;;  %1048 = vmatpush3.bf16.msra.mxu1 %v1164_v31 }
  0x1e   : > { %1049 = vmatprep.subr.bf16.mxu1 %v1166_v32 }
  0x1f   : > { %1066 = vmatpush3.bf16.msra.mxu0 %v1154_v15 }
  0x20   : > { %263 = vrot.lane.b32.xlu1 %v926_v6, %s1208_s26  ;;  %261 = vrot.lane.b32.xlu0 %v925_v11, %s1208_s26 }
  0x21   : > { %1071 = vmatprep.subr.bf16.mxu0 %v1155_v20  ;;  %1050 = vmatpush3.bf16.msra.mxu1 %v1166_v32 }
  0x24   : > { %267 = vrot.lane.b32.xlu1 %v928_v19, %s1208_s26  ;;  %265 = vrot.lane.b32.xlu0 %v927_v10, %s1208_s26 }
  0x28   : > { %322 = vrot.lane.b32.xlu1 %v1330_v21, %s1207_s10  ;;  %320 = vrot.lane.b32.xlu0 %v1333_v22, %s1207_s10 }
  0x2c   : > { %326 = vrot.lane.b32.xlu1 %v933_v26, %s1207_s10  ;;  %324 = vrot.lane.b32.xlu0 %v1345_v27, %s1207_s10 }
  0x30   : > { %333 = vrot.lane.b32.xlu1 %v1345_v27, %s1208_s26  ;;  %331 = vrot.lane.b32.xlu0 %v1330_v21, %s1208_s26 }
  0x34   : > { %337 = vrot.lane.b32.xlu1 %v934_v30, %s1208_s26  ;;  %335 = vrot.lane.b32.xlu0 %v933_v26, %s1208_s26 }
  0x8a   : > { %v255_v33 = vpop.permute.xlu1 %254  ;;  %v251_v34 = vpop.permute.xlu0 %250 }
  0x8b   : > { %v272_v38 = vsel %vm269_vm0, %v226_v37, %v251_v34  ;;  %v278_v45 = vsel %vm269_vm0, %v1296_v8, %v255_v33 }
  0x8e   : > { %v257_v35 = vpop.permute.xlu1 %256  ;;  %v253_v36 = vpop.permute.xlu0 %252 }
  0x8f   : > { %v275_v39 = vsel %vm269_vm0, %v1288_v4, %v253_v36  ;;  %v281_v46 = vsel %vm269_vm0, %v1285_v3, %v257_v35 }
  0x92   : > { %v264_v40 = vpop.permute.xlu1 %263  ;;  %v262_v41 = vpop.permute.xlu0 %261 }
  0x93   : > { %v286_v42 = vsel %vm282_vm1, %v275_v39, %v264_v40  ;;  %v284_v43 = vsel %vm282_vm1, %v272_v38, %v262_v41 }
  0x94   : > { %v965_v44 = vcombine.low %v284_v43, %v286_v42 }
  0x96   : > { %v268_v47 = vpop.permute.xlu1 %267  ;;  %v266_v48 = vpop.permute.xlu0 %265  ;;  %1067 = vmatprep.mubr.msk.bf16.mxu0 %vm493_vm2, %v965_v44 }
  0x97   : > { %v290_v49 = vsel %vm282_vm1, %v281_v46, %v268_v47  ;;  %v288_v50 = vsel %vm282_vm1, %v278_v45, %v266_v48 }
  0x98   : > { %v966_v51 = vcombine.low %v288_v50, %v290_v49 }
  0x9a   : > { %v323_v53 = vpop.permute.xlu1 %322  ;;  %v321_v54 = vpop.permute.xlu0 %320  ;;  %1068 = vmatmul.mubr.msk.bf16.vlgmr.msra.gmra.mrb[0].mxu0 %vm493_vm2, %v966_v51 }
  0x9b   : > { %1072 = vmatpush3.bf16.msra.mxu0 %v1155_v20  ;;  %v344_v61 = vsel %vm269_vm0, %v1333_v22, %v323_v53  ;;  %v341_v62 = vsel %vm269_vm0, %v929_v57, %v321_v54 }
  0x9c   : > { %1073 = vmatprep.subr.bf16.mxu0 %v1157_v52 }
  0x9e   : > { %v327_v58 = vpop.permute.xlu1 %326  ;;  %v325_v59 = vpop.permute.xlu0 %324 }
  0x9f   : > { %1074 = vmatpush3.bf16.msra.mxu0 %v1157_v52  ;;  %v350_v8 = vsel %vm269_vm0, %v1345_v27, %v327_v58  ;;  %v347_v24 = vsel %vm269_vm0, %v1330_v21, %v325_v59 }
  0xa0   : > { %1075 = vmatprep.subr.bf16.mxu0 %v1159_v56 }
  0xa2   : > { %v334_v63 = vpop.permute.xlu1 %333  ;;  %v332_v0 = vpop.permute.xlu0 %331 }
  0xa3   : > { %v354_v1 = vsel %vm282_vm1, %v344_v61, %v334_v63  ;;  %v352_v2 = vsel %vm282_vm1, %v341_v62, %v332_v0  ;;  %1076 = vmatpush3.bf16.msra.mxu0 %v1159_v56 }
  0xa4   : > { %v937_v3 = vcombine.low %v354_v1, %v354_v1  ;;  %v938_v4 = vcombine.high %v354_v1, %v354_v1  ;;  %v935_v5 = vcombine.low %v352_v2, %v352_v2  ;;  %v936_v6 = vcombine.high %v352_v2, %v352_v2  ;;  %1077 = vmatprep.subr.bf16.mxu0 %v1161_v60 }
  0xa6   : > { %v397_v9 = vshrl.u32 %v937_v3, 16  ;;  %v400_v10 = vshll.u32 %v937_v3, 16  ;;  %v406_v11 = vshll.u32 %v938_v4, 16  ;;  %v976_v12 = vrot.slane %v937_v3, 9  ;;  %v338_v16 = vpop.permute.xlu1 %337  ;;  %v336_v17 = vpop.permute.xlu0 %335 }
  0xa7   : > { %v659_v13 = vrot.slane %v938_v4, 5  ;;  %v383_v14 = vshrl.u32 %v935_v5, 16  ;;  %v386_v15 = vshll.u32 %v935_v5, 16  ;;  %1078 = vmatpush3.bf16.msra.mxu0 %v1161_v60  ;;  %v392_v20 = vshll.u32 %v936_v6, 16 }
  0xa8   : > { %v399_v18 = vrot.slane %v397_v9, 4  ;;  %v402_v19 = vrot.slane %v400_v10, 5  ;;  %v975_v22 = vrot.slane %v935_v5, 9  ;;  %1079 = vmatprep.subr.bf16.mxu0 %v1163_v7  ;;  %v655_v27 = vrot.slane %v936_v6, 5 }
  0xa9   : > { %v385_v25 = vrot.slane %v383_v14, 4  ;;  %v388_v26 = vrot.slane %v386_v15, 5  ;;  %v358_v29 = vsel %vm282_vm1, %v350_v8, %v338_v16  ;;  %v356_v30 = vsel %vm282_vm1, %v347_v24, %v336_v17  ;;  %v1001_v14 = vld [vmem:[%s1467_s2] ss:$0 sm:$0xff] }
  0xaa   : > { %v403_v31 = vor.u32 %v402_v19, %v399_v18  ;;  %v408_v32 = vrot.slane %v406_v11, 5  ;;  %v941_v33 = vcombine.low %v358_v29, %v358_v29  ;;  %v942_v34 = vcombine.high %v358_v29, %v358_v29  ;;  %v1002_v17 = vld [vmem:[%s1468_s3] ss:$0 sm:$0xff] }
  0xab   : > { %v939_v35 = vcombine.low %v356_v30, %v356_v30  ;;  %1080 = vmatpush3.bf16.msra.mxu0 %v1163_v7  ;;  %v394_v21 = vrot.slane %v392_v20, 5  ;;  %v940_v36 = vcombine.high %v356_v30, %v356_v30  ;;  %v656_v37 = vsel %vm1407_vm6, %v975_v22, %v655_v27 }
  0xac   : > { %v660_v38 = vsel %vm1407_vm6, %v976_v12, %v659_v13  ;;  %1081 = vmatprep.subr.bf16.mxu0 %v1165_v23  ;;  %v425_v39 = vshrl.u32 %v941_v33, 16  ;;  %v428_v40 = vshll.u32 %v941_v33, 16  ;;  %v978_v41 = vrot.slane %v941_v33, 9 }
  0xad   : > { %v389_v42 = vor.u32 %v388_v26, %v385_v25  ;;  %v667_v43 = vrot.slane %v942_v34, 5  ;;  %v411_v44 = vshrl.u32 %v939_v35, 16  ;;  %v414_v45 = vshll.u32 %v939_v35, 16 }
  0xae   : > { %v404_v46 = vrot.slane %v403_v31, 4  ;;  %v427_v47 = vrot.slane %v425_v39, 4  ;;  %v430_v48 = vrot.slane %v428_v40, 5  ;;  %v434_v49 = vshll.u32 %v942_v34, 16 }
  0xaf   : > { %v977_v50 = vrot.slane %v939_v35, 9  ;;  %1082 = vmatpush3.bf16.msra.mxu0 %v1165_v23  ;;  %v668_v52 = vsel %vm1407_vm6, %v978_v41, %v667_v43  ;;  %v413_v53 = vrot.slane %v411_v44, 4  ;;  %v416_v54 = vrot.slane %v414_v45, 5 }
  0xb0   : > { %v420_v55 = vshll.u32 %v940_v36, 16  ;;  %v431_v56 = vor.u32 %v430_v48, %v427_v47  ;;  %v663_v57 = vrot.slane %v940_v36, 5  ;;  %v991_v58 = vcombine.low %v656_v37, %v660_v38 }
  0xb1   : > { %v390_v59 = vrot.slane %v389_v42, 4  ;;  %v417_v60 = vor.u32 %v416_v54, %v413_v53  ;;  %v409_v61 = vsel %vm1419_vm8, %v404_v46, %v408_v32  ;;  %v436_v63 = vrot.slane %v434_v49, 5 }
  0xb2   : > { %v432_v62 = vrot.slane %v431_v56, 4  ;;  %v664_v0 = vsel %vm1407_vm6, %v977_v50, %v663_v57  ;;  %1083 = vmatprep.mubr.msk.bf16.mxu0 %vm493_vm2, %v991_v58  ;;  %v422_v3 = vrot.slane %v420_v55, 5 }
  0xb3   : > { %v395_v1 = vsel %vm1419_vm8, %v390_v59, %v394_v21  ;;  %v418_v2 = vrot.slane %v417_v60, 4  ;;  %v992_v4 = vcombine.low %v664_v0, %v668_v52 }
  0xb4   : > { %v955_v5 = vcombine.low %v395_v1, %v409_v61  ;;  %v437_v6 = vsel %vm1419_vm8, %v432_v62, %v436_v63 }
  0xb5   : > { %1084 = vmatmul.mubr.msk.bf16.vlgmr.msra.gmra.mrb[0].mxu0 %vm493_vm2, %v992_v4  ;;  %v423_v7 = vsel %vm1419_vm8, %v418_v2, %v422_v3 }
  0xb6   : > { %1051 = vmatprep.mubr.msk.bf16.mxu1 %vm493_vm2, %v955_v5  ;;  %v956_v8 = vcombine.low %v423_v7, %v437_v6 }
  0xb8   : > { %1052 = vmatmul.mubr.msk.bf16.vlgmr.msra.gmra.mrb[0].mxu1 %vm493_vm2, %v956_v8 }
 0x188   : > { %v1085_v9 = vpop.f32.mrb[0].mxu0 }
 0x189   : > { %v764_v10 = vpop.f32.mrb[1].mxu0 }
 0x18a   : > { %v1086_v11 = vpop.f32.mrb[2].mxu0 }
 0x18b   : > { %v767_v12 = vpop.f32.mrb[3].mxu0  ;;  %v1053_v13 = vpop.f32.mrb[0].mxu1 }
 0x18c   : > { %v1087_v15 = vadd.f32 %v1085_v9, %v1053_v13  ;;  %v534_v16 = vpop.f32.mrb[1].mxu1 }
 0x18d   : > { %v1088_v18 = vadd.f32 %v764_v10, %v534_v16  ;;  %v1054_v19 = vpop.f32.mrb[2].mxu1 }
 0x18e   : > { %v792_v20 = vmul.f32 %v1087_v15, %v1001_v14  ;;  %v1089_v22 = vadd.f32 %v1086_v11, %v1054_v19  ;;  %v537_v23 = vpop.f32.mrb[3].mxu1 }
 0x18f   : > { %v790_v24 = vmul.f32 %v1088_v18, %v1001_v14  ;;  %v1090_v25 = vadd.f32 %v767_v12, %v537_v23 }
 0x190   : > { %v803_v26 = vadd.f32 %v1002_v17, %v792_v20  ;;  %v793_v27 = vmul.f32 %v1089_v22, %v1001_v14 }
 0x191   : > { %v801_v28 = vadd.f32 %v1002_v17, %v790_v24  ;;  %v791_v29 = vmul.f32 %v1090_v25, %v1001_v14 }
 0x192   : > { %v1013_v30 = vpack.c.bf16 %v803_v26, %v803_v26  ;;  %v804_v31 = vadd.f32 %v1002_v17, %v793_v27 }
 0x193   : > { %v1011_v32 = vpack.c.bf16 %v801_v28, %v801_v28  ;;  %v802_v33 = vadd.f32 %v1002_v17, %v791_v29 }
 0x194   : > { %824 = vst.msk [vmem:[%s219_s11 + $0x8] sm:$0xf] %vm821_vm9, %v1013_v30  ;;  %v1014_v34 = vpack.c.bf16 %v804_v31, %v804_v31 }
 0x195   : > { %822 = vst.msk [vmem:[%s219_s11] sm:$0xf] %vm821_vm9, %v1011_v32  ;;  %v1012_v35 = vpack.c.bf16 %v802_v33, %v802_v33 }
 0x196   : > { %825 = vst.msk [vmem:[%s219_s11 + $0xc] sm:$0xf] %vm821_vm9, %v1014_v34 }
 0x197   : > { %823 = vst.msk [vmem:[%s219_s11 + $0x4] sm:$0xf] %vm821_vm9, %v1012_v35 }
 0x198 PF: > { %s14_s19 = sadd.s32 1, %s1205_s19   ;;  %s1474_s15 = smov %s1197_s17 }
 0x199   : > { %p11_p7 = scmp.ge.s32.totalorder %s14_s19, 6   ;;  %s1475_s16 = smov %s1201_s18 }
 0x19a   : > { %s1476_s17 = smov %s1479_s20  ;;  %s1477_s18 = smov %s1483_s21 }
 0x19b   :  { %13 = sbr.rel (!%p11_p7) target bundleno = 3 (0x3), region = 69 }

// kernel: hsimsi_forward.16
= control target key start
LH: loop header
LB: loop body
LE: loop exit
PB: predicated region body
PF: predicated region fallthrough
CT: control target
= control target key end

     0   :  { %s1388_s18 = smov 0   ;;  %s1390_s19 = smov 0   ;;  %s1629_s0 = inlined_call_operand.vmem [shape: bf16[2,10,10,32], index: 0, kind: input, shape index: {}]   ;;  %s1630_s1 = inlined_call_operand.vmem [shape: bf16[3,96,32], index: 1, kind: input, shape index: {}]   ;;  %s1631_s2 = inlined_call_operand.vmem [shape: f32[1,32], index: 2, kind: input, shape index: {}]   ;;  %s1632_s3 = inlined_call_operand.vmem [shape: f32[1,32], index: 3, kind: input, shape index: {}]   ;;  %s1633_s4 = inlined_call_operand.vmem [shape: bf16[2,64,32], index: 4, kind: input, shape index: {}]   ;;  %s1634_s5 = inlined_call_operand.vmem [shape: bf16[2,64,32], index: 5, kind: output, shape index: {}]  }
   0x1   :  { %s1392_s20 = smov 0   ;;  %s1394_s21 = smov 0  }
   0x2   :  { %s1396_s22 = smov 0  }
   0x3 LB: > { %s24_s23 = sadd.s32 1, %s1346_s20  ;;  %s27_s24 = sadd.s32 1, %s1350_s21  ;;  %s1354_s22 = sphi %s1396_s22, %s15_s22   ;;  %s1350_s21 = sphi %s1394_s21, %s1642_s21   ;;  %s1346_s20 = sphi %s1392_s20, %s1641_s20   ;;  %s1342_s19 = sphi %s1390_s19, %s1640_s19   ;;  %s1338_s18 = sphi %s1388_s18, %s1639_s18  }
   0x4   : > { %p25_p0 = scmp.ge.s32.totalorder %s24_s23, 2  ;;  %p1033_p1 = scmp.ge.s32.totalorder %s1354_s22, 1 }
   0x5   : > { %p218_p2 = scmp.lt.s32.totalorder %s1354_s22, 5 }
   0x6   : > { %s1644_s23 = smov (%p25_p0, %s24_s23), 0  ;;  %s1646_s24 = smov (!%p25_p0, %s27_s24), %s1350_s21 }
   0x7   : > { %p219_p3 = pnand %p1033_p1, %p218_p2  ;;  %p29_p4 = scmp.ge.s32.totalorder %s1646_s24, 2 }
   0x8   : > { %p259_p5 = scmp.lt.s32.totalorder (!%p219_p3), %s1342_s19, 1  ;;  %v1281_v0 = vld [vmem:[%s1630_s1] sm:$0xff] (!%p219_p3)   ;;  %v1282_v1 = vld [vmem:[%s1630_s1 + $0x8] sm:$0xff] (!%p219_p3)   ;;  %s1134_s30 = sshll.u32 (!%p219_p3), %s1338_s18, 5  ;;  %v1283_v2 = vld [vmem:[%s1630_s1 + $0x10] sm:$0xff] (!%p219_p3)   ;;  %vm332_vm0 = vcmask (!%p219_p3), 261120  }
   0x9   : > { %s1648_s24 = smov (%p29_p4, %s1646_s24), 0  ;;  %222 = sbr.rel (%p219_p3) target bundleno = 410 (0x19a), region = 40 }
   0xa   : > { %1188 = vmatprep.subr.bf16.mxu0 (!%p219_p3), %v1281_v0  ;;  %v1285_v9 = vld [vmem:[%s1630_s1 + $0x18] sm:$0xff] (!%p219_p3)   ;;  %s1356_s14 = smov (!%p219_p3), 32   ;;  %v1286_v12 = vld [vmem:[%s1630_s1 + $0x20] sm:$0xff] (!%p219_p3)   ;;  %v1289_v14 = vld [vmem:[%s1630_s1 + $0x30] sm:$0xff] (!%p219_p3)   ;;  %vm345_vm1 = vcmask (!%p219_p3), 523264   ;;  %vm556_vm2 = vcmask (!%p219_p3), 785408  }
   0xb   : > { %1189 = vmatpush3.bf16.msra.mxu0 (!%p219_p3), %v1281_v0  ;;  %v1287_v15 = vld [vmem:[%s1630_s1 + $0x28] sm:$0xff] (!%p219_p3)   ;;  %1172 = vmatprep.subr.bf16.mxu1 (!%p219_p3), %v1289_v14  ;;  %v1291_v18 = vld [vmem:[%s1630_s1 + $0x38] sm:$0xff] (!%p219_p3)   ;;  %v1288_v20 = vld [vmem:[%s1630_s1 + $0x60] sm:$0xff] (!%p219_p3)   ;;  %vm713_vm3 = vcmask (!%p219_p3), 1042432   ;;  %vm714_vm4 = vcmask (!%p219_p3), 1046532   ;;  %s1035_s8 = sshll.u32 (!%p219_p3), %s1338_s18, 2 }
   0xc   : > { %1190 = vmatprep.subr.bf16.mxu0 (!%p219_p3), %v1282_v1  ;;  %1173 = vmatpush3.bf16.msra.mxu1 (!%p219_p3), %v1289_v14  ;;  %v1293_v25 = vld [vmem:[%s1630_s1 + $0x40] sm:$0xff] (!%p219_p3)   ;;  %v1295_v29 = vld [vmem:[%s1630_s1 + $0x48] sm:$0xff] (!%p219_p3)   ;;  %v1297_v31 = vld [vmem:[%s1630_s1 + $0x50] sm:$0xff] (!%p219_p3)   ;;  %vm442_vm5 = vsmask.f32 (!%p219_p3), 3328  ;;  %p267_p6 = scmp.lt.s32.totalorder (!%p219_p3), %s1035_s8, 7 }
   0xd   : > { %1174 = vmatprep.subr.bf16.mxu1 (!%p219_p3), %v1291_v18  ;;  %v1299_v32 = vld [vmem:[%s1630_s1 + $0x58] sm:$0xff] (!%p219_p3)   ;;  %v1290_v52 = vld [vmem:[%s1630_s1 + $0x68] sm:$0xff] (!%p219_p3)   ;;  %v1292_v56 = vld [vmem:[%s1630_s1 + $0x70] sm:$0xff] (!%p219_p3)   ;;  %vm443_vm7 = vsmask.f32 (!%p219_p3), 7440  ;;  %vm920_vm9 = vcmask (!%p219_p3), 257024  }
   0xe   : > { %v1294_v60 = vld [vmem:[%s1630_s1 + $0x78] sm:$0xff] (!%p219_p3)   ;;  %vm1561_vm6 = vmor (!%p219_p3), %vm713_vm3, %vm714_vm4 }
   0xf   : > { %1191 = vmatpush3.bf16.msra.mxu0 (!%p219_p3), %v1282_v1  ;;  %vm1573_vm8 = vmor (!%p219_p3), %vm442_vm5, %vm443_vm7 }
  0x10   : > { %s1650_s19 = smov (!%p259_p5, %s1342_s19), 1  ;;  %1192 = vmatprep.subr.bf16.mxu0 %v1283_v2  ;;  %1175 = vmatpush3.bf16.msra.mxu1 %v1291_v18  ;;  %s1652_s8 = smov (!%p267_p6, %s1035_s8), 7 }
  0x11   : > { %s1228_s29 = smul.u32 80, %s1650_s19  ;;  %1176 = vmatprep.subr.bf16.mxu1 %v1293_v25  ;;  %s1036_s9 = sshll.u32 %s1650_s19, 3 }
  0x13   : > { %s263_s10 = scalar_lea.vmem %s1629_s0, %s1228_s29  ;;  %1193 = vmatpush3.bf16.msra.mxu0 %v1283_v2 }
  0x14   : > { %s1436_s11 = scalar_lea.vmem %s263_s10, %s1134_s30  ;;  %1194 = vmatprep.subr.bf16.mxu0 %v1285_v9  ;;  %s1357_s30 = smov 64   ;;  %1177 = vmatpush3.bf16.msra.mxu1 %v1293_v25 }
  0x15   : > { %v1439_v3 = vld [vmem:[%s1436_s11 + $0x18] sm:$0xf]  ;;  %v1442_v4 = vld [vmem:[%s1436_s11 + $0x8] sm:$0xf]  ;;  %v297_v5 = vld [vmem:[%s1436_s11 + $0x20] sm:$0xf]  ;;  %1178 = vmatprep.subr.bf16.mxu1 %v1295_v29  ;;  %s1595_s10 = sadd.s32 %s1036_s9, %s1652_s8 }
  0x16   : > { %v1046_v6 = vcombine.low %v1439_v3, %v1439_v3  ;;  %v1044_v7 = vcombine.low %v1442_v4, %v1442_v4  ;;  %v1450_v8 = vld [vmem:[%s1436_s11 + $0x10] sm:$0xf]  ;;  %v1047_v10 = vcombine.low %v297_v5, %v297_v5  ;;  %v299_v13 = vld [vmem:[%s1436_s11 + $0x28] sm:$0xf]  ;;  %v294_v16 = vld [vmem:[%s1436_s11 + $0x14] sm:$0x1] }
  0x17   : > { %v1045_v11 = vcombine.low %v1450_v8, %v1450_v8  ;;  %1195 = vmatpush3.bf16.msra.mxu0 %v1285_v9  ;;  %v292_v17 = vld [vmem:[%s1436_s11 + $0xc] sm:$0x1]  ;;  %v1048_v19 = vcombine.low %v299_v13, %v299_v13  ;;  %v1484_v21 = vcombine.low %v1450_v8, %v294_v16  ;;  %v298_v23 = vld [vmem:[%s1436_s11 + $0x24] sm:$0x1]  ;;  %v296_v24 = vld [vmem:[%s1436_s11 + $0x1c] sm:$0x1] }
  0x18   : > { %317 = vrot.lane.b32.xlu1 %v1046_v6, %s1356_s14  ;;  %313 = vrot.lane.b32.xlu0 %v1044_v7, %s1356_s14  ;;  %v1487_v22 = vcombine.low %v1442_v4, %v292_v17  ;;  %v1053_v26 = vcombine.low %v297_v5, %v298_v23  ;;  %v1499_v27 = vcombine.low %v1439_v3, %v296_v24  ;;  %v300_v28 = vld [vmem:[%s1436_s11 + $0x2c] sm:$0x1]  ;;  %v289_v37 = vld [vmem:[%s1436_s11] sm:$0xf]  ;;  %s1037_s12 = sshll.u32 %s1595_s10, 2 }
  0x19   : > { %1196 = vmatprep.subr.bf16.mxu0 %v1286_v12  ;;  %v1054_v30 = vcombine.low %v299_v13, %v300_v28  ;;  %1179 = vmatpush3.bf16.msra.mxu1 %v1295_v29  ;;  %v290_v55 = vld [vmem:[%s1436_s11 + $0x4] sm:$0x1]  ;;  %v1298_v23 = vld [vmem:[%s1630_s1 + $0x88] sm:$0xff]   ;;  %s282_s27 = scalar_lea.vmem %s1634_s5, %s1037_s12 }
  0x1a   : > { %1180 = vmatprep.subr.bf16.mxu1 %v1297_v31  ;;  %v1049_v57 = vcombine.low %v289_v37, %v290_v55  ;;  %v1296_v7 = vld [vmem:[%s1630_s1 + $0x80] sm:$0xff]  }
  0x1b   : > { %1197 = vmatpush3.bf16.msra.mxu0 %v1286_v12 }
  0x1c   : > { %319 = vrot.lane.b32.xlu1 %v1047_v10, %s1356_s14  ;;  %315 = vrot.lane.b32.xlu0 %v1045_v11, %s1356_s14 }
  0x1d   : > { %1198 = vmatprep.subr.bf16.mxu0 %v1287_v15  ;;  %1181 = vmatpush3.bf16.msra.mxu1 %v1297_v31 }
  0x1e   : > { %1182 = vmatprep.subr.bf16.mxu1 %v1299_v32 }
  0x1f   : > { %1199 = vmatpush3.bf16.msra.mxu0 %v1287_v15 }
  0x20   : > { %326 = vrot.lane.b32.xlu1 %v1046_v6, %s1357_s30  ;;  %324 = vrot.lane.b32.xlu0 %v1045_v11, %s1357_s30 }
  0x21   : > { %1204 = vmatprep.subr.bf16.mxu0 %v1288_v20  ;;  %1183 = vmatpush3.bf16.msra.mxu1 %v1299_v32 }
  0x24   : > { %330 = vrot.lane.b32.xlu1 %v1048_v19, %s1357_s30  ;;  %328 = vrot.lane.b32.xlu0 %v1047_v10, %s1357_s30 }
  0x28   : > { %385 = vrot.lane.b32.xlu1 %v1484_v21, %s1356_s14  ;;  %383 = vrot.lane.b32.xlu0 %v1487_v22, %s1356_s14 }
  0x2c   : > { %389 = vrot.lane.b32.xlu1 %v1053_v26, %s1356_s14  ;;  %387 = vrot.lane.b32.xlu0 %v1499_v27, %s1356_s14  ;;  %s272_s14 = scalar_lea.vmem %s1633_s4, %s1037_s12 }
  0x30   : > { %396 = vrot.lane.b32.xlu1 %v1499_v27, %s1357_s30  ;;  %394 = vrot.lane.b32.xlu0 %v1484_v21, %s1357_s30 }
  0x34   : > { %400 = vrot.lane.b32.xlu1 %v1054_v30, %s1357_s30  ;;  %398 = vrot.lane.b32.xlu0 %v1053_v26, %s1357_s30 }
  0x8a   : > { %v318_v33 = vpop.permute.xlu1 %317  ;;  %v314_v34 = vpop.permute.xlu0 %313 }
  0x8b   : > { %v335_v38 = vsel %vm332_vm0, %v289_v37, %v314_v34  ;;  %v341_v45 = vsel %vm332_vm0, %v1450_v8, %v318_v33 }
  0x8e   : > { %v320_v35 = vpop.permute.xlu1 %319  ;;  %v316_v36 = vpop.permute.xlu0 %315 }
  0x8f   : > { %v338_v39 = vsel %vm332_vm0, %v1442_v4, %v316_v36  ;;  %v344_v46 = vsel %vm332_vm0, %v1439_v3, %v320_v35 }
  0x92   : > { %v327_v40 = vpop.permute.xlu1 %326  ;;  %v325_v41 = vpop.permute.xlu0 %324 }
  0x93   : > { %v349_v42 = vsel %vm345_vm1, %v338_v39, %v327_v40  ;;  %v347_v43 = vsel %vm345_vm1, %v335_v38, %v325_v41 }
  0x94   : > { %v1085_v44 = vcombine.low %v347_v43, %v349_v42 }
  0x96   : > { %v331_v47 = vpop.permute.xlu1 %330  ;;  %v329_v48 = vpop.permute.xlu0 %328  ;;  %1200 = vmatprep.mubr.msk.bf16.mxu0 %vm556_vm2, %v1085_v44 }
  0x97   : > { %v353_v49 = vsel %vm345_vm1, %v344_v46, %v331_v47  ;;  %v351_v50 = vsel %vm345_vm1, %v341_v45, %v329_v48 }
  0x98   : > { %v1086_v51 = vcombine.low %v351_v50, %v353_v49 }
  0x9a   : > { %v386_v53 = vpop.permute.xlu1 %385  ;;  %v384_v54 = vpop.permute.xlu0 %383  ;;  %1201 = vmatmul.mubr.msk.bf16.vlgmr.msra.gmra.mrb[0].mxu0 %vm556_vm2, %v1086_v51 }
  0x9b   : > { %1205 = vmatpush3.bf16.msra.mxu0 %v1288_v20  ;;  %v407_v61 = vsel %vm332_vm0, %v1487_v22, %v386_v53  ;;  %v404_v62 = vsel %vm332_vm0, %v1049_v57, %v384_v54 }
  0x9c   : > { %1206 = vmatprep.subr.bf16.mxu0 %v1290_v52 }
  0x9e   : > { %v390_v58 = vpop.permute.xlu1 %389  ;;  %v388_v59 = vpop.permute.xlu0 %387 }
  0x9f   : > { %1207 = vmatpush3.bf16.msra.mxu0 %v1290_v52  ;;  %v413_v8 = vsel %vm332_vm0, %v1499_v27, %v390_v58  ;;  %v410_v24 = vsel %vm332_vm0, %v1484_v21, %v388_v59 }
  0xa0   : > { %1208 = vmatprep.subr.bf16.mxu0 %v1292_v56 }
  0xa2   : > { %v397_v63 = vpop.permute.xlu1 %396  ;;  %v395_v0 = vpop.permute.xlu0 %394 }
  0xa3   : > { %v417_v1 = vsel %vm345_vm1, %v407_v61, %v397_v63  ;;  %v415_v2 = vsel %vm345_vm1, %v404_v62, %v395_v0  ;;  %1209 = vmatpush3.bf16.msra.mxu0 %v1292_v56 }
  0xa4   : > { %v1057_v3 = vcombine.low %v417_v1, %v417_v1  ;;  %v1058_v4 = vcombine.high %v417_v1, %v417_v1  ;;  %v1055_v5 = vcombine.low %v415_v2, %v415_v2  ;;  %v1056_v6 = vcombine.high %v415_v2, %v415_v2  ;;  %1210 = vmatprep.subr.bf16.mxu0 %v1294_v60 }
  0xa6   : > { %v460_v9 = vshrl.u32 %v1057_v3, 16  ;;  %v463_v10 = vshll.u32 %v1057_v3, 16  ;;  %v469_v11 = vshll.u32 %v1058_v4, 16  ;;  %v1096_v12 = vrot.slane %v1057_v3, 9  ;;  %v401_v16 = vpop.permute.xlu1 %400  ;;  %v399_v17 = vpop.permute.xlu0 %398 }
  0xa7   : > { %v722_v13 = vrot.slane %v1058_v4, 5  ;;  %v446_v14 = vshrl.u32 %v1055_v5, 16  ;;  %v449_v15 = vshll.u32 %v1055_v5, 16  ;;  %1211 = vmatpush3.bf16.msra.mxu0 %v1294_v60  ;;  %v455_v20 = vshll.u32 %v1056_v6, 16 }
  0xa8   : > { %v462_v18 = vrot.slane %v460_v9, 4  ;;  %v465_v19 = vrot.slane %v463_v10, 5  ;;  %v1095_v22 = vrot.slane %v1055_v5, 9  ;;  %1212 = vmatprep.subr.bf16.mxu0 %v1296_v7  ;;  %v718_v27 = vrot.slane %v1056_v6, 5  ;;  %v1147_v9 = vld [vmem:[%s272_s14 + $0x8] sm:$0xff]   ;;  %v1140_v10 = vld [vmem:[%s272_s14] sm:$0xff]  }
  0xa9   : > { %v448_v25 = vrot.slane %v446_v14, 4  ;;  %v451_v26 = vrot.slane %v449_v15, 5  ;;  %v421_v29 = vsel %vm345_vm1, %v413_v8, %v401_v16  ;;  %v419_v30 = vsel %vm345_vm1, %v410_v24, %v399_v17 }
  0xaa   : > { %v466_v31 = vor.u32 %v465_v19, %v462_v18  ;;  %v471_v32 = vrot.slane %v469_v11, 5  ;;  %v1061_v33 = vcombine.low %v421_v29, %v421_v29  ;;  %v1062_v34 = vcombine.high %v421_v29, %v421_v29 }
  0xab   : > { %v1059_v35 = vcombine.low %v419_v30, %v419_v30  ;;  %1213 = vmatpush3.bf16.msra.mxu0 %v1296_v7  ;;  %v457_v21 = vrot.slane %v455_v20, 5  ;;  %v1060_v36 = vcombine.high %v419_v30, %v419_v30  ;;  %v719_v37 = vsel %vm1561_vm6, %v1095_v22, %v718_v27 }
  0xac   : > { %v723_v38 = vsel %vm1561_vm6, %v1096_v12, %v722_v13  ;;  %1214 = vmatprep.subr.bf16.mxu0 %v1298_v23  ;;  %v488_v39 = vshrl.u32 %v1061_v33, 16  ;;  %v491_v40 = vshll.u32 %v1061_v33, 16  ;;  %v1098_v41 = vrot.slane %v1061_v33, 9  ;;  %v1121_v33 = vld [vmem:[%s1631_s2] ss:$0 sm:$0xff] }
  0xad   : > { %v452_v42 = vor.u32 %v451_v26, %v448_v25  ;;  %v730_v43 = vrot.slane %v1062_v34, 5  ;;  %v474_v44 = vshrl.u32 %v1059_v35, 16  ;;  %v477_v45 = vshll.u32 %v1059_v35, 16 }
  0xae   : > { %v467_v46 = vrot.slane %v466_v31, 4  ;;  %v490_v47 = vrot.slane %v488_v39, 4  ;;  %v493_v48 = vrot.slane %v491_v40, 5  ;;  %v497_v49 = vshll.u32 %v1062_v34, 16 }
  0xaf   : > { %v1097_v50 = vrot.slane %v1059_v35, 9  ;;  %1215 = vmatpush3.bf16.msra.mxu0 %v1298_v23  ;;  %v731_v52 = vsel %vm1561_vm6, %v1098_v41, %v730_v43  ;;  %v476_v53 = vrot.slane %v474_v44, 4  ;;  %v479_v54 = vrot.slane %v477_v45, 5 }
  0xb0   : > { %v483_v55 = vshll.u32 %v1060_v36, 16  ;;  %v494_v56 = vor.u32 %v493_v48, %v490_v47  ;;  %v726_v57 = vrot.slane %v1060_v36, 5  ;;  %v1111_v58 = vcombine.low %v719_v37, %v723_v38 }
  0xb1   : > { %v453_v59 = vrot.slane %v452_v42, 4  ;;  %v480_v60 = vor.u32 %v479_v54, %v476_v53  ;;  %v472_v61 = vsel %vm1573_vm8, %v467_v46, %v471_v32  ;;  %v499_v63 = vrot.slane %v497_v49, 5 }
  0xb2   : > { %v495_v62 = vrot.slane %v494_v56, 4  ;;  %v727_v0 = vsel %vm1561_vm6, %v1097_v50, %v726_v57  ;;  %1216 = vmatprep.mubr.msk.bf16.mxu0 %vm556_vm2, %v1111_v58  ;;  %v485_v3 = vrot.slane %v483_v55, 5  ;;  %v1145_v11 = vunpack.c.l.bf16 %v1147_v9 }
  0xb3   : > { %v458_v1 = vsel %vm1573_vm8, %v453_v59, %v457_v21  ;;  %v481_v2 = vrot.slane %v480_v60, 4  ;;  %v1112_v4 = vcombine.low %v727_v0, %v731_v52  ;;  %v1141_v12 = vunpack.c.l.bf16 %v1140_v10  ;;  %v1122_v21 = vld [vmem:[%s1632_s3] ss:$0 sm:$0xff] }
  0xb4   : > { %v1075_v5 = vcombine.low %v458_v1, %v472_v61  ;;  %v500_v6 = vsel %vm1573_vm8, %v495_v62, %v499_v63  ;;  %v1146_v13 = vunpack.c.h.bf16 %v1147_v9  ;;  %v1142_v14 = vunpack.c.h.bf16 %v1140_v10 }
  0xb5   : > { %1217 = vmatmul.mubr.msk.bf16.vlgmr.msra.gmra.mrb[0].mxu0 %vm556_vm2, %v1112_v4  ;;  %v486_v7 = vsel %vm1573_vm8, %v481_v2, %v485_v3  ;;  %v1125_v15 = vmul.f32 -1.442695, %v1145_v11  ;;  %v1123_v16 = vmul.f32 -1.442695, %v1141_v12 }
  0xb6   : > { %1184 = vmatprep.mubr.msk.bf16.mxu1 %vm556_vm2, %v1075_v5  ;;  %v1076_v8 = vcombine.low %v486_v7, %v500_v6  ;;  %v1126_v17 = vmul.f32 -1.442695, %v1146_v13  ;;  %v1124_v18 = vmul.f32 -1.442695, %v1142_v14 }
  0xb7   : > { %1300 = vpow2.f32 %v1125_v15 }
  0xb8   : > { %1185 = vmatmul.mubr.msk.bf16.vlgmr.msra.gmra.mrb[0].mxu1 %vm556_vm2, %v1076_v8  ;;  %1302 = vpow2.f32 %v1123_v16 }
  0xb9   : > { %1304 = vpow2.f32 %v1126_v17 }
  0xba   : > { %1306 = vpow2.f32 %v1124_v18 }
  0xc1   : > { %v1301_v19 = vpop.eup %1300 }
  0xc2   : > { %v1303_v20 = vpop.eup %1302  ;;  %v890_v24 = vadd.f32 1.0, %v1301_v19 }
  0xc3   : > { %v1305_v22 = vpop.eup %1304  ;;  %v888_v25 = vadd.f32 1.0, %v1303_v20 }
  0xc4   : > { %v1307_v23 = vpop.eup %1306  ;;  %v891_v26 = vadd.f32 1.0, %v1305_v22  ;;  %1308 = vrcp.f32 %v890_v24 }
  0xc5   : > { %v889_v27 = vadd.f32 1.0, %v1307_v23  ;;  %1310 = vrcp.f32 %v888_v25 }
  0xc6   : > { %1312 = vrcp.f32 %v891_v26 }
  0xc7   : > { %1314 = vrcp.f32 %v889_v27 }
  0xce   : > { %v1309_v41 = vpop.eup %1308 }
  0xcf   : > { %v1311_v44 = vpop.eup %1310 }
  0xd0   : > { %v1313_v47 = vpop.eup %1312 }
  0xd1   : > { %v1315_v50 = vpop.eup %1314 }
 0x188   : > { %v1218_v28 = vpop.f32.mrb[0].mxu0 }
 0x189   : > { %v827_v29 = vpop.f32.mrb[1].mxu0 }
 0x18a   : > { %v1219_v30 = vpop.f32.mrb[2].mxu0 }
 0x18b   : > { %v830_v31 = vpop.f32.mrb[3].mxu0  ;;  %v1186_v32 = vpop.f32.mrb[0].mxu1 }
 0x18c   : > { %v1220_v34 = vadd.f32 %v1218_v28, %v1186_v32  ;;  %v597_v35 = vpop.f32.mrb[1].mxu1 }
 0x18d   : > { %v1221_v36 = vadd.f32 %v827_v29, %v597_v35  ;;  %v1187_v37 = vpop.f32.mrb[2].mxu1 }
 0x18e   : > { %v855_v38 = vmul.f32 %v1220_v34, %v1121_v33  ;;  %v1222_v39 = vadd.f32 %v1219_v30, %v1187_v37  ;;  %v600_v40 = vpop.f32.mrb[3].mxu1 }
 0x18f   : > { %v853_v42 = vmul.f32 %v1221_v36, %v1121_v33  ;;  %v1223_v43 = vadd.f32 %v830_v31, %v600_v40 }
 0x190   : > { %v866_v45 = vadd.f32 %v1122_v21, %v855_v38  ;;  %v856_v46 = vmul.f32 %v1222_v39, %v1121_v33 }
 0x191   : > { %v864_v48 = vadd.f32 %v1122_v21, %v853_v42  ;;  %v854_v49 = vmul.f32 %v1223_v43, %v1121_v33 }
 0x192   : > { %v902_v51 = vmul.f32 %v1309_v41, %v866_v45  ;;  %v867_v52 = vadd.f32 %v1122_v21, %v856_v46 }
 0x193   : > { %v900_v53 = vmul.f32 %v1311_v44, %v864_v48  ;;  %v865_v54 = vadd.f32 %v1122_v21, %v854_v49 }
 0x194   : > { %v1137_v55 = vpack.c.bf16 %v902_v51, %v902_v51  ;;  %v903_v56 = vmul.f32 %v1313_v47, %v867_v52 }
 0x195   : > { %v1135_v57 = vpack.c.bf16 %v900_v53, %v900_v53  ;;  %v901_v58 = vmul.f32 %v1315_v50, %v865_v54 }
 0x196   : > { %923 = vst.msk [vmem:[%s282_s27 + $0x8] sm:$0xf] %vm920_vm9, %v1137_v55  ;;  %v1138_v59 = vpack.c.bf16 %v903_v56, %v903_v56 }
 0x197   : > { %921 = vst.msk [vmem:[%s282_s27] sm:$0xf] %vm920_vm9, %v1135_v57  ;;  %v1136_v60 = vpack.c.bf16 %v901_v58, %v901_v58 }
 0x198   : > { %924 = vst.msk [vmem:[%s282_s27 + $0xc] sm:$0xf] %vm920_vm9, %v1138_v59 }
 0x199   : > { %922 = vst.msk [vmem:[%s282_s27 + $0x4] sm:$0xf] %vm920_vm9, %v1136_v60 }
 0x19a PF: > { %s15_s22 = sadd.s32 1, %s1354_s22   ;;  %s1639_s18 = smov %s1346_s20 }
 0x19b   : > { %p12_p7 = scmp.ge.s32.totalorder %s15_s22, 6   ;;  %s1640_s19 = smov %s1350_s21 }
 0x19c   : > { %s1641_s20 = smov %s1644_s23  ;;  %s1642_s21 = smov %s1648_s24 }
 0x19d   :  { %14 = sbr.rel (!%p12_p7) target bundleno = 3 (0x3), region = 76 }

</bundles_post_ra>
